<compile_context>
chip_gen: v5e
topology: v5e:2x2
jax: 0.10.0
libtpu: 0.0.40
codegen_flags: <defaults>
</compile_context>

<pallas_src>
import functools

import numpy as np
import jax
import jax.numpy as jnp
from jax import lax
from jax.experimental import pallas as pl
from jax.experimental.pallas import tpu as pltpu


CPAD = 128  # lane-dense padded class axis: [attr logits | obj logits | zero pad]


# ---------------------------------------------------------------------------
# Single fused kernel: 1x1 conv (BN folded) + pool -> merged disentanglers ->
# row-stacked merged classifier + masked softmaxes. One batch tile per step.
# ---------------------------------------------------------------------------
def dbc_fused_kernel(
    x_ref,        # (b_tile, C, HW)   backbone features, NCHW-native (C,HW) per image
    wc_t_ref,     # (Cemb, C)   bf16  1x1 conv weight^T with BN2d scale folded in
    bc_ref,       # (Cemb, 1)   f32   folded BN2d shift
    dd_w_ref,     # (Cemb, 2*Cemb) bf16  merged [da | do] Linear weights, BN1d scale folded
    dd_b_ref,     # (1, 2*Cemb) f32   merged folded biases
    clf_w_ref,    # (Cemb, CPAD) bf16 merged [attr | obj | 0] classifier weight
    clf_b_ref,    # (1, CPAD)   f32   merged classifier bias
    out_ref,      # (b_tile, CPAD) f32  [attr probs | obj probs | zeros]
    *, hw, n_attrs, n_objs,
):
    f32 = jnp.float32
    bf16 = jnp.bfloat16
    b_tile = out_ref.shape[0]
    cemb = wc_t_ref.shape[0]
    inv_hw = f32(1.0 / hw)

    wc_t = wc_t_ref[...]          # (Cemb, C) bf16
    bc = bc_ref[...]              # (Cemb, 1) f32

    # -- 1) img_embedder (1x1 conv + folded BN2d + ReLU) + AdaptiveAvgPool2d ----
    # Per image: (Cemb, C) @ (C, HW) on the MXU, then pool over HW on the lane
    # axis (XLU reduction). b_tile is a compile-time constant -> static unroll.
    rows = []
    for i in range(b_tile):
        xi = x_ref[i].astype(bf16)                                      # (C, HW)
        zi = jnp.dot(wc_t, xi, preferred_element_type=f32)              # (Cemb, HW)
        zi = jnp.maximum(zi + bc, 0.0)
        rows.append(jnp.sum(zi, axis=1).reshape(1, cemb))               # (1, Cemb)
    img_feat = jnp.concatenate(rows, axis=0) * inv_hw                   # (b_tile, Cemb)

    # -- 2) Merged disentanglers 'da' | 'do' (Linear + folded BN1d + ReLU) ------
    dd = jnp.dot(img_feat.astype(bf16), dd_w_ref[...],
                 preferred_element_type=f32)
    dd = jnp.maximum(dd + dd_b_ref[...], 0.0)                           # (b_tile, 2*Cemb)

    # -- 3) Merged attr/obj classifier on row-stacked [img_da ; img_do] --------
    stacked = jnp.concatenate([dd[:, :cemb], dd[:, cemb:]], axis=0).astype(bf16)
    logits = jnp.dot(stacked, clf_w_ref[...],
                     preferred_element_type=f32) + clf_b_ref[...]       # (2*b_tile, CPAD)
    la = logits[:b_tile]   # attr logits (from img_da)
    lo = logits[b_tile:]   # obj  logits (from img_do)

    cls = lax.broadcasted_iota(jnp.int32, (b_tile, CPAD), 1)
    attr_mask = cls < n_attrs
    obj_mask = jnp.logical_and(cls >= n_attrs, cls < n_attrs + n_objs)
    neg = f32(-1e30)

    def masked_softmax(lg, mask):
        z = jnp.where(mask, lg, neg)
        m = jnp.max(z, axis=-1, keepdims=True)
        e = jnp.where(mask, jnp.exp(z - m), 0.0)
        inv = pl.reciprocal(jnp.sum(e, axis=-1, keepdims=True), approx=True)
        return e * inv

    # attr probs land in cols [0, n_attrs), obj probs in [n_attrs, n_attrs+n_objs)
    out_ref[...] = masked_softmax(la, attr_mask) + masked_softmax(lo, obj_mask)


# ---------------------------------------------------------------------------
# Wrapper: one gridded pallas_call for the whole eval forward after the backbone.
# ---------------------------------------------------------------------------
@functools.partial(jax.jit, static_argnames=("n_attrs", "n_objs", "b_tile"))
def dbc_val_forward(backbone_feat_nchw, kparams, *, n_attrs, n_objs, b_tile=8):
    """backbone_feat_nchw: (B, 512, H, W) f32 (output of feat_extractor)."""
    if n_attrs + n_objs > CPAD:
        raise ValueError(f"n_attrs + n_objs = {n_attrs + n_objs} exceeds CPAD={CPAD}")
    B, C, H, W = backbone_feat_nchw.shape
    hw = H * W
    emb = kparams["wc_t"].shape[0]

    # NCHW-native read: only a free (B, C, HW) reshape, no transpose HBM pass.
    x = backbone_feat_nchw.reshape(B, C, hw)
    b_pad = ((B + b_tile - 1) // b_tile) * b_tile
    if b_pad != B:
        x = jnp.pad(x, ((0, b_pad - B), (0, 0), (0, 0)))

    kernel = functools.partial(dbc_fused_kernel, hw=hw,
                               n_attrs=n_attrs, n_objs=n_objs)
    probs = pl.pallas_call(
        kernel,
        out_shape=jax.ShapeDtypeStruct((b_pad, CPAD), jnp.float32),
        grid=(b_pad // b_tile,),
        in_specs=[
            pl.BlockSpec((b_tile, C, hw), lambda b: (b, 0, 0)),   # batch-tiled input
            pl.BlockSpec((emb, C), lambda b: (0, 0)),             # wc_t
            pl.BlockSpec((emb, 1), lambda b: (0, 0)),             # bc
            pl.BlockSpec((emb, 2 * emb), lambda b: (0, 0)),       # dd_w
            pl.BlockSpec((1, 2 * emb), lambda b: (0, 0)),         # dd_b
            pl.BlockSpec((emb, CPAD), lambda b: (0, 0)),          # clf_w
            pl.BlockSpec((1, CPAD), lambda b: (0, 0)),            # clf_b
        ],
        out_specs=pl.BlockSpec((b_tile, CPAD), lambda b: (b, 0)),
        compiler_params=pltpu.CompilerParams(
            dimension_semantics=("parallel",)),
    )(x, kparams["wc_t"], kparams["bc"], kparams["dd_w"], kparams["dd_b"],
      kparams["clf_w"], kparams["clf_b"])

    probs = probs[:B]
    attr_pred = probs[:, :n_attrs]
    obj_pred = probs[:, n_attrs:n_attrs + n_objs]
    # All pair scores attr_pred[:, a] * obj_pred[:, o] as ONE outer product.
    pair_scores = attr_pred[:, :, None] * obj_pred[:, None, :]   # (B, n_attrs, n_objs)
    return attr_pred, obj_pred, pair_scores


# ---------------------------------------------------------------------------
# Parameter setup (deterministic, synthetic), host-side folding, JAX reference.
# ---------------------------------------------------------------------------
def make_raw_params(key, feat_dim, emb_dim, n_attrs, n_objs):
    """Raw module parameters (conv / BN2d / Linear+BN1d x2 / attr_clf / obj_clf)."""
    ks = jax.random.split(key, 8)
    s = 0.05

    def bn_stats(k, dim):
        k0, k1, k2, k3 = jax.random.split(k, 4)
        return dict(
            gamma=1.0 + 0.1 * jax.random.normal(k0, (dim,), jnp.float32),
            beta=0.1 * jax.random.normal(k1, (dim,), jnp.float32),
            mean=0.1 * jax.random.normal(k2, (dim,), jnp.float32),
            var=1.0 + 0.1 * jax.random.uniform(k3, (dim,), jnp.float32),
        )

    p = {}
    # img_embedder: Conv2d(feat_dim, emb_dim, 1, bias=False) weight (as (Cin, Cemb)) + BN2d
    p["conv_w"] = s * jax.random.normal(ks[0], (feat_dim, emb_dim), jnp.float32)
    for name, st in bn_stats(ks[1], emb_dim).items():
        p[f"bn2d_{name}"] = st
    # Disentanglers 'da' / 'do': Linear(emb, emb) + BN1d(emb)
    for i, name in enumerate(("da", "do")):
        k0, k1, k2 = jax.random.split(ks[2 + i], 3)
        p[f"{name}_w"] = s * jax.random.normal(k0, (emb_dim, emb_dim), jnp.float32)
        p[f"{name}_b"] = s * jax.random.normal(k1, (emb_dim,), jnp.float32)
        for sname, st in bn_stats(k2, emb_dim).items():
            p[f"{name}_bn_{sname}"] = st
    # attr_clf / obj_clf: MLP(emb, n_cls, 1, relu=False) == single Linear
    p["attr_w"] = s * jax.random.normal(ks[4], (emb_dim, n_attrs), jnp.float32)
    p["attr_b"] = s * jax.random.normal(ks[5], (n_attrs,), jnp.float32)
    p["obj_w"] = s * jax.random.normal(ks[6], (emb_dim, n_objs), jnp.float32)
    p["obj_b"] = s * jax.random.normal(ks[7], (n_objs,), jnp.float32)
    return p


def fold_params_for_kernel(raw, n_attrs, n_objs, eps=1e-5):
    """Fold all eval-mode BN scales into weights, shifts into biases; merge columns."""
    assert n_attrs + n_objs <= CPAD

    def bn_fold(prefix):
        s = raw[f"{prefix}_gamma"] / jnp.sqrt(raw[f"{prefix}_var"] + eps)
        return s, raw[f"{prefix}_beta"] - raw[f"{prefix}_mean"] * s

    emb = raw["conv_w"].shape[1]
    kp = {}

    s2, t2 = bn_fold("bn2d")
    kp["wc_t"] = (raw["conv_w"] * s2[None, :]).T.astype(jnp.bfloat16)      # (Cemb, C)
    kp["bc"] = t2.reshape(emb, 1).astype(jnp.float32)                      # (Cemb, 1)

    sa, ta = bn_fold("da_bn")
    so, to = bn_fold("do_bn")
    kp["dd_w"] = jnp.concatenate(
        [raw["da_w"] * sa[None, :], raw["do_w"] * so[None, :]], axis=1
    ).astype(jnp.bfloat16)                                                 # (Cemb, 2*Cemb)
    kp["dd_b"] = jnp.concatenate(
        [raw["da_b"] * sa + ta, raw["do_b"] * so + to]
    ).reshape(1, 2 * emb).astype(jnp.float32)                              # (1, 2*Cemb)

    clf_w = jnp.zeros((emb, CPAD), jnp.float32)
    clf_w = clf_w.at[:, :n_attrs].set(raw["attr_w"])
    clf_w = clf_w.at[:, n_attrs:n_attrs + n_objs].set(raw["obj_w"])
    clf_b = jnp.zeros((1, CPAD), jnp.float32)
    clf_b = clf_b.at[:, :n_attrs].set(raw["attr_b"][None, :])
    clf_b = clf_b.at[:, n_attrs:n_attrs + n_objs].set(raw["obj_b"][None, :])
    kp["clf_w"] = clf_w.astype(jnp.bfloat16)
    kp["clf_b"] = clf_b
    return kp


def reference_forward(x_nchw, rp, n_attrs, n_objs, eps=1e-5):
    """Pure-JAX f32 reference matching the PyTorch eval forward (unfolded BN)."""
    B, C, H, W = x_nchw.shape
    x = jnp.transpose(x_nchw, (0, 2, 3, 1)).reshape(B, H * W, C)
    y = jnp.einsum("bsc,ce->bse", x, rp["conv_w"])
    y = ((y - rp["bn2d_mean"]) / jnp.sqrt(rp["bn2d_var"] + eps)
         * rp["bn2d_gamma"] + rp["bn2d_beta"])
    y = jnp.maximum(y, 0.0)
    feat = jnp.mean(y, axis=1)

    def disentangle(f, prefix):
        z = f @ rp[f"{prefix}_w"] + rp[f"{prefix}_b"]
        z = ((z - rp[f"{prefix}_bn_mean"]) / jnp.sqrt(rp[f"{prefix}_bn_var"] + eps)
             * rp[f"{prefix}_bn_gamma"] + rp[f"{prefix}_bn_beta"])
        return jnp.maximum(z, 0.0)

    da = disentangle(feat, "da")
    do = disentangle(feat, "do")
    ap = jax.nn.softmax(da @ rp["attr_w"] + rp["attr_b"], axis=-1)
    op = jax.nn.softmax(do @ rp["obj_w"] + rp["obj_b"], axis=-1)
    return ap, op


if __name__ == "__main__":
    B, FEAT_DIM, H, W = 2, 512, 8, 8   # feat_dim=512 fixed by the resnet18 backbone
    EMB_DIM = 128
    # synthetic dataset vocabulary / pairs (mirrors dset.attrs / dset.objs / dset.pairs)
    attrs = ["red", "green", "blue", "old"]
    objs = ["cat", "dog", "car"]
    pairs = [(a, o) for a in attrs for o in objs]
    attr2idx = {a: i for i, a in enumerate(attrs)}
    obj2idx = {o: i for i, o in enumerate(objs)}

    key = jax.random.PRNGKey(0)
    k_x, k_p = jax.random.split(key)
    backbone_feat = jax.random.normal(k_x, (B, FEAT_DIM, H, W), jnp.float32)  # NCHW
    raw_params = make_raw_params(k_p, FEAT_DIM, EMB_DIM, len(attrs), len(objs))
    kparams = fold_params_for_kernel(raw_params, len(attrs), len(objs))

    attr_pred, obj_pred, pair_scores = dbc_val_forward(
        backbone_feat, kparams, n_attrs=len(attrs), n_objs=len(objs))
    jax.block_until_ready((attr_pred, obj_pred, pair_scores))

    # score dict (matches val_forward's {(attr, obj): score}), built host-side once
    scores_np = np.asarray(pair_scores)
    scores = {(a, o): scores_np[:, attr2idx[a], obj2idx[o]] for (a, o) in pairs}

    # sanity check against a pure-JAX f32 reference (kernel uses bf16 MXU inputs
    # with f32 accumulation + approx-reciprocal softmax denominators).
    ap_ref, op_ref = reference_forward(backbone_feat, raw_params, len(attrs), len(objs))
    tol = dict(rtol=5e-3, atol=5e-3)
    assert jnp.allclose(attr_pred, ap_ref, **tol), "attr_pred mismatch"
    assert jnp.allclose(obj_pred, op_ref, **tol), "obj_pred mismatch"
    ref_scores = np.asarray(ap_ref)[:, :, None] * np.asarray(op_ref)[:, None, :]
    assert np.allclose(scores_np, ref_scores, **tol), "scores mismatch"

    print("KERNEL_OK")
</pallas_src>

<mosaic_0001>
module attributes {stable_mosaic.version = 11 : i64} {
  func.func @dbc_fused_kernel(%arg0: i32, %arg1: memref<8x512x64xf32, #tpu.memory_space<vmem>>, %arg2: memref<128x512xbf16, #tpu.memory_space<vmem>>, %arg3: memref<128x1xf32, #tpu.memory_space<vmem>>, %arg4: memref<128x256xbf16, #tpu.memory_space<vmem>>, %arg5: memref<1x256xf32, #tpu.memory_space<vmem>>, %arg6: memref<128x128xbf16, #tpu.memory_space<vmem>>, %arg7: memref<1x128xf32, #tpu.memory_space<vmem>>, %arg8: memref<8x128xf32, #tpu.memory_space<vmem>>) attributes {dimension_semantics = [#tpu.dimension_semantics<parallel>], iteration_bounds = array<i64: 1>, scalar_prefetch = 0 : i64, scratch_operands = 0 : i64, tpu.core_type = #tpu.core_type<tc>, window_params = [{transform_indices = @transform_0, window_bounds = array<i64: 8, 512, 64>}, {pipeline_mode = #tpu.pipeline_mode<synchronous>, transform_indices = @transform_1, window_bounds = array<i64: 128, 512>}, {pipeline_mode = #tpu.pipeline_mode<synchronous>, transform_indices = @transform_2, window_bounds = array<i64: 128, 1>}, {pipeline_mode = #tpu.pipeline_mode<synchronous>, transform_indices = @transform_3, window_bounds = array<i64: 128, 256>}, {pipeline_mode = #tpu.pipeline_mode<synchronous>, transform_indices = @transform_4, window_bounds = array<i64: 1, 256>}, {pipeline_mode = #tpu.pipeline_mode<synchronous>, transform_indices = @transform_5, window_bounds = array<i64: 128, 128>}, {pipeline_mode = #tpu.pipeline_mode<synchronous>, transform_indices = @transform_6, window_bounds = array<i64: 1, 128>}, {transform_indices = @transform_7, window_bounds = array<i64: 8, 128>}]} {
    %c0 = arith.constant 0 : index
    %c0_0 = arith.constant 0 : index
    %0 = vector.load %arg2[%c0, %c0_0] : memref<128x512xbf16, #tpu.memory_space<vmem>>, vector<128x512xbf16>
    %c0_1 = arith.constant 0 : index
    %c0_2 = arith.constant 0 : index
    %1 = vector.load %arg3[%c0_1, %c0_2] : memref<128x1xf32, #tpu.memory_space<vmem>>, vector<128x1xf32>
    %c0_3 = arith.constant 0 : index
    %c0_4 = arith.constant 0 : index
    %c0_5 = arith.constant 0 : index
    %2 = vector.load %arg1[%c0_3, %c0_4, %c0_5] : memref<8x512x64xf32, #tpu.memory_space<vmem>>, vector<1x512x64xf32>
    %3 = vector.shape_cast %2 : vector<1x512x64xf32> to vector<512x64xf32>
    %4 = arith.truncf %3 : vector<512x64xf32> to vector<512x64xbf16>
    %cst = arith.constant dense<0.000000e+00> : vector<128x64xf32>
    %5 = tpu.matmul %0, %4, %cst {dimension_numbers = #tpu.dot_dimension_numbers<[1], [0], [0], [1], [0, 0, 1, 1], [], []>} : vector<128x512xbf16>, vector<512x64xbf16>, vector<128x64xf32> -> vector<128x64xf32>
    %6 = vector.broadcast %1 : vector<128x1xf32> to vector<128x64xf32>
    %7 = arith.addf %5, %6 : vector<128x64xf32>
    %cst_6 = arith.constant 0.000000e+00 : f32
    %8 = vector.broadcast %cst_6 : f32 to vector<128x64xf32>
    %9 = arith.maximumf %7, %8 : vector<128x64xf32>
    %cst_7 = arith.constant dense<0.000000e+00> : vector<128xf32>
    %10 = vector.multi_reduction <add>, %9, %cst_7 [1] : vector<128x64xf32> to vector<128xf32>
    %11 = vector.shape_cast %10 : vector<128xf32> to vector<1x128xf32>
    %c1 = arith.constant 1 : index
    %c0_8 = arith.constant 0 : index
    %c0_9 = arith.constant 0 : index
    %12 = vector.load %arg1[%c1, %c0_8, %c0_9] : memref<8x512x64xf32, #tpu.memory_space<vmem>>, vector<1x512x64xf32>
    %13 = vector.shape_cast %12 : vector<1x512x64xf32> to vector<512x64xf32>
    %14 = arith.truncf %13 : vector<512x64xf32> to vector<512x64xbf16>
    %cst_10 = arith.constant dense<0.000000e+00> : vector<128x64xf32>
    %15 = tpu.matmul %0, %14, %cst_10 {dimension_numbers = #tpu.dot_dimension_numbers<[1], [0], [0], [1], [0, 0, 1, 1], [], []>} : vector<128x512xbf16>, vector<512x64xbf16>, vector<128x64xf32> -> vector<128x64xf32>
    %16 = vector.broadcast %1 : vector<128x1xf32> to vector<128x64xf32>
    %17 = arith.addf %15, %16 : vector<128x64xf32>
    %cst_11 = arith.constant 0.000000e+00 : f32
    %18 = vector.broadcast %cst_11 : f32 to vector<128x64xf32>
    %19 = arith.maximumf %17, %18 : vector<128x64xf32>
    %cst_12 = arith.constant dense<0.000000e+00> : vector<128xf32>
    %20 = vector.multi_reduction <add>, %19, %cst_12 [1] : vector<128x64xf32> to vector<128xf32>
    %21 = vector.shape_cast %20 : vector<128xf32> to vector<1x128xf32>
    %c2 = arith.constant 2 : index
    %c0_13 = arith.constant 0 : index
    %c0_14 = arith.constant 0 : index
    %22 = vector.load %arg1[%c2, %c0_13, %c0_14] : memref<8x512x64xf32, #tpu.memory_space<vmem>>, vector<1x512x64xf32>
    %23 = vector.shape_cast %22 : vector<1x512x64xf32> to vector<512x64xf32>
    %24 = arith.truncf %23 : vector<512x64xf32> to vector<512x64xbf16>
    %cst_15 = arith.constant dense<0.000000e+00> : vector<128x64xf32>
    %25 = tpu.matmul %0, %24, %cst_15 {dimension_numbers = #tpu.dot_dimension_numbers<[1], [0], [0], [1], [0, 0, 1, 1], [], []>} : vector<128x512xbf16>, vector<512x64xbf16>, vector<128x64xf32> -> vector<128x64xf32>
    %26 = vector.broadcast %1 : vector<128x1xf32> to vector<128x64xf32>
    %27 = arith.addf %25, %26 : vector<128x64xf32>
    %cst_16 = arith.constant 0.000000e+00 : f32
    %28 = vector.broadcast %cst_16 : f32 to vector<128x64xf32>
    %29 = arith.maximumf %27, %28 : vector<128x64xf32>
    %cst_17 = arith.constant dense<0.000000e+00> : vector<128xf32>
    %30 = vector.multi_reduction <add>, %29, %cst_17 [1] : vector<128x64xf32> to vector<128xf32>
    %31 = vector.shape_cast %30 : vector<128xf32> to vector<1x128xf32>
    %c3 = arith.constant 3 : index
    %c0_18 = arith.constant 0 : index
    %c0_19 = arith.constant 0 : index
    %32 = vector.load %arg1[%c3, %c0_18, %c0_19] : memref<8x512x64xf32, #tpu.memory_space<vmem>>, vector<1x512x64xf32>
    %33 = vector.shape_cast %32 : vector<1x512x64xf32> to vector<512x64xf32>
    %34 = arith.truncf %33 : vector<512x64xf32> to vector<512x64xbf16>
    %cst_20 = arith.constant dense<0.000000e+00> : vector<128x64xf32>
    %35 = tpu.matmul %0, %34, %cst_20 {dimension_numbers = #tpu.dot_dimension_numbers<[1], [0], [0], [1], [0, 0, 1, 1], [], []>} : vector<128x512xbf16>, vector<512x64xbf16>, vector<128x64xf32> -> vector<128x64xf32>
    %36 = vector.broadcast %1 : vector<128x1xf32> to vector<128x64xf32>
    %37 = arith.addf %35, %36 : vector<128x64xf32>
    %cst_21 = arith.constant 0.000000e+00 : f32
    %38 = vector.broadcast %cst_21 : f32 to vector<128x64xf32>
    %39 = arith.maximumf %37, %38 : vector<128x64xf32>
    %cst_22 = arith.constant dense<0.000000e+00> : vector<128xf32>
    %40 = vector.multi_reduction <add>, %39, %cst_22 [1] : vector<128x64xf32> to vector<128xf32>
    %41 = vector.shape_cast %40 : vector<128xf32> to vector<1x128xf32>
    %c4 = arith.constant 4 : index
    %c0_23 = arith.constant 0 : index
    %c0_24 = arith.constant 0 : index
    %42 = vector.load %arg1[%c4, %c0_23, %c0_24] : memref<8x512x64xf32, #tpu.memory_space<vmem>>, vector<1x512x64xf32>
    %43 = vector.shape_cast %42 : vector<1x512x64xf32> to vector<512x64xf32>
    %44 = arith.truncf %43 : vector<512x64xf32> to vector<512x64xbf16>
    %cst_25 = arith.constant dense<0.000000e+00> : vector<128x64xf32>
    %45 = tpu.matmul %0, %44, %cst_25 {dimension_numbers = #tpu.dot_dimension_numbers<[1], [0], [0], [1], [0, 0, 1, 1], [], []>} : vector<128x512xbf16>, vector<512x64xbf16>, vector<128x64xf32> -> vector<128x64xf32>
    %46 = vector.broadcast %1 : vector<128x1xf32> to vector<128x64xf32>
    %47 = arith.addf %45, %46 : vector<128x64xf32>
    %cst_26 = arith.constant 0.000000e+00 : f32
    %48 = vector.broadcast %cst_26 : f32 to vector<128x64xf32>
    %49 = arith.maximumf %47, %48 : vector<128x64xf32>
    %cst_27 = arith.constant dense<0.000000e+00> : vector<128xf32>
    %50 = vector.multi_reduction <add>, %49, %cst_27 [1] : vector<128x64xf32> to vector<128xf32>
    %51 = vector.shape_cast %50 : vector<128xf32> to vector<1x128xf32>
    %c5 = arith.constant 5 : index
    %c0_28 = arith.constant 0 : index
    %c0_29 = arith.constant 0 : index
    %52 = vector.load %arg1[%c5, %c0_28, %c0_29] : memref<8x512x64xf32, #tpu.memory_space<vmem>>, vector<1x512x64xf32>
    %53 = vector.shape_cast %52 : vector<1x512x64xf32> to vector<512x64xf32>
    %54 = arith.truncf %53 : vector<512x64xf32> to vector<512x64xbf16>
    %cst_30 = arith.constant dense<0.000000e+00> : vector<128x64xf32>
    %55 = tpu.matmul %0, %54, %cst_30 {dimension_numbers = #tpu.dot_dimension_numbers<[1], [0], [0], [1], [0, 0, 1, 1], [], []>} : vector<128x512xbf16>, vector<512x64xbf16>, vector<128x64xf32> -> vector<128x64xf32>
    %56 = vector.broadcast %1 : vector<128x1xf32> to vector<128x64xf32>
    %57 = arith.addf %55, %56 : vector<128x64xf32>
    %cst_31 = arith.constant 0.000000e+00 : f32
    %58 = vector.broadcast %cst_31 : f32 to vector<128x64xf32>
    %59 = arith.maximumf %57, %58 : vector<128x64xf32>
    %cst_32 = arith.constant dense<0.000000e+00> : vector<128xf32>
    %60 = vector.multi_reduction <add>, %59, %cst_32 [1] : vector<128x64xf32> to vector<128xf32>
    %61 = vector.shape_cast %60 : vector<128xf32> to vector<1x128xf32>
    %c6 = arith.constant 6 : index
    %c0_33 = arith.constant 0 : index
    %c0_34 = arith.constant 0 : index
    %62 = vector.load %arg1[%c6, %c0_33, %c0_34] : memref<8x512x64xf32, #tpu.memory_space<vmem>>, vector<1x512x64xf32>
    %63 = vector.shape_cast %62 : vector<1x512x64xf32> to vector<512x64xf32>
    %64 = arith.truncf %63 : vector<512x64xf32> to vector<512x64xbf16>
    %cst_35 = arith.constant dense<0.000000e+00> : vector<128x64xf32>
    %65 = tpu.matmul %0, %64, %cst_35 {dimension_numbers = #tpu.dot_dimension_numbers<[1], [0], [0], [1], [0, 0, 1, 1], [], []>} : vector<128x512xbf16>, vector<512x64xbf16>, vector<128x64xf32> -> vector<128x64xf32>
    %66 = vector.broadcast %1 : vector<128x1xf32> to vector<128x64xf32>
    %67 = arith.addf %65, %66 : vector<128x64xf32>
    %cst_36 = arith.constant 0.000000e+00 : f32
    %68 = vector.broadcast %cst_36 : f32 to vector<128x64xf32>
    %69 = arith.maximumf %67, %68 : vector<128x64xf32>
    %cst_37 = arith.constant dense<0.000000e+00> : vector<128xf32>
    %70 = vector.multi_reduction <add>, %69, %cst_37 [1] : vector<128x64xf32> to vector<128xf32>
    %71 = vector.shape_cast %70 : vector<128xf32> to vector<1x128xf32>
    %c7 = arith.constant 7 : index
    %c0_38 = arith.constant 0 : index
    %c0_39 = arith.constant 0 : index
    %72 = vector.load %arg1[%c7, %c0_38, %c0_39] : memref<8x512x64xf32, #tpu.memory_space<vmem>>, vector<1x512x64xf32>
    %73 = vector.shape_cast %72 : vector<1x512x64xf32> to vector<512x64xf32>
    %74 = arith.truncf %73 : vector<512x64xf32> to vector<512x64xbf16>
    %cst_40 = arith.constant dense<0.000000e+00> : vector<128x64xf32>
    %75 = tpu.matmul %0, %74, %cst_40 {dimension_numbers = #tpu.dot_dimension_numbers<[1], [0], [0], [1], [0, 0, 1, 1], [], []>} : vector<128x512xbf16>, vector<512x64xbf16>, vector<128x64xf32> -> vector<128x64xf32>
    %76 = vector.broadcast %1 : vector<128x1xf32> to vector<128x64xf32>
    %77 = arith.addf %75, %76 : vector<128x64xf32>
    %cst_41 = arith.constant 0.000000e+00 : f32
    %78 = vector.broadcast %cst_41 : f32 to vector<128x64xf32>
    %79 = arith.maximumf %77, %78 : vector<128x64xf32>
    %cst_42 = arith.constant dense<0.000000e+00> : vector<128xf32>
    %80 = vector.multi_reduction <add>, %79, %cst_42 [1] : vector<128x64xf32> to vector<128xf32>
    %81 = vector.shape_cast %80 : vector<128xf32> to vector<1x128xf32>
    %82 = tpu.concatenate %11, %21, %31, %41, %51, %61, %71, %81 in 0 : vector<1x128xf32>, vector<1x128xf32>, vector<1x128xf32>, vector<1x128xf32>, vector<1x128xf32>, vector<1x128xf32>, vector<1x128xf32>, vector<1x128xf32> -> vector<8x128xf32>
    %cst_43 = arith.constant 1.562500e-02 : f32
    %83 = vector.broadcast %cst_43 : f32 to vector<8x128xf32>
    %84 = arith.mulf %82, %83 : vector<8x128xf32>
    %85 = arith.truncf %84 : vector<8x128xf32> to vector<8x128xbf16>
    %c0_44 = arith.constant 0 : index
    %c0_45 = arith.constant 0 : index
    %86 = vector.load %arg4[%c0_44, %c0_45] : memref<128x256xbf16, #tpu.memory_space<vmem>>, vector<128x256xbf16>
    %cst_46 = arith.constant dense<0.000000e+00> : vector<8x256xf32>
    %87 = tpu.matmul %85, %86, %cst_46 {dimension_numbers = #tpu.dot_dimension_numbers<[1], [0], [0], [1], [0, 0, 1, 1], [], []>} : vector<8x128xbf16>, vector<128x256xbf16>, vector<8x256xf32> -> vector<8x256xf32>
    %c0_47 = arith.constant 0 : index
    %c0_48 = arith.constant 0 : index
    %88 = vector.load %arg5[%c0_47, %c0_48] : memref<1x256xf32, #tpu.memory_space<vmem>>, vector<1x256xf32>
    %89 = vector.broadcast %88 : vector<1x256xf32> to vector<8x256xf32>
    %90 = arith.addf %87, %89 : vector<8x256xf32>
    %cst_49 = arith.constant 0.000000e+00 : f32
    %91 = vector.broadcast %cst_49 : f32 to vector<8x256xf32>
    %92 = arith.maximumf %90, %91 : vector<8x256xf32>
    %93 = vector.extract_strided_slice %92 {offsets = [0, 0], sizes = [8, 128], strides = [1, 1]} : vector<8x256xf32> to vector<8x128xf32>
    %94 = vector.extract_strided_slice %92 {offsets = [0, 128], sizes = [8, 128], strides = [1, 1]} : vector<8x256xf32> to vector<8x128xf32>
    %95 = tpu.concatenate %93, %94 in 0 : vector<8x128xf32>, vector<8x128xf32> -> vector<16x128xf32>
    %96 = arith.truncf %95 : vector<16x128xf32> to vector<16x128xbf16>
    %c0_50 = arith.constant 0 : index
    %c0_51 = arith.constant 0 : index
    %97 = vector.load %arg6[%c0_50, %c0_51] : memref<128x128xbf16, #tpu.memory_space<vmem>>, vector<128x128xbf16>
    %cst_52 = arith.constant dense<0.000000e+00> : vector<16x128xf32>
    %98 = tpu.matmul %96, %97, %cst_52 {dimension_numbers = #tpu.dot_dimension_numbers<[1], [0], [0], [1], [0, 0, 1, 1], [], []>} : vector<16x128xbf16>, vector<128x128xbf16>, vector<16x128xf32> -> vector<16x128xf32>
    %c0_53 = arith.constant 0 : index
    %c0_54 = arith.constant 0 : index
    %99 = vector.load %arg7[%c0_53, %c0_54] : memref<1x128xf32, #tpu.memory_space<vmem>>, vector<1x128xf32>
    %100 = vector.broadcast %99 : vector<1x128xf32> to vector<16x128xf32>
    %101 = arith.addf %98, %100 : vector<16x128xf32>
    %102 = vector.extract_strided_slice %101 {offsets = [0, 0], sizes = [8, 128], strides = [1, 1]} : vector<16x128xf32> to vector<8x128xf32>
    %103 = vector.extract_strided_slice %101 {offsets = [8, 0], sizes = [8, 128], strides = [1, 1]} : vector<16x128xf32> to vector<8x128xf32>
    %104 = tpu.iota {dimensions = array<i32: 1>} : vector<8x128xi32>
    %c4_i32 = arith.constant 4 : i32
    %105 = vector.broadcast %c4_i32 : i32 to vector<8x128xi32>
    %106 = arith.cmpi slt, %104, %105 : vector<8x128xi32>
    %c4_i32_55 = arith.constant 4 : i32
    %107 = vector.broadcast %c4_i32_55 : i32 to vector<8x128xi32>
    %108 = arith.cmpi sge, %104, %107 : vector<8x128xi32>
    %c7_i32 = arith.constant 7 : i32
    %109 = vector.broadcast %c7_i32 : i32 to vector<8x128xi32>
    %110 = arith.cmpi slt, %104, %109 : vector<8x128xi32>
    %111 = arith.andi %108, %110 : vector<8x128xi1>
    %cst_56 = arith.constant -1.000000e+30 : f32
    %112 = vector.broadcast %cst_56 : f32 to vector<8x128xf32>
    %113 = arith.select %106, %102, %112 : vector<8x128xi1>, vector<8x128xf32>
    %cst_57 = arith.constant dense<0xFF800000> : vector<8xf32>
    %114 = vector.multi_reduction <maximumf>, %113, %cst_57 [1] : vector<8x128xf32> to vector<8xf32>
    %115 = vector.shape_cast %114 : vector<8xf32> to vector<8x1xf32>
    %116 = vector.broadcast %115 : vector<8x1xf32> to vector<8x128xf32>
    %117 = arith.subf %113, %116 : vector<8x128xf32>
    %118 = math.exp %117 : vector<8x128xf32>
    %cst_58 = arith.constant 0.000000e+00 : f32
    %119 = vector.broadcast %cst_58 : f32 to vector<8x128xf32>
    %120 = arith.select %106, %118, %119 : vector<8x128xi1>, vector<8x128xf32>
    %cst_59 = arith.constant dense<0.000000e+00> : vector<8xf32>
    %121 = vector.multi_reduction <add>, %120, %cst_59 [1] : vector<8x128xf32> to vector<8xf32>
    %122 = vector.shape_cast %121 : vector<8xf32> to vector<8x1xf32>
    %123 = tpu.reciprocal %122 {approx = true} : vector<8x1xf32> -> vector<8x1xf32>
    %124 = vector.broadcast %123 : vector<8x1xf32> to vector<8x128xf32>
    %125 = arith.mulf %120, %124 : vector<8x128xf32>
    %cst_60 = arith.constant -1.000000e+30 : f32
    %126 = vector.broadcast %cst_60 : f32 to vector<8x128xf32>
    %127 = arith.select %111, %103, %126 : vector<8x128xi1>, vector<8x128xf32>
    %cst_61 = arith.constant dense<0xFF800000> : vector<8xf32>
    %128 = vector.multi_reduction <maximumf>, %127, %cst_61 [1] : vector<8x128xf32> to vector<8xf32>
    %129 = vector.shape_cast %128 : vector<8xf32> to vector<8x1xf32>
    %130 = vector.broadcast %129 : vector<8x1xf32> to vector<8x128xf32>
    %131 = arith.subf %127, %130 : vector<8x128xf32>
    %132 = math.exp %131 : vector<8x128xf32>
    %cst_62 = arith.constant 0.000000e+00 : f32
    %133 = vector.broadcast %cst_62 : f32 to vector<8x128xf32>
    %134 = arith.select %111, %132, %133 : vector<8x128xi1>, vector<8x128xf32>
    %cst_63 = arith.constant dense<0.000000e+00> : vector<8xf32>
    %135 = vector.multi_reduction <add>, %134, %cst_63 [1] : vector<8x128xf32> to vector<8xf32>
    %136 = vector.shape_cast %135 : vector<8xf32> to vector<8x1xf32>
    %137 = tpu.reciprocal %136 {approx = true} : vector<8x1xf32> -> vector<8x1xf32>
    %138 = vector.broadcast %137 : vector<8x1xf32> to vector<8x128xf32>
    %139 = arith.mulf %134, %138 : vector<8x128xf32>
    %140 = arith.addf %125, %139 : vector<8x128xf32>
    %c0_64 = arith.constant 0 : index
    %c0_65 = arith.constant 0 : index
    %141 = vector.load %arg8[%c0_64, %c0_65] : memref<8x128xf32, #tpu.memory_space<vmem>>, vector<8x128xf32>
    tpu.vector_store %arg8[%c0_64, %c0_65], %140 {strides = array<i32>} : memref<8x128xf32, #tpu.memory_space<vmem>>, vector<8x128xf32>,
    return
  }
  func.func @transform_0(%arg0: i32) -> (i32, i32, i32) {
    %c0_i32 = arith.constant 0 : i32
    %c0_i32_0 = arith.constant 0 : i32
    %c0_i32_1 = arith.constant 0 : i32
    return %arg0, %c0_i32, %c0_i32_0 : i32, i32, i32
  }
  func.func @transform_1(%arg0: i32) -> (i32, i32) {
    %c0_i32 = arith.constant 0 : i32
    %c0_i32_0 = arith.constant 0 : i32
    %c0_i32_1 = arith.constant 0 : i32
    return %c0_i32, %c0_i32_0 : i32, i32
  }
  func.func @transform_2(%arg0: i32) -> (i32, i32) {
    %c0_i32 = arith.constant 0 : i32
    %c0_i32_0 = arith.constant 0 : i32
    %c0_i32_1 = arith.constant 0 : i32
    return %c0_i32, %c0_i32_0 : i32, i32
  }
  func.func @transform_3(%arg0: i32) -> (i32, i32) {
    %c0_i32 = arith.constant 0 : i32
    %c0_i32_0 = arith.constant 0 : i32
    %c0_i32_1 = arith.constant 0 : i32
    return %c0_i32, %c0_i32_0 : i32, i32
  }
  func.func @transform_4(%arg0: i32) -> (i32, i32) {
    %c0_i32 = arith.constant 0 : i32
    %c0_i32_0 = arith.constant 0 : i32
    %c0_i32_1 = arith.constant 0 : i32
    return %c0_i32, %c0_i32_0 : i32, i32
  }
  func.func @transform_5(%arg0: i32) -> (i32, i32) {
    %c0_i32 = arith.constant 0 : i32
    %c0_i32_0 = arith.constant 0 : i32
    %c0_i32_1 = arith.constant 0 : i32
    return %c0_i32, %c0_i32_0 : i32, i32
  }
  func.func @transform_6(%arg0: i32) -> (i32, i32) {
    %c0_i32 = arith.constant 0 : i32
    %c0_i32_0 = arith.constant 0 : i32
    %c0_i32_1 = arith.constant 0 : i32
    return %c0_i32, %c0_i32_0 : i32, i32
  }
  func.func @transform_7(%arg0: i32) -> (i32, i32) {
    %c0_i32 = arith.constant 0 : i32
    %c0_i32_0 = arith.constant 0 : i32
    return %arg0, %c0_i32 : i32, i32
  }
}

</mosaic_0001>

<bundles_post_ra>
// kernel: dbc_val_forward.1
= control target key start
LH: loop header
LB: loop body
LE: loop exit
PB: predicated region body
PF: predicated region fallthrough
CT: control target
= control target key end

     0   :  { %v4588_v29 = vmov 0   ;;  %vm622_vm0 = vcmask 523264   ;;  %vm3191_vm1 = vcmask 130112   ;;  %vm3195_vm2 = vcmask 195712   ;;  %s7491_s0 = inlined_call_operand.vmem [shape: f32[8,512,64], index: 0, kind: input, shape index: {}]   ;;  %s7492_s1 = inlined_call_operand.vmem [shape: bf16[128,512], index: 1, kind: input, shape index: {}]   ;;  %s7493_s2 = inlined_call_operand.vmem [shape: f32[128,1], index: 2, kind: input, shape index: {}]   ;;  %s7494_s3 = inlined_call_operand.vmem [shape: bf16[128,256], index: 3, kind: input, shape index: {}]   ;;  %s7495_s5 = inlined_call_operand.vmem [shape: bf16[128,128], index: 5, kind: input, shape index: {}]   ;;  %s7496_s6 = inlined_call_operand.vmem [shape: f32[1,128], index: 6, kind: input, shape index: {}]   ;;  %s7497_s4 = inlined_call_operand.vmem [shape: f32[1,256], index: 4, kind: input, shape index: {}]   ;;  %s7498_s7 = inlined_call_operand.vmem [shape: f32[8,128], index: 7, kind: output, shape index: {}]  }
   0x1   :  { %v88_v0 = vld [vmem:[%s7491_s0 + $0x70] sm:$0xff]  ;;  %v89_v1 = vld [vmem:[%s7491_s0 + $0x78] sm:$0xff]  ;;  %v86_v11 = vld [vmem:[%s7491_s0 + $0x60] sm:$0xff]  ;;  %4576 = vset.pattern.permute.xlu0 %v4588_v29  ;;  %4577 = vset.pattern.permute.xlu1 %v4588_v29  ;;  %vm3199_vm3 = vcmask 261312   ;;  %vm3203_vm4 = vcmask 326912   ;;  %vm3207_vm5 = vcmask 392512  }
   0x2   :  { %v104_v2 = vld [vmem:[%s7491_s0 + $0xf0] sm:$0xff]  ;;  %v145_v3 = vpack.c.bf16 %v89_v1, %v88_v0  ;;  %v105_v4 = vld [vmem:[%s7491_s0 + $0xf8] sm:$0xff]  ;;  %v87_v13 = vld [vmem:[%s7491_s0 + $0x68] sm:$0xff]  ;;  %4578 = vset.pattern.permute.xlu2 %v4588_v29  ;;  %vm3211_vm6 = vcmask 458112   ;;  %vm3215_vm7 = vcmask 523712   ;;  %vm3219_vm8 = vcmask 589312  }
   0x3   :  { %v120_v5 = vld [vmem:[%s7491_s0 + $0x170] sm:$0xff]  ;;  %v121_v6 = vld [vmem:[%s7491_s0 + $0x178] sm:$0xff]  ;;  %v153_v7 = vpack.c.bf16 %v105_v4, %v104_v2  ;;  %v102_v14 = vld [vmem:[%s7491_s0 + $0xe0] sm:$0xff]  ;;  %v144_v16 = vpack.c.bf16 %v87_v13, %v86_v11  ;;  %vm3223_vm9 = vcmask 654912   ;;  %vm3227_vm10 = vcmask 720512  }
   0x4   :  { %v161_v8 = vpack.c.bf16 %v121_v6, %v120_v5  ;;  %v136_v9 = vld [vmem:[%s7491_s0 + $0x1f0] sm:$0xff]  ;;  %v137_v10 = vld [vmem:[%s7491_s0 + $0x1f8] sm:$0xff]  ;;  %410 = vmatpush.bf16.msra.mxu0 %v145_v3  ;;  %v103_v15 = vld [vmem:[%s7491_s0 + $0xe8] sm:$0xff]  ;;  %vm3231_vm11 = vcmask 786112   ;;  %vm3235_vm12 = vcmask 851712   ;;  %vm7555_vm13 = vcmask 917312  }
   0x5   :  { %v169_v12 = vpack.c.bf16 %v137_v10, %v136_v9  ;;  %459 = vmatpush.bf16.msra.mxu1 %v153_v7  ;;  %v152_v17 = vpack.c.bf16 %v103_v15, %v102_v14  ;;  %v118_v18 = vld [vmem:[%s7491_s0 + $0x160] sm:$0xff]  ;;  %v119_v19 = vld [vmem:[%s7491_s0 + $0x168] sm:$0xff]  ;;  %v84_v23 = vld [vmem:[%s7491_s0 + $0x50] sm:$0xff]  ;;  %vm3243_vm14 = vcmask 982912   ;;  %vm3247_vm15 = vcmask 1048512  }
   0x6   :  { %508 = vmatpush.bf16.msra.mxu2 %v161_v8  ;;  %v134_v20 = vld [vmem:[%s7491_s0 + $0x1e0] sm:$0xff]  ;;  %v160_v21 = vpack.c.bf16 %v119_v19, %v118_v18  ;;  %v135_v22 = vld [vmem:[%s7491_s0 + $0x1e8] sm:$0xff]  ;;  %v85_v24 = vld [vmem:[%s7491_s0 + $0x58] sm:$0xff] }
   0x7   :  { %557 = vmatpush.bf16.msra.mxu3 %v169_v12  ;;  %v168_v25 = vpack.c.bf16 %v135_v22, %v134_v20  ;;  %v100_v26 = vld [vmem:[%s7491_s0 + $0xd0] sm:$0xff]  ;;  %v101_v27 = vld [vmem:[%s7491_s0 + $0xd8] sm:$0xff]  ;;  %v143_v30 = vpack.c.bf16 %v85_v24, %v84_v23  ;;  %v82_v36 = vld [vmem:[%s7491_s0 + $0x40] sm:$0xff] }
   0x8   :  { %v116_v28 = vld [vmem:[%s7491_s0 + $0x150] sm:$0xff]  ;;  %411 = vmatpush.bf16.msra.mxu0 %v144_v16  ;;  %v117_v31 = vld [vmem:[%s7491_s0 + $0x158] sm:$0xff]  ;;  %v151_v34 = vpack.c.bf16 %v101_v27, %v100_v26  ;;  %v83_v37 = vld [vmem:[%s7491_s0 + $0x48] sm:$0xff] }
   0x9   :  { %v132_v32 = vld [vmem:[%s7491_s0 + $0x1d0] sm:$0xff]  ;;  %v133_v33 = vld [vmem:[%s7491_s0 + $0x1d8] sm:$0xff]  ;;  %460 = vmatpush.bf16.msra.mxu1 %v152_v17  ;;  %v159_v35 = vpack.c.bf16 %v117_v31, %v116_v28  ;;  %v98_v38 = vld [vmem:[%s7491_s0 + $0xc0] sm:$0xff]  ;;  %v142_v45 = vpack.c.bf16 %v83_v37, %v82_v36 }
   0xa   :  { %509 = vmatpush.bf16.msra.mxu2 %v160_v21  ;;  %v167_v39 = vpack.c.bf16 %v133_v33, %v132_v32  ;;  %v99_v40 = vld [vmem:[%s7491_s0 + $0xc8] sm:$0xff]  ;;  %v114_v41 = vld [vmem:[%s7491_s0 + $0x140] sm:$0xff]  ;;  %v80_v48 = vld [vmem:[%s7491_s0 + $0x30] sm:$0xff] }
   0xb   :  { %558 = vmatpush.bf16.msra.mxu3 %v168_v25  ;;  %v115_v42 = vld [vmem:[%s7491_s0 + $0x148] sm:$0xff]  ;;  %v130_v43 = vld [vmem:[%s7491_s0 + $0x1c0] sm:$0xff]  ;;  %v150_v46 = vpack.c.bf16 %v99_v40, %v98_v38  ;;  %v81_v49 = vld [vmem:[%s7491_s0 + $0x38] sm:$0xff] }
   0xc   :  { %v131_v44 = vld [vmem:[%s7491_s0 + $0x1c8] sm:$0xff]  ;;  %412 = vmatpush.bf16.msra.mxu0 %v143_v30  ;;  %v158_v47 = vpack.c.bf16 %v115_v42, %v114_v41  ;;  %v96_v50 = vld [vmem:[%s7491_s0 + $0xb0] sm:$0xff]  ;;  %v97_v52 = vld [vmem:[%s7491_s0 + $0xb8] sm:$0xff]  ;;  %v141_v57 = vpack.c.bf16 %v81_v49, %v80_v48 }
   0xd   :  { %461 = vmatpush.bf16.msra.mxu1 %v151_v34  ;;  %v166_v51 = vpack.c.bf16 %v131_v44, %v130_v43  ;;  %v112_v53 = vld [vmem:[%s7491_s0 + $0x130] sm:$0xff]  ;;  %v113_v54 = vld [vmem:[%s7491_s0 + $0x138] sm:$0xff]  ;;  %v149_v58 = vpack.c.bf16 %v97_v52, %v96_v50  ;;  %v78_v60 = vld [vmem:[%s7491_s0 + $0x20] sm:$0xff] }
   0xe   :  { %510 = vmatpush.bf16.msra.mxu2 %v159_v35  ;;  %v128_v55 = vld [vmem:[%s7491_s0 + $0x1b0] sm:$0xff]  ;;  %v129_v56 = vld [vmem:[%s7491_s0 + $0x1b8] sm:$0xff]  ;;  %v157_v59 = vpack.c.bf16 %v113_v54, %v112_v53  ;;  %v79_v61 = vld [vmem:[%s7491_s0 + $0x28] sm:$0xff] }
   0xf   :  { %559 = vmatpush.bf16.msra.mxu3 %v167_v39  ;;  %v94_v62 = vld [vmem:[%s7491_s0 + $0xa0] sm:$0xff]  ;;  %v165_v63 = vpack.c.bf16 %v129_v56, %v128_v55  ;;  %v95_v0 = vld [vmem:[%s7491_s0 + $0xa8] sm:$0xff]  ;;  %v140_v5 = vpack.c.bf16 %v79_v61, %v78_v60  ;;  %v76_v8 = vld [vmem:[%s7491_s0 + $0x10] sm:$0xff] }
  0x10   :  { %413 = vmatpush.bf16.msra.mxu0 %v142_v45  ;;  %v110_v1 = vld [vmem:[%s7491_s0 + $0x120] sm:$0xff]  ;;  %v111_v2 = vld [vmem:[%s7491_s0 + $0x128] sm:$0xff]  ;;  %v148_v6 = vpack.c.bf16 %v95_v0, %v94_v62  ;;  %v77_v9 = vld [vmem:[%s7491_s0 + $0x18] sm:$0xff] }
  0x11   :  { %462 = vmatpush.bf16.msra.mxu1 %v150_v46  ;;  %v126_v3 = vld [vmem:[%s7491_s0 + $0x1a0] sm:$0xff]  ;;  %v127_v4 = vld [vmem:[%s7491_s0 + $0x1a8] sm:$0xff]  ;;  %v156_v7 = vpack.c.bf16 %v111_v2, %v110_v1  ;;  %v92_v10 = vld [vmem:[%s7491_s0 + $0x90] sm:$0xff]  ;;  %v139_v18 = vpack.c.bf16 %v77_v9, %v76_v8 }
  0x12   :  { %511 = vmatpush.bf16.msra.mxu2 %v158_v47  ;;  %v164_v11 = vpack.c.bf16 %v127_v4, %v126_v3  ;;  %v93_v12 = vld [vmem:[%s7491_s0 + $0x98] sm:$0xff]  ;;  %v108_v13 = vld [vmem:[%s7491_s0 + $0x110] sm:$0xff]  ;;  %v74_v17 = vld [vmem:[%s7491_s0] sm:$0xff] }
  0x13   :  { %560 = vmatpush.bf16.msra.mxu3 %v166_v51  ;;  %v109_v14 = vld [vmem:[%s7491_s0 + $0x118] sm:$0xff]  ;;  %v124_v15 = vld [vmem:[%s7491_s0 + $0x190] sm:$0xff]  ;;  %v75_v19 = vld [vmem:[%s7491_s0 + $0x8] sm:$0xff]  ;;  %v147_v22 = vpack.c.bf16 %v93_v12, %v92_v10 }
  0x14   :  { %414 = vmatpush.bf16.msra.mxu0 %v141_v57  ;;  %v125_v16 = vld [vmem:[%s7491_s0 + $0x198] sm:$0xff]  ;;  %v90_v20 = vld [vmem:[%s7491_s0 + $0x80] sm:$0xff]  ;;  %v91_v21 = vld [vmem:[%s7491_s0 + $0x88] sm:$0xff]  ;;  %v155_v23 = vpack.c.bf16 %v109_v14, %v108_v13  ;;  %v138_v36 = vpack.c.bf16 %v75_v19, %v74_v17 }
  0x15   :  { %463 = vmatpush.bf16.msra.mxu1 %v149_v58  ;;  %v106_v24 = vld [vmem:[%s7491_s0 + $0x100] sm:$0xff]  ;;  %v107_v25 = vld [vmem:[%s7491_s0 + $0x108] sm:$0xff]  ;;  %v163_v27 = vpack.c.bf16 %v125_v16, %v124_v15  ;;  %v4521_v30 = vld [vmem:[%s7492_s1 + $0xc] sm:$0xf0]  ;;  %v146_v40 = vpack.c.bf16 %v91_v21, %v90_v20 }
  0x16   :  { %512 = vmatpush.bf16.msra.mxu2 %v157_v59  ;;  %v122_v26 = vld [vmem:[%s7491_s0 + $0x180] sm:$0xff]  ;;  %v123_v28 = vld [vmem:[%s7491_s0 + $0x188] sm:$0xff]  ;;  %v3851_v32 = vld [vmem:[%s7492_s1 + $0x10] sm:$0xf0]  ;;  %v154_v41 = vpack.c.bf16 %v107_v25, %v106_v24 }
  0x17   :  { %561 = vmatpush.bf16.msra.mxu3 %v165_v63  ;;  %v3849_v29 = vld [vmem:[%s7492_s1] sm:$0xf]  ;;  %v4519_v31 = vld [vmem:[%s7492_s1 + $0x4] sm:$0xf]  ;;  %v4021_v33 = vld [vmem:[%s7491_s0 + $0x370] sm:$0xff]  ;;  %v162_v45 = vpack.c.bf16 %v123_v28, %v122_v26 }
  0x18   :  { %415 = vmatpush.bf16.msra.mxu0 %v140_v5  ;;  %v4022_v34 = vld [vmem:[%s7491_s0 + $0x378] sm:$0xff]  ;;  %v58_v35 = vld [vmem:[%s7493_s2] sm:$0xff]  ;;  %v3857_v37 = vld [vmem:[%s7492_s1 + $0x8] sm:$0xf]  ;;  %v4869_v50 = vor.u32 %v4521_v30, %v3849_v29  ;;  %v4880_v55 = vor.u32 %v4519_v31, %v3851_v32 }
  0x19   :  { %464 = vmatpush.bf16.msra.mxu1 %v148_v6  ;;  %v4037_v38 = vld [vmem:[%s7491_s0 + $0x3f0] sm:$0xff]  ;;  %v4038_v39 = vld [vmem:[%s7491_s0 + $0x3f8] sm:$0xff]  ;;  %172 = vperm.xlu0 %4576, %v58_v35   ;;  %v4520_v43 = vld [vmem:[%s7492_s1 + $0xc] sm:$0xf]  ;;  %v759_v46 = vpack.c.bf16 %v4022_v34, %v4021_v33 }
  0x1a   :  { %513 = vmatpush.bf16.msra.mxu2 %v156_v7  ;;  %v4522_v42 = vld [vmem:[%s7492_s1 + $0x14] sm:$0xf0]  ;;  %v3859_v44 = vld [vmem:[%s7492_s1 + $0x18] sm:$0xf0]  ;;  %v3989_v47 = vld [vmem:[%s7491_s0 + $0x270] sm:$0xff]  ;;  %7575 = vst [vmem:[#allocation2_spill] sm:$0xff] %v4869_v50  ;;  %v767_v51 = vpack.c.bf16 %v4038_v39, %v4037_v38 }
  0x1b   :  { %562 = vmatpush.bf16.msra.mxu3 %v164_v11  ;;  %v3990_v48 = vld [vmem:[%s7491_s0 + $0x278] sm:$0xff]  ;;  %v4005_v49 = vld [vmem:[%s7491_s0 + $0x2f0] sm:$0xff]  ;;  %v4019_v53 = vld [vmem:[%s7491_s0 + $0x360] sm:$0xff]  ;;  %7576 = vst [vmem:[#allocation3_spill] sm:$0xff] %v4880_v55  ;;  %v4882_v56 = vor.u32 %v4522_v42, %v3857_v37  ;;  %v4890_v59 = vor.u32 %v4520_v43, %v3859_v44 }
  0x1c   :  { %416 = vmatpush.bf16.msra.mxu0 %v139_v18  ;;  %v4006_v52 = vld [vmem:[%s7491_s0 + $0x2f8] sm:$0xff]  ;;  %v4020_v54 = vld [vmem:[%s7491_s0 + $0x368] sm:$0xff]  ;;  %v4035_v57 = vld [vmem:[%s7491_s0 + $0x3e0] sm:$0xff]  ;;  %v743_v60 = vpack.c.bf16 %v3990_v48, %v3989_v47 }
  0x1d   :  { %465 = vmatpush.bf16.msra.mxu1 %v147_v22  ;;  %7577 = vst [vmem:[#allocation4_spill] sm:$0xff] %v4882_v56  ;;  %v4036_v58 = vld [vmem:[%s7491_s0 + $0x3e8] sm:$0xff]  ;;  %v751_v61 = vpack.c.bf16 %v4006_v52, %v4005_v49  ;;  %v758_v62 = vpack.c.bf16 %v4020_v54, %v4019_v53  ;;  %v3987_v63 = vld [vmem:[%s7491_s0 + $0x260] sm:$0xff]  ;;  %v60_v5 = vld [vmem:[%s7493_s2 + $0x10] sm:$0xff] }
  0x1e   :  { %514 = vmatpush.bf16.msra.mxu2 %v155_v23  ;;  %7578 = vst [vmem:[#allocation5_spill] sm:$0xff] %v4890_v59  ;;  %v3988_v0 = vld [vmem:[%s7491_s0 + $0x268] sm:$0xff]  ;;  %v766_v1 = vpack.c.bf16 %v4036_v58, %v4035_v57  ;;  %v4003_v2 = vld [vmem:[%s7491_s0 + $0x2e0] sm:$0xff]  ;;  %v4017_v7 = vld [vmem:[%s7491_s0 + $0x350] sm:$0xff]  ;;  %182 = vperm.xlu1 %4577, %v60_v5  }
  0x1f   :  { %563 = vmatpush.bf16.msra.mxu3 %v163_v27  ;;  %v4004_v3 = vld [vmem:[%s7491_s0 + $0x2e8] sm:$0xff]  ;;  %v742_v6 = vpack.c.bf16 %v3988_v0, %v3987_v63  ;;  %v4018_v8 = vld [vmem:[%s7491_s0 + $0x358] sm:$0xff]  ;;  %v3985_v9 = vld [vmem:[%s7491_s0 + $0x250] sm:$0xff] }
  0x20   :  { %417 = vmatpush.bf16.msra.mxu0 %v138_v36  ;;  %v59_v4 = vld [vmem:[%s7493_s2 + $0x8] sm:$0xff]  ;;  %v750_v10 = vpack.c.bf16 %v4004_v3, %v4003_v2  ;;  %v757_v11 = vpack.c.bf16 %v4018_v8, %v4017_v7  ;;  %v3986_v12 = vld [vmem:[%s7491_s0 + $0x258] sm:$0xff]  ;;  %v4033_v13 = vld [vmem:[%s7491_s0 + $0x3d0] sm:$0xff] }
  0x21   :  { %466 = vmatpush.bf16.msra.mxu1 %v146_v40  ;;  %v4034_v14 = vld [vmem:[%s7491_s0 + $0x3d8] sm:$0xff]  ;;  %177 = vperm.xlu0 %4576, %v59_v4   ;;  %v4001_v16 = vld [vmem:[%s7491_s0 + $0x2d0] sm:$0xff]  ;;  %v741_v18 = vpack.c.bf16 %v3986_v12, %v3985_v9  ;;  %v3865_v20 = vld [vmem:[%s7492_s1 + $0x20] sm:$0xf] }
  0x22   :  { %515 = vmatpush.bf16.msra.mxu2 %v154_v41  ;;  %v765_v15 = vpack.c.bf16 %v4034_v14, %v4033_v13  ;;  %v4002_v17 = vld [vmem:[%s7491_s0 + $0x2d8] sm:$0xff]  ;;  %v4525_v21 = vld [vmem:[%s7492_s1 + $0x2c] sm:$0xf0]  ;;  %v4523_v22 = vld [vmem:[%s7492_s1 + $0x24] sm:$0xf] }
  0x23   :  { %564 = vmatpush.bf16.msra.mxu3 %v162_v45  ;;  %418 = vmatmul.bf16.vlgmr.msra.gmra.mxu0 %v4869_v50  ;;  %v749_v19 = vpack.c.bf16 %v4002_v17, %v4001_v16  ;;  %v3867_v23 = vld [vmem:[%s7492_s1 + $0x30] sm:$0xf0]  ;;  %v3873_v24 = vld [vmem:[%s7492_s1 + $0x28] sm:$0xf]  ;;  %v4526_v25 = vld [vmem:[%s7492_s1 + $0x34] sm:$0xf0]  ;;  %v4965_v29 = vor.u32 %v4525_v21, %v3865_v20 }
  0x24   :  { %467 = vmatmul.bf16.vlgmr.msra.gmra.mxu1 %v4880_v55  ;;  %768 = vmatpush.bf16.msrb.mxu0 %v743_v60  ;;  %v61_v26 = vld [vmem:[%s7493_s2 + $0x18] sm:$0xff]  ;;  %v4524_v27 = vld [vmem:[%s7492_s1 + $0x2c] sm:$0xf]  ;;  %v4967_v30 = vor.u32 %v4523_v22, %v3867_v23  ;;  %v4969_v31 = vor.u32 %v4526_v25, %v3873_v24  ;;  %v4015_v33 = vld [vmem:[%s7491_s0 + $0x340] sm:$0xff] }
  0x25   :  { %516 = vmatmul.bf16.vlgmr.msra.gmra.mxu2 %v4882_v56  ;;  %817 = vmatpush.bf16.msrb.mxu1 %v751_v61  ;;  %v3875_v28 = vld [vmem:[%s7492_s1 + $0x38] sm:$0xf0]  ;;  %v4016_v34 = vld [vmem:[%s7491_s0 + $0x348] sm:$0xff]  ;;  %v3983_v35 = vld [vmem:[%s7491_s0 + $0x240] sm:$0xff] }
  0x26   :  { %866 = vmatpush.bf16.msrb.mxu2 %v759_v46  ;;  %565 = vmatmul.bf16.vlgmr.msra.gmra.mxu3 %v4890_v59  ;;  %v4971_v32 = vor.u32 %v4524_v27, %v3875_v28  ;;  %v756_v36 = vpack.c.bf16 %v4016_v34, %v4015_v33  ;;  %v3984_v37 = vld [vmem:[%s7491_s0 + $0x248] sm:$0xff]  ;;  %v4031_v38 = vld [vmem:[%s7491_s0 + $0x3c0] sm:$0xff]  ;;  %v64_v44 = vld [vmem:[%s7493_s2 + $0x30] sm:$0xff] }
  0x27   :  { %915 = vmatpush.bf16.msrb.mxu3 %v767_v51  ;;  %187 = vperm.xlu1 %4577, %v61_v26   ;;  %v4032_v39 = vld [vmem:[%s7491_s0 + $0x3c8] sm:$0xff]  ;;  %v740_v40 = vpack.c.bf16 %v3984_v37, %v3983_v35  ;;  %v3999_v42 = vld [vmem:[%s7491_s0 + $0x2c0] sm:$0xff]  ;;  %v4529_v47 = vld [vmem:[%s7492_s1 + $0x4c] sm:$0xf0] }
  0x28   :  { %769 = vmatpush.bf16.msrb.mxu0 %v742_v6  ;;  %7579 = vst [vmem:[#allocation6_spill] sm:$0xff] %v4971_v32  ;;  %v764_v41 = vpack.c.bf16 %v4032_v39, %v4031_v38  ;;  %v4000_v43 = vld [vmem:[%s7491_s0 + $0x2c8] sm:$0xff]  ;;  %v3881_v46 = vld [vmem:[%s7492_s1 + $0x40] sm:$0xf]  ;;  %v4527_v48 = vld [vmem:[%s7492_s1 + $0x44] sm:$0xf] }
  0x29   :  { %818 = vmatpush.bf16.msrb.mxu1 %v750_v10  ;;  %v748_v45 = vpack.c.bf16 %v4000_v43, %v3999_v42  ;;  %202 = vperm.xlu0 %4576, %v64_v44   ;;  %v3883_v49 = vld [vmem:[%s7492_s1 + $0x50] sm:$0xf0]  ;;  %v3889_v51 = vld [vmem:[%s7492_s1 + $0x48] sm:$0xf]  ;;  %v4530_v52 = vld [vmem:[%s7492_s1 + $0x54] sm:$0xf0]  ;;  %v5028_v57 = vor.u32 %v4529_v47, %v3881_v46 }
  0x2a   :  { %867 = vmatpush.bf16.msrb.mxu2 %v758_v62  ;;  %v4528_v53 = vld [vmem:[%s7492_s1 + $0x4c] sm:$0xf]  ;;  %v3891_v54 = vld [vmem:[%s7492_s1 + $0x58] sm:$0xf0]  ;;  %v5030_v58 = vor.u32 %v4527_v48, %v3883_v49  ;;  %v5032_v60 = vor.u32 %v4530_v52, %v3889_v51  ;;  %v4013_v62 = vld [vmem:[%s7491_s0 + $0x330] sm:$0xff] }
  0x2b   :  { %916 = vmatpush.bf16.msrb.mxu3 %v766_v1  ;;  %v5034_v61 = vor.u32 %v4528_v53, %v3891_v54  ;;  %v4014_v63 = vld [vmem:[%s7491_s0 + $0x338] sm:$0xff]  ;;  %v3981_v0 = vld [vmem:[%s7491_s0 + $0x230] sm:$0xff]  ;;  %v62_v7 = vld [vmem:[%s7493_s2 + $0x20] sm:$0xff] }
  0x2c   :  { %770 = vmatpush.bf16.msrb.mxu0 %v741_v18  ;;  %7580 = vst [vmem:[#allocation7_spill] sm:$0xff] %v5032_v60  ;;  %v755_v1 = vpack.c.bf16 %v4014_v63, %v4013_v62  ;;  %v3982_v2 = vld [vmem:[%s7491_s0 + $0x238] sm:$0xff]  ;;  %v4029_v3 = vld [vmem:[%s7491_s0 + $0x3b0] sm:$0xff]  ;;  %192 = vperm.xlu2 %4578, %v62_v7   ;;  %v3897_v12 = vld [vmem:[%s7492_s1 + $0x60] sm:$0xf] }
  0x2d   :  { %819 = vmatpush.bf16.msrb.mxu1 %v749_v19  ;;  %7581 = vst [vmem:[#allocation8_spill] sm:$0xff] %v5034_v61  ;;  %v4030_v4 = vld [vmem:[%s7491_s0 + $0x3b8] sm:$0xff]  ;;  %v739_v5 = vpack.c.bf16 %v3982_v2, %v3981_v0  ;;  %v3997_v9 = vld [vmem:[%s7491_s0 + $0x2b0] sm:$0xff]  ;;  %v4531_v14 = vld [vmem:[%s7492_s1 + $0x64] sm:$0xf] }
  0x2e   :  { %868 = vmatpush.bf16.msrb.mxu2 %v757_v11  ;;  %v763_v6 = vpack.c.bf16 %v4030_v4, %v4029_v3  ;;  %v65_v8 = vld [vmem:[%s7493_s2 + $0x38] sm:$0xff]  ;;  %v4533_v13 = vld [vmem:[%s7492_s1 + $0x6c] sm:$0xf0]  ;;  %v3905_v16 = vld [vmem:[%s7492_s1 + $0x68] sm:$0xf] }
  0x2f   :  { %917 = vmatpush.bf16.msrb.mxu3 %v765_v15  ;;  %v3998_v10 = vld [vmem:[%s7491_s0 + $0x2b8] sm:$0xff]  ;;  %207 = vperm.xlu1 %4577, %v65_v8   ;;  %v3899_v15 = vld [vmem:[%s7492_s1 + $0x70] sm:$0xf0]  ;;  %v63_v18 = vld [vmem:[%s7493_s2 + $0x28] sm:$0xff]  ;;  %v5097_v21 = vor.u32 %v4533_v13, %v3897_v12 }
  0x30   :  { %771 = vmatpush.bf16.msrb.mxu0 %v740_v40  ;;  %v747_v11 = vpack.c.bf16 %v3998_v10, %v3997_v9  ;;  %v4534_v17 = vld [vmem:[%s7492_s1 + $0x74] sm:$0xf0]  ;;  %v4532_v19 = vld [vmem:[%s7492_s1 + $0x6c] sm:$0xf]  ;;  %v3907_v20 = vld [vmem:[%s7492_s1 + $0x78] sm:$0xf0]  ;;  %v5099_v22 = vor.u32 %v4531_v14, %v3899_v15 }
  0x31   :  { %820 = vmatpush.bf16.msrb.mxu1 %v748_v45  ;;  %v5101_v23 = vor.u32 %v4534_v17, %v3905_v16  ;;  %v5103_v24 = vor.u32 %v4532_v19, %v3907_v20  ;;  %v4011_v25 = vld [vmem:[%s7491_s0 + $0x320] sm:$0xff]  ;;  %v4012_v26 = vld [vmem:[%s7491_s0 + $0x328] sm:$0xff]  ;;  %v68_v42 = vld [vmem:[%s7493_s2 + $0x50] sm:$0xff] }
  0x32   :  { %869 = vmatpush.bf16.msrb.mxu2 %v756_v36  ;;  %v3979_v27 = vld [vmem:[%s7491_s0 + $0x220] sm:$0xff]  ;;  %v754_v28 = vpack.c.bf16 %v4012_v26, %v4011_v25  ;;  %v3980_v33 = vld [vmem:[%s7491_s0 + $0x228] sm:$0xff]  ;;  %v4537_v45 = vld [vmem:[%s7492_s1 + $0x8c] sm:$0xf0] }
  0x33   :  { %423 = vmatmul.bf16.gmra.mxu0 %v4965_v29  ;;  %918 = vmatpush.bf16.msrb.mxu3 %v764_v41  ;;  %7582 = vst [vmem:[#allocation9_spill] sm:$0xff] %v5101_v23  ;;  %v4027_v34 = vld [vmem:[%s7491_s0 + $0x3a0] sm:$0xff]  ;;  %v4028_v35 = vld [vmem:[%s7491_s0 + $0x3a8] sm:$0xff]  ;;  %v738_v36 = vpack.c.bf16 %v3980_v33, %v3979_v27  ;;  %v3915_v47 = vld [vmem:[%s7492_s1 + $0x90] sm:$0xf0] }
  0x34   :  { %472 = vmatmul.bf16.gmra.mxu1 %v4967_v30  ;;  %772 = vmatpush.bf16.msrb.mxu0 %v739_v5  ;;  %7583 = vst [vmem:[#allocation10_spill] sm:$0xff] %v5103_v24  ;;  %v762_v37 = vpack.c.bf16 %v4028_v35, %v4027_v34  ;;  %v67_v38 = vld [vmem:[%s7493_s2 + $0x48] sm:$0xff]  ;;  %v3995_v39 = vld [vmem:[%s7491_s0 + $0x2a0] sm:$0xff]  ;;  %v4538_v49 = vld [vmem:[%s7492_s1 + $0x94] sm:$0xf0] }
  0x35   :  { %521 = vmatmul.bf16.gmra.mxu2 %v4969_v31  ;;  %821 = vmatpush.bf16.msrb.mxu1 %v747_v11  ;;  %v3996_v40 = vld [vmem:[%s7491_s0 + $0x2a8] sm:$0xff]  ;;  %v66_v43 = vld [vmem:[%s7493_s2 + $0x40] sm:$0xff]  ;;  %v3923_v52 = vld [vmem:[%s7492_s1 + $0x98] sm:$0xf0] }
  0x36   :  { %570 = vmatmul.bf16.gmra.mxu3 %v4971_v32  ;;  %870 = vmatpush.bf16.msrb.mxu2 %v755_v1  ;;  %v746_v41 = vpack.c.bf16 %v3996_v40, %v3995_v39  ;;  %v3913_v44 = vld [vmem:[%s7492_s1 + $0x80] sm:$0xf]  ;;  %v4535_v46 = vld [vmem:[%s7492_s1 + $0x84] sm:$0xf]  ;;  %v3921_v48 = vld [vmem:[%s7492_s1 + $0x88] sm:$0xf] }
  0x37   :  { %919 = vmatpush.bf16.msrb.mxu3 %v763_v6  ;;  %197 = vperm.xlu2 %4578, %v63_v18   ;;  %v4536_v51 = vld [vmem:[%s7492_s1 + $0x8c] sm:$0xf]  ;;  %v5166_v53 = vor.u32 %v4537_v45, %v3913_v44  ;;  %v5168_v54 = vor.u32 %v4535_v46, %v3915_v47  ;;  %v5170_v62 = vor.u32 %v4538_v49, %v3921_v48  ;;  %v4009_v0 = vld [vmem:[%s7491_s0 + $0x310] sm:$0xff]  ;;  %v4010_v1 = vld [vmem:[%s7491_s0 + $0x318] sm:$0xff] }
  0x38   :  { %217 = vperm.xlu0 %4576, %v67_v38   ;;  %773 = vmatpush.bf16.msrb.mxu0 %v738_v36  ;;  %v5172_v63 = vor.u32 %v4536_v51, %v3923_v52  ;;  %v71_v2 = vld [vmem:[%s7493_s2 + $0x68] sm:$0xff]  ;;  %v753_v3 = vpack.c.bf16 %v4010_v1, %v4009_v0  ;;  %v69_v4 = vld [vmem:[%s7493_s2 + $0x58] sm:$0xff]  ;;  %v3977_v5 = vld [vmem:[%s7491_s0 + $0x210] sm:$0xff] }
  0x39   :  { %822 = vmatpush.bf16.msrb.mxu1 %v746_v41  ;;  %222 = vperm.xlu1 %4577, %v68_v42   ;;  %7584 = vst [vmem:[#allocation11_spill] sm:$0xff] %v5170_v62  ;;  %v3978_v6 = vld [vmem:[%s7491_s0 + $0x218] sm:$0xff]  ;;  %v4025_v8 = vld [vmem:[%s7491_s0 + $0x390] sm:$0xff]  ;;  %v70_v13 = vld [vmem:[%s7493_s2 + $0x60] sm:$0xff] }
  0x3a   :  { %871 = vmatpush.bf16.msrb.mxu2 %v754_v28  ;;  %7585 = vst [vmem:[#allocation12_spill] sm:$0xff] %v5172_v63  ;;  %v737_v7 = vpack.c.bf16 %v3978_v6, %v3977_v5  ;;  %v4026_v9 = vld [vmem:[%s7491_s0 + $0x398] sm:$0xff]  ;;  %v3993_v10 = vld [vmem:[%s7491_s0 + $0x290] sm:$0xff]  ;;  %v3929_v15 = vld [vmem:[%s7492_s1 + $0xa0] sm:$0xf] }
  0x3b   :  { %920 = vmatpush.bf16.msrb.mxu3 %v762_v37  ;;  %v761_v11 = vpack.c.bf16 %v4026_v9, %v4025_v8  ;;  %v3994_v12 = vld [vmem:[%s7491_s0 + $0x298] sm:$0xff]  ;;  %v4541_v16 = vld [vmem:[%s7492_s1 + $0xac] sm:$0xf0]  ;;  %v4539_v17 = vld [vmem:[%s7492_s1 + $0xa4] sm:$0xf] }
  0x3c   :  { %774 = vmatpush.bf16.msrb.mxu0 %v737_v7  ;;  %v745_v14 = vpack.c.bf16 %v3994_v12, %v3993_v10  ;;  %v72_v18 = vld [vmem:[%s7493_s2 + $0x70] sm:$0xff]  ;;  %v3937_v20 = vld [vmem:[%s7492_s1 + $0xa8] sm:$0xf]  ;;  %v4542_v25 = vld [vmem:[%s7492_s1 + $0xb4] sm:$0xf0]  ;;  %v5238_v28 = vor.u32 %v4541_v16, %v3929_v15 }
  0x3d   :  { %v3931_v19 = vld [vmem:[%s7492_s1 + $0xb0] sm:$0xf0]  ;;  %v4540_v26 = vld [vmem:[%s7492_s1 + $0xac] sm:$0xf]  ;;  %v3939_v27 = vld [vmem:[%s7492_s1 + $0xb8] sm:$0xf0]  ;;  %v5242_v34 = vor.u32 %v4542_v25, %v3937_v20 }
  0x3e   :  { %872 = vmatpush.bf16.msrb.mxu2 %v753_v3  ;;  %823 = vmatpush.bf16.msrb.mxu1 %v745_v14  ;;  %7586 = vst [vmem:[#allocation13_spill] sm:$0xff] %v5238_v28  ;;  %v5240_v33 = vor.u32 %v4539_v17, %v3931_v19  ;;  %v5244_v35 = vor.u32 %v4540_v26, %v3939_v27  ;;  %v4007_v36 = vld [vmem:[%s7491_s0 + $0x300] sm:$0xff]  ;;  %v4008_v37 = vld [vmem:[%s7491_s0 + $0x308] sm:$0xff]  ;;  %v4545_v49 = vld [vmem:[%s7492_s1 + $0xcc] sm:$0xf0] }
  0x3f   :  { %212 = vperm.xlu2 %4578, %v66_v43   ;;  %921 = vmatpush.bf16.msrb.mxu3 %v761_v11  ;;  %7588 = vst [vmem:[#allocation15_spill] sm:$0xff] %v5242_v34  ;;  %v3975_v38 = vld [vmem:[%s7491_s0 + $0x200] sm:$0xff]  ;;  %v752_v39 = vpack.c.bf16 %v4008_v37, %v4007_v36  ;;  %v3976_v40 = vld [vmem:[%s7491_s0 + $0x208] sm:$0xff]  ;;  %v3947_v52 = vld [vmem:[%s7492_s1 + $0xd0] sm:$0xf0] }
  0x40   :  { %232 = vperm.xlu0 %4576, %v70_v13   ;;  %7587 = vst [vmem:[#allocation14_spill] sm:$0xff] %v5240_v33  ;;  %v4023_v41 = vld [vmem:[%s7491_s0 + $0x380] sm:$0xff]  ;;  %v4024_v42 = vld [vmem:[%s7491_s0 + $0x388] sm:$0xff]  ;;  %v736_v43 = vpack.c.bf16 %v3976_v40, %v3975_v38  ;;  %v4546_v1 = vld [vmem:[%s7492_s1 + $0xd4] sm:$0xf0] }
  0x41   :  { %237 = vperm.xlu1 %4577, %v71_v2   ;;  %7589 = vst [vmem:[#allocation16_spill] sm:$0xff] %v5244_v35  ;;  %v760_v44 = vpack.c.bf16 %v4024_v42, %v4023_v41  ;;  %v3991_v45 = vld [vmem:[%s7491_s0 + $0x280] sm:$0xff]  ;;  %v3992_v46 = vld [vmem:[%s7491_s0 + $0x288] sm:$0xff]  ;;  %v3955_v3 = vld [vmem:[%s7492_s1 + $0xd8] sm:$0xf0] }
  0x42   :  { %873 = vmatpush.bf16.msrb.mxu2 %v752_v39  ;;  %v744_v47 = vpack.c.bf16 %v3992_v46, %v3991_v45  ;;  %775 = vmatpush.bf16.msrb.mxu0 %v736_v43  ;;  %v3945_v48 = vld [vmem:[%s7492_s1 + $0xc0] sm:$0xf]  ;;  %v4543_v51 = vld [vmem:[%s7492_s1 + $0xc4] sm:$0xf]  ;;  %v3953_v0 = vld [vmem:[%s7492_s1 + $0xc8] sm:$0xf] }
  0x43   :  { %428 = vmatmul.bf16.gmra.mxu0 %v5028_v57  ;;  %922 = vmatpush.bf16.msrb.mxu3 %v760_v44  ;;  %v4544_v2 = vld [vmem:[%s7492_s1 + $0xcc] sm:$0xf]  ;;  %v5300_v5 = vor.u32 %v4543_v51, %v3947_v52  ;;  %v5302_v6 = vor.u32 %v4546_v1, %v3953_v0  ;;  %v4085_v8 = vld [vmem:[%s7491_s0 + $0x570] sm:$0xff]  ;;  %v4086_v9 = vld [vmem:[%s7491_s0 + $0x578] sm:$0xff] }
  0x44   :  { %477 = vmatmul.bf16.gmra.mxu1 %v5030_v58  ;;  %v5304_v7 = vor.u32 %v4544_v2, %v3955_v3  ;;  %v4053_v10 = vld [vmem:[%s7491_s0 + $0x470] sm:$0xff]  ;;  %v1116_v11 = vpack.c.bf16 %v4086_v9, %v4085_v8  ;;  %v4054_v12 = vld [vmem:[%s7491_s0 + $0x478] sm:$0xff]  ;;  %v4547_v20 = vld [vmem:[%s7492_s1 + $0xe4] sm:$0xf] }
  0x45   :  { %526 = vmatmul.bf16.gmra.mxu2 %v5032_v60  ;;  %824 = vmatpush.bf16.msrb.mxu1 %v744_v47  ;;  %7591 = vst [vmem:[#allocation18_spill] sm:$0xff] %v5300_v5  ;;  %v4101_v13 = vld [vmem:[%s7491_s0 + $0x5f0] sm:$0xff]  ;;  %v4102_v14 = vld [vmem:[%s7491_s0 + $0x5f8] sm:$0xff]  ;;  %v1100_v15 = vpack.c.bf16 %v4054_v12, %v4053_v10  ;;  %v3969_v36 = vld [vmem:[%s7492_s1 + $0xe8] sm:$0xf] }
  0x46   :  { %575 = vmatmul.bf16.gmra.mxu3 %v5034_v61  ;;  %7592 = vst [vmem:[#allocation19_spill] sm:$0xff] %v5302_v6  ;;  %v1124_v16 = vpack.c.bf16 %v4102_v14, %v4101_v13  ;;  %v73_v17 = vld [vmem:[%s7493_s2 + $0x78] sm:$0xff]  ;;  %1223 = vmatpush.bf16.msra.mxu2 %v1116_v11  ;;  %v4549_v19 = vld [vmem:[%s7492_s1 + $0xec] sm:$0xf0]  ;;  %v3963_v27 = vld [vmem:[%s7492_s1 + $0xf0] sm:$0xf0] }
  0x47   :  { %227 = vperm.xlu2 %4578, %v69_v4   ;;  %v5298_v4 = vor.u32 %v4545_v49, %v3945_v48  ;;  %7593 = vst [vmem:[#allocation20_spill] sm:$0xff] %v5304_v7  ;;  %1125 = vmatpush.bf16.msra.mxu0 %v1100_v15  ;;  %v4069_v25 = vld [vmem:[%s7491_s0 + $0x4f0] sm:$0xff]  ;;  %v4070_v26 = vld [vmem:[%s7491_s0 + $0x4f8] sm:$0xff]  ;;  %v4548_v39 = vld [vmem:[%s7492_s1 + $0xec] sm:$0xf]  ;;  %v5363_v42 = vor.u32 %v4547_v20, %v3963_v27 }
  0x48   :  { %247 = vperm.xlu0 %4576, %v73_v17   ;;  %1272 = vmatpush.bf16.msra.mxu3 %v1124_v16  ;;  %v4550_v37 = vld [vmem:[%s7492_s1 + $0xf4] sm:$0xf0]  ;;  %v1108_v38 = vpack.c.bf16 %v4070_v26, %v4069_v25  ;;  %v3971_v40 = vld [vmem:[%s7492_s1 + $0xf8] sm:$0xf0]  ;;  %v4083_v45 = vld [vmem:[%s7491_s0 + $0x560] sm:$0xff] }
  0x49   :  { %7590 = vst [vmem:[#allocation17_spill] sm:$0xff] %v5298_v4  ;;  %v5365_v43 = vor.u32 %v4550_v37, %v3969_v36  ;;  %v5367_v44 = vor.u32 %v4548_v39, %v3971_v40  ;;  %v4084_v46 = vld [vmem:[%s7491_s0 + $0x568] sm:$0xff]  ;;  %v4051_v47 = vld [vmem:[%s7491_s0 + $0x460] sm:$0xff]  ;;  %v4081_v14 = vld [vmem:[%s7491_s0 + $0x550] sm:$0xff] }
  0x4a   :  { %1174 = vmatpush.bf16.msra.mxu1 %v1108_v38  ;;  %7595 = vst [vmem:[#allocation22_spill] sm:$0xff] %v5363_v42  ;;  %v1115_v48 = vpack.c.bf16 %v4084_v46, %v4083_v45  ;;  %v4052_v49 = vld [vmem:[%s7491_s0 + $0x468] sm:$0xff]  ;;  %v4099_v51 = vld [vmem:[%s7491_s0 + $0x5e0] sm:$0xff]  ;;  %v4082_v15 = vld [vmem:[%s7491_s0 + $0x558] sm:$0xff] }
  0x4b   :  { %7596 = vst [vmem:[#allocation23_spill] sm:$0xff] %v5365_v43  ;;  %v4100_v52 = vld [vmem:[%s7491_s0 + $0x5e8] sm:$0xff]  ;;  %v1099_v0 = vpack.c.bf16 %v4052_v49, %v4051_v47  ;;  %v4067_v2 = vld [vmem:[%s7491_s0 + $0x4e0] sm:$0xff]  ;;  %v4049_v16 = vld [vmem:[%s7491_s0 + $0x450] sm:$0xff]  ;;  %v1114_v17 = vpack.c.bf16 %v4082_v15, %v4081_v14 }
  0x4c   :  { %7597 = vst [vmem:[#allocation24_spill] sm:$0xff] %v5367_v44  ;;  %v1123_v1 = vpack.c.bf16 %v4100_v52, %v4099_v51  ;;  %1224 = vmatpush.bf16.msra.mxu2 %v1115_v48  ;;  %v4068_v3 = vld [vmem:[%s7491_s0 + $0x4e8] sm:$0xff]  ;;  %v4098_v20 = vld [vmem:[%s7491_s0 + $0x5d8] sm:$0xff]  ;;  %v4065_v48 = vld [vmem:[%s7491_s0 + $0x4d0] sm:$0xff] }
  0x4d   :  { %1126 = vmatpush.bf16.msra.mxu0 %v1099_v0  ;;  %v1107_v9 = vpack.c.bf16 %v4068_v3, %v4067_v2  ;;  %v4066_v49 = vld [vmem:[%s7491_s0 + $0x4d8] sm:$0xff] }
  0x4e   :  { %1273 = vmatpush.bf16.msra.mxu3 %v1123_v1  ;;  %v1106_v52 = vpack.c.bf16 %v4066_v49, %v4065_v48 }
  0x4f   :  { %242 = vperm.xlu2 %4578, %v72_v18   ;;  %v3961_v18 = vld [vmem:[%s7492_s1 + $0xe0] sm:$0xf]  ;;  %1175 = vmatpush.bf16.msra.mxu1 %v1107_v9 }
  0x50   :  { %v5361_v41 = vor.u32 %v4549_v19, %v3961_v18  ;;  %v4050_v18 = vld [vmem:[%s7491_s0 + $0x458] sm:$0xff]  ;;  %v4097_v19 = vld [vmem:[%s7491_s0 + $0x5d0] sm:$0xff]  ;;  %1225 = vmatpush.bf16.msra.mxu2 %v1114_v17  ;;  %v4080_v17 = vld [vmem:[%s7491_s0 + $0x548] sm:$0xff] }
  0x51   :  { %v1098_v27 = vpack.c.bf16 %v4050_v18, %v4049_v16  ;;  %v1122_v36 = vpack.c.bf16 %v4098_v20, %v4097_v19  ;;  %v4079_v16 = vld [vmem:[%s7491_s0 + $0x540] sm:$0xff] }
  0x52   :  { %7594 = vst [vmem:[#allocation21_spill] sm:$0xff] %v5361_v41  ;;  %v4047_v18 = vld [vmem:[%s7491_s0 + $0x440] sm:$0xff]  ;;  %v1113_v20 = vpack.c.bf16 %v4080_v17, %v4079_v16 }
  0x53   :  { %433 = vmatmul.bf16.gmra.mxu0 %v5097_v21  ;;  %1274 = vmatpush.bf16.msra.mxu3 %v1122_v36  ;;  %v4096_v36 = vld [vmem:[%s7491_s0 + $0x5c8] sm:$0xff] }
  0x54   :  { %482 = vmatmul.bf16.gmra.mxu1 %v5099_v22  ;;  %1127 = vmatpush.bf16.msra.mxu0 %v1098_v27  ;;  %v4095_v27 = vld [vmem:[%s7491_s0 + $0x5c0] sm:$0xff] }
  0x55   :  { %531 = vmatmul.bf16.gmra.mxu2 %v5101_v23  ;;  %1176 = vmatpush.bf16.msra.mxu1 %v1106_v52 }
  0x56   :  { %580 = vmatmul.bf16.gmra.mxu3 %v5103_v24  ;;  %1226 = vmatpush.bf16.msra.mxu2 %v1113_v20 }
  0x63   :  { %438 = vmatmul.bf16.gmra.mxu0 %v5166_v53 }
  0x64   :  { %487 = vmatmul.bf16.gmra.mxu1 %v5168_v54 }
  0x65   :  { %536 = vmatmul.bf16.gmra.mxu2 %v5170_v62 }
  0x66   :  { %585 = vmatmul.bf16.gmra.mxu3 %v5172_v63 }
  0x73   :  { %443 = vmatmul.bf16.gmra.mxu0 %v5238_v28 }
  0x74   :  { %492 = vmatmul.bf16.gmra.mxu1 %v5240_v33 }
  0x75   :  { %541 = vmatmul.bf16.gmra.mxu2 %v5242_v34 }
  0x76   :  { %590 = vmatmul.bf16.gmra.mxu3 %v5244_v35 }
  0x83   :  { %448 = vmatmul.bf16.gmra.mxu0 %v5298_v4 }
  0x84   :  { %497 = vmatmul.bf16.gmra.mxu1 %v5300_v5 }
  0x85   :  { %546 = vmatmul.bf16.gmra.mxu2 %v5302_v6 }
  0x86   :  { %595 = vmatmul.bf16.gmra.mxu3 %v5304_v7 }
  0x8b   :  { %v5397_v8 = vpop.permute.xlu0 %172 }
  0x8c   :  { %7598 = vst [vmem:[#allocation25_spill] sm:$0xff] %v5397_v8 }
  0x90   :  { %v5431_v51 = vpop.permute.xlu1 %182 }
  0x93   :  { %453 = vmatmul.bf16.gmra.mxu0 %v5361_v41  ;;  %v5422_v26 = vpop.permute.xlu0 %177 }
  0x94   :  { %502 = vmatmul.bf16.gmra.mxu1 %v5363_v42 }
  0x95   :  { %551 = vmatmul.bf16.gmra.mxu2 %v5365_v43 }
  0x96   :  { %600 = vmatmul.bf16.gmra.mxu3 %v5367_v44 }
  0xa0   :  { %v419_v10 = vpop.f32.mrf.mxu0 }
  0xa1   :  { %v420_v11 = vadd.f32 %v419_v10, %v5397_v8  ;;  %v468_v12 = vpop.f32.mrf.mxu1 }
  0xa3   :  { %776 = vmatmul.bf16.vlgmr.msrb.gmra.mxu0 %v4869_v50  ;;  %v469_v13 = vadd.f32 %v468_v12, %v420_v11 }
  0xa4   :  { %825 = vmatmul.bf16.vlgmr.msrb.gmra.mxu1 %v4880_v55 }
  0xa5   :  { %874 = vmatmul.bf16.vlgmr.msrb.gmra.mxu2 %v4882_v56 }
  0xa6   :  { %923 = vmatmul.bf16.vlgmr.msrb.gmra.mxu3 %v4890_v59 }
  0xa8   :  { %v517_v25 = vpop.f32.mrf.mxu2  ;;  %v421_v39 = vpop.f32.mrf.mxu0 }
  0xa9   :  { %v518_v37 = vadd.f32 %v517_v25, %v469_v13  ;;  %v566_v38 = vpop.f32.mrf.mxu3  ;;  %v470_v40 = vpop.f32.mrf.mxu1  ;;  %v422_v46 = vadd.f32 %v421_v39, %v5422_v26  ;;  %v4048_v25 = vld [vmem:[%s7491_s0 + $0x448] sm:$0xff] }
  0xaa   :  { %v1097_v39 = vpack.c.bf16 %v4048_v25, %v4047_v18  ;;  %v4077_v25 = vld [vmem:[%s7491_s0 + $0x530] sm:$0xff] }
  0xab   :  { %v567_v45 = vadd.f32 %v566_v38, %v518_v37  ;;  %v471_v0 = vadd.f32 %v470_v40, %v422_v46  ;;  %v5458_v38 = vpop.permute.xlu1 %187  ;;  %v1121_v40 = vpack.c.bf16 %v4096_v36, %v4095_v27  ;;  %v4078_v27 = vld [vmem:[%s7491_s0 + $0x538] sm:$0xff]  ;;  %v4045_v36 = vld [vmem:[%s7491_s0 + $0x430] sm:$0xff] }
  0xac   :  { %1128 = vmatpush.bf16.msra.mxu0 %v1097_v39  ;;  %v1112_v39 = vpack.c.bf16 %v4078_v27, %v4077_v25 }
  0xad   :  { %v606_v47 = vmax.f32 %v567_v45, 0.0  ;;  %1275 = vmatpush.bf16.msra.mxu3 %v1121_v40  ;;  %v4046_v40 = vld [vmem:[%s7491_s0 + $0x438] sm:$0xff] }
  0xae   :  { %1227 = vmatpush.bf16.msra.mxu2 %v1112_v39 }
  0xaf   :  { %v623_v1 = vsel %vm622_vm0, %v606_v47, 0.0 }
  0xb0   :  { %v519_v2 = vpop.f32.mrf.mxu2  ;;  %624 = vadd.xlane.f32.xlu1 %v623_v1  ;;  %v424_v10 = vpop.f32.mrf.mxu0  ;;  %v4063_v1 = vld [vmem:[%s7491_s0 + $0x4c0] sm:$0xff] }
  0xb1   :  { %v520_v3 = vadd.f32 %v519_v2, %v471_v0  ;;  %v568_v9 = vpop.f32.mrf.mxu3  ;;  %v425_v11 = vadd.f32 %v424_v10, %v5431_v51  ;;  %v473_v12 = vpop.f32.mrf.mxu1  ;;  %v4064_v2 = vld [vmem:[%s7491_s0 + $0x4c8] sm:$0xff] }
  0xb3   :  { %v569_v13 = vadd.f32 %v568_v9, %v520_v3  ;;  %781 = vmatmul.bf16.gmra.mxu0 %v4965_v29  ;;  %v474_v15 = vadd.f32 %v473_v12, %v425_v11  ;;  %v5467_v3 = vpop.permute.xlu2 %192  ;;  %v1105_v9 = vpack.c.bf16 %v4064_v2, %v4063_v1 }
  0xb4   :  { %830 = vmatmul.bf16.gmra.mxu1 %v4967_v30 }
  0xb5   :  { %v607_v14 = vmax.f32 %v569_v13, 0.0  ;;  %879 = vmatmul.bf16.gmra.mxu2 %v4969_v31  ;;  %1177 = vmatpush.bf16.msra.mxu1 %v1105_v9 }
  0xb6   :  { %928 = vmatmul.bf16.gmra.mxu3 %v4971_v32 }
  0xb7   :  { %v626_v19 = vsel %vm622_vm0, %v607_v14, 0.0 }
  0xb8   :  { %v522_v37 = vpop.f32.mrf.mxu2  ;;  %627 = vadd.xlane.f32.xlu2 %v626_v19  ;;  %v426_v47 = vpop.f32.mrf.mxu0 }
  0xb9   :  { %v523_v45 = vadd.f32 %v522_v37, %v474_v15  ;;  %v571_v46 = vpop.f32.mrf.mxu3  ;;  %v475_v48 = vpop.f32.mrf.mxu1  ;;  %v427_v52 = vadd.f32 %v426_v47, %v5458_v38 }
  0xbb   :  { %v572_v49 = vadd.f32 %v571_v46, %v523_v45  ;;  %v476_v10 = vadd.f32 %v475_v48, %v427_v52  ;;  %v4093_v45 = vld [vmem:[%s7491_s0 + $0x5b0] sm:$0xff]  ;;  %v4094_v46 = vld [vmem:[%s7491_s0 + $0x5b8] sm:$0xff]  ;;  %v5494_v48 = vpop.permute.xlu2 %197 }
  0xbc   :  { %v1120_v52 = vpack.c.bf16 %v4094_v46, %v4093_v45  ;;  %v4075_v46 = vld [vmem:[%s7491_s0 + $0x520] sm:$0xff] }
  0xbd   :  { %v608_v0 = vmax.f32 %v572_v49, 0.0  ;;  %v1096_v49 = vpack.c.bf16 %v4046_v40, %v4045_v36 }
  0xbe   :  { %1276 = vmatpush.bf16.msra.mxu3 %v1120_v52 }
  0xbf   :  { %v629_v11 = vsel %vm622_vm0, %v608_v0, 0.0  ;;  %1129 = vmatpush.bf16.msra.mxu0 %v1096_v49  ;;  %v4043_v49 = vld [vmem:[%s7491_s0 + $0x420] sm:$0xff] }
  0xc0   :  { %v524_v12 = vpop.f32.mrf.mxu2  ;;  %630 = vadd.xlane.f32.xlu1 %v629_v11  ;;  %v429_v15 = vpop.f32.mrf.mxu0 }
  0xc1   :  { %v525_v13 = vadd.f32 %v524_v12, %v476_v10  ;;  %v573_v14 = vpop.f32.mrf.mxu3  ;;  %v430_v16 = vadd.f32 %v429_v15, %v5467_v3  ;;  %v478_v17 = vpop.f32.mrf.mxu1 }
  0xc3   :  { %v574_v18 = vadd.f32 %v573_v14, %v525_v13  ;;  %786 = vmatmul.bf16.gmra.mxu0 %v5028_v57  ;;  %v479_v20 = vadd.f32 %v478_v17, %v430_v16  ;;  %v4061_v13 = vld [vmem:[%s7491_s0 + $0x4b0] sm:$0xff]  ;;  %v4062_v14 = vld [vmem:[%s7491_s0 + $0x4b8] sm:$0xff] }
  0xc4   :  { %835 = vmatmul.bf16.gmra.mxu1 %v5030_v58  ;;  %v1104_v15 = vpack.c.bf16 %v4062_v14, %v4061_v13 }
  0xc5   :  { %v609_v19 = vmax.f32 %v574_v18, 0.0  ;;  %884 = vmatmul.bf16.gmra.mxu2 %v5032_v60  ;;  %v5504_v18 = vpop.permute.xlu0 %202 }
  0xc6   :  { %933 = vmatmul.bf16.gmra.mxu3 %v5034_v61  ;;  %1178 = vmatpush.bf16.msra.mxu1 %v1104_v15 }
  0xc7   :  { %v632_v37 = vsel %vm622_vm0, %v609_v19, 0.0 }
  0xc8   :  { %v527_v47 = vpop.f32.mrf.mxu2  ;;  %633 = vadd.xlane.f32.xlu2 %v632_v37  ;;  %v431_v2 = vpop.f32.mrf.mxu0 }
  0xc9   :  { %v528_v0 = vadd.f32 %v527_v47, %v479_v20  ;;  %v576_v1 = vpop.f32.mrf.mxu3  ;;  %v480_v9 = vpop.f32.mrf.mxu1  ;;  %v432_v11 = vadd.f32 %v431_v2, %v5494_v48  ;;  %v4076_v47 = vld [vmem:[%s7491_s0 + $0x528] sm:$0xff]  ;;  %v4091_v2 = vld [vmem:[%s7491_s0 + $0x5a0] sm:$0xff] }
  0xcb   :  { %v577_v10 = vadd.f32 %v576_v1, %v528_v0  ;;  %v481_v16 = vadd.f32 %v480_v9, %v432_v11  ;;  %v1111_v0 = vpack.c.bf16 %v4076_v47, %v4075_v46  ;;  %v4044_v1 = vld [vmem:[%s7491_s0 + $0x428] sm:$0xff]  ;;  %v5530_v11 = vpop.permute.xlu1 %207 }
  0xcc   :  { %v4092_v9 = vld [vmem:[%s7491_s0 + $0x5a8] sm:$0xff] }
  0xcd   :  { %v610_v12 = vmax.f32 %v577_v10, 0.0  ;;  %v1119_v13 = vpack.c.bf16 %v4092_v9, %v4091_v2  ;;  %1228 = vmatpush.bf16.msra.mxu2 %v1111_v0 }
  0xcf   :  { %v635_v17 = vsel %vm622_vm0, %v610_v12, 0.0  ;;  %v1095_v12 = vpack.c.bf16 %v4044_v1, %v4043_v49  ;;  %1277 = vmatpush.bf16.msra.mxu3 %v1119_v13  ;;  %v4074_v13 = vld [vmem:[%s7491_s0 + $0x518] sm:$0xff] }
  0xd0   :  { %v529_v19 = vpop.f32.mrf.mxu2  ;;  %636 = vadd.xlane.f32.xlu1 %v635_v17  ;;  %v434_v27 = vpop.f32.mrf.mxu0 }
  0xd1   :  { %v530_v20 = vadd.f32 %v529_v19, %v481_v16  ;;  %v578_v25 = vpop.f32.mrf.mxu3  ;;  %v483_v36 = vpop.f32.mrf.mxu1  ;;  %v435_v37 = vadd.f32 %v434_v27, %v5504_v18  ;;  %1130 = vmatpush.bf16.msra.mxu0 %v1095_v12  ;;  %v4059_v27 = vld [vmem:[%s7491_s0 + $0x4a0] sm:$0xff]  ;;  %v4073_v12 = vld [vmem:[%s7491_s0 + $0x510] sm:$0xff] }
  0xd3   :  { %v579_v39 = vadd.f32 %v578_v25, %v530_v20  ;;  %791 = vmatmul.bf16.gmra.mxu0 %v5097_v21  ;;  %v484_v45 = vadd.f32 %v483_v36, %v435_v37  ;;  %v4060_v36 = vld [vmem:[%s7491_s0 + $0x4a8] sm:$0xff] }
  0xd4   :  { %840 = vmatmul.bf16.gmra.mxu1 %v5099_v22  ;;  %v1103_v37 = vpack.c.bf16 %v4060_v36, %v4059_v27  ;;  %v5566_v27 = vpop.permute.xlu0 %217 }
  0xd5   :  { %v611_v40 = vmax.f32 %v579_v39, 0.0  ;;  %889 = vmatmul.bf16.gmra.mxu2 %v5101_v23 }
  0xd6   :  { %938 = vmatmul.bf16.gmra.mxu3 %v5103_v24  ;;  %1179 = vmatpush.bf16.msra.mxu1 %v1103_v37 }
  0xd7   :  { %v638_v52 = vsel %vm622_vm0, %v611_v40, 0.0 }
  0xd8   :  { %v532_v10 = vpop.f32.mrf.mxu2  ;;  %639 = vadd.xlane.f32.xlu1 %v638_v52  ;;  %v436_v16 = vpop.f32.mrf.mxu0 }
  0xd9   :  { %v533_v14 = vadd.f32 %v532_v10, %v484_v45  ;;  %v581_v15 = vpop.f32.mrf.mxu3  ;;  %v485_v17 = vpop.f32.mrf.mxu1  ;;  %v437_v20 = vadd.f32 %v436_v16, %v5530_v11  ;;  %v1110_v16 = vpack.c.bf16 %v4074_v13, %v4073_v12 }
  0xda   :  { %v5540_v45 = vpop.permute.xlu2 %212  ;;  %v5576_v13 = vpop.permute.xlu1 %222 }
  0xdb   :  { %v582_v19 = vadd.f32 %v581_v15, %v533_v14  ;;  %v486_v39 = vadd.f32 %v485_v17, %v437_v20  ;;  %v4041_v14 = vld [vmem:[%s7491_s0 + $0x410] sm:$0xff]  ;;  %v4042_v17 = vld [vmem:[%s7491_s0 + $0x418] sm:$0xff]  ;;  %1229 = vmatpush.bf16.msra.mxu2 %v1110_v16 }
  0xdc   :  { %v4090_v20 = vld [vmem:[%s7491_s0 + $0x598] sm:$0xff]  ;;  %v1094_v36 = vpack.c.bf16 %v4042_v17, %v4041_v14 }
  0xdd   :  { %v612_v25 = vmax.f32 %v582_v19, 0.0  ;;  %v4089_v19 = vld [vmem:[%s7491_s0 + $0x590] sm:$0xff] }
  0xde   :  { %v1118_v37 = vpack.c.bf16 %v4090_v20, %v4089_v19  ;;  %1131 = vmatpush.bf16.msra.mxu0 %v1094_v36 }
  0xdf   :  { %v641_v40 = vsel %vm622_vm0, %v612_v25, 0.0 }
  0xe0   :  { %v534_v46 = vpop.f32.mrf.mxu2  ;;  %642 = vadd.xlane.f32.xlu2 %v641_v40  ;;  %v439_v52 = vpop.f32.mrf.mxu0  ;;  %1278 = vmatpush.bf16.msra.mxu3 %v1118_v37 }
  0xe1   :  { %v535_v47 = vadd.f32 %v534_v46, %v486_v39  ;;  %v583_v49 = vpop.f32.mrf.mxu3  ;;  %v488_v0 = vpop.f32.mrf.mxu1  ;;  %v440_v1 = vadd.f32 %v439_v52, %v5540_v45 }
  0xe3   :  { %v584_v2 = vadd.f32 %v583_v49, %v535_v47  ;;  %796 = vmatmul.bf16.gmra.mxu0 %v5166_v53  ;;  %v489_v10 = vadd.f32 %v488_v0, %v440_v1  ;;  %v4057_v1 = vld [vmem:[%s7491_s0 + $0x490] sm:$0xff] }
  0xe4   :  { %845 = vmatmul.bf16.gmra.mxu1 %v5168_v54 }
  0xe5   :  { %v613_v9 = vmax.f32 %v584_v2, 0.0  ;;  %894 = vmatmul.bf16.gmra.mxu2 %v5170_v62  ;;  %v4058_v2 = vld [vmem:[%s7491_s0 + $0x498] sm:$0xff] }
  0xe6   :  { %943 = vmatmul.bf16.gmra.mxu3 %v5172_v63 }
  0xe7   :  { %v644_v15 = vsel %vm622_vm0, %v613_v9, 0.0  ;;  %v1102_v9 = vpack.c.bf16 %v4058_v2, %v4057_v1  ;;  %v4088_v1 = vld [vmem:[%s7491_s0 + $0x588] sm:$0xff] }
  0xe8   :  { %v537_v25 = vpop.f32.mrf.mxu2  ;;  %645 = vadd.xlane.f32.xlu1 %v644_v15  ;;  %v441_v46 = vpop.f32.mrf.mxu0 }
  0xe9   :  { %v538_v39 = vadd.f32 %v537_v25, %v489_v10  ;;  %v586_v40 = vpop.f32.mrf.mxu3  ;;  %v490_v47 = vpop.f32.mrf.mxu1  ;;  %v442_v52 = vadd.f32 %v441_v46, %v5566_v27  ;;  %1180 = vmatpush.bf16.msra.mxu1 %v1102_v9  ;;  %v4039_v46 = vld [vmem:[%s7491_s0 + $0x400] sm:$0xff] }
  0xea   :  { %v5602_v9 = vpop.permute.xlu2 %227 }
  0xeb   :  { %v587_v49 = vadd.f32 %v586_v40, %v538_v39  ;;  %v491_v10 = vadd.f32 %v490_v47, %v442_v52  ;;  %v4071_v39 = vld [vmem:[%s7491_s0 + $0x500] sm:$0xff]  ;;  %v4072_v40 = vld [vmem:[%s7491_s0 + $0x508] sm:$0xff]  ;;  %7599 = vst [vmem:[#allocation26_spill] sm:$0xff] %v5602_v9 }
  0xec   :  { %v4040_v52 = vld [vmem:[%s7491_s0 + $0x408] sm:$0xff] }
  0xed   :  { %v614_v0 = vmax.f32 %v587_v49, 0.0  ;;  %v1109_v49 = vpack.c.bf16 %v4072_v40, %v4071_v39  ;;  %v4056_v39 = vld [vmem:[%s7491_s0 + $0x488] sm:$0xff] }
  0xef   :  { %v647_v12 = vsel %vm622_vm0, %v614_v0, 0.0  ;;  %v4087_v0 = vld [vmem:[%s7491_s0 + $0x580] sm:$0xff]  ;;  %1230 = vmatpush.bf16.msra.mxu2 %v1109_v49 }
  0xf0   :  { %v539_v14 = vpop.f32.mrf.mxu2  ;;  %648 = vadd.xlane.f32.xlu1 %v647_v12  ;;  %v444_v17 = vpop.f32.mrf.mxu0  ;;  %v1117_v12 = vpack.c.bf16 %v4088_v1, %v4087_v0 }
  0xf1   :  { %v540_v15 = vadd.f32 %v539_v14, %v491_v10  ;;  %v588_v16 = vpop.f32.mrf.mxu3  ;;  %v493_v19 = vpop.f32.mrf.mxu1  ;;  %v445_v20 = vadd.f32 %v444_v17, %v5576_v13  ;;  %v1093_v10 = vpack.c.bf16 %v4040_v52, %v4039_v46 }
  0xf2   :  { %1279 = vmatpush.bf16.msra.mxu3 %v1117_v12 }
  0xf3   :  { %v589_v25 = vadd.f32 %v588_v16, %v540_v15  ;;  %801 = vmatmul.bf16.gmra.mxu0 %v5238_v28  ;;  %v494_v37 = vadd.f32 %v493_v19, %v445_v20 }
  0xf4   :  { %850 = vmatmul.bf16.gmra.mxu1 %v5240_v33  ;;  %1132 = vmatpush.bf16.msra.mxu0 %v1093_v10 }
  0xf5   :  { %v615_v36 = vmax.f32 %v589_v25, 0.0  ;;  %899 = vmatmul.bf16.gmra.mxu2 %v5242_v34 }
  0xf6   :  { %948 = vmatmul.bf16.gmra.mxu3 %v5244_v35 }
  0xf7   :  { %v650_v47 = vsel %vm622_vm0, %v615_v36, 0.0  ;;  %v4055_v36 = vld [vmem:[%s7491_s0 + $0x480] sm:$0xff] }
  0xf8   :  { %v542_v2 = vpop.f32.mrf.mxu2  ;;  %651 = vadd.xlane.f32.xlu0 %v650_v47  ;;  %v446_v16 = vpop.f32.mrf.mxu0  ;;  %v1101_v40 = vpack.c.bf16 %v4056_v39, %v4055_v36  ;;  %v4118_v36 = vld [vmem:[%s7491_s0 + $0x678] sm:$0xff]  ;;  %v4165_v39 = vld [vmem:[%s7491_s0 + $0x7f0] sm:$0xff] }
  0xf9   :  { %v543_v14 = vadd.f32 %v542_v2, %v494_v37  ;;  %v591_v15 = vpop.f32.mrf.mxu3  ;;  %v495_v17 = vpop.f32.mrf.mxu1  ;;  %v447_v20 = vadd.f32 %v446_v16, %v5602_v9  ;;  %v4149_v16 = vld [vmem:[%s7491_s0 + $0x770] sm:$0xff] }
  0xfa   :  { %v5612_v47 = vpop.permute.xlu0 %232  ;;  %1181 = vmatpush.bf16.msra.mxu1 %v1101_v40  ;;  %v4166_v40 = vld [vmem:[%s7491_s0 + $0x7f8] sm:$0xff] }
  0xfb   :  { %v592_v19 = vadd.f32 %v591_v15, %v543_v14  ;;  %v496_v37 = vadd.f32 %v495_v17, %v447_v20  ;;  %7600 = vst [vmem:[#allocation27_spill] sm:$0xff] %v5612_v47  ;;  %v4150_v17 = vld [vmem:[%s7491_s0 + $0x778] sm:$0xff] }
  0xfd   :  { %v616_v25 = vmax.f32 %v592_v19, 0.0  ;;  %v4117_v19 = vld [vmem:[%s7491_s0 + $0x670] sm:$0xff] }
  0xff   :  { %v653_v46 = vsel %vm622_vm0, %v616_v25, 0.0  ;;  %v1473_v25 = vpack.c.bf16 %v4150_v17, %v4149_v16  ;;  %v4133_v17 = vld [vmem:[%s7491_s0 + $0x6f0] sm:$0xff] }
 0x100   :  { %v544_v49 = vpop.f32.mrf.mxu2  ;;  %654 = vadd.xlane.f32.xlu2 %v653_v46  ;;  %v449_v1 = vpop.f32.mrf.mxu0 }
 0x101   :  { %v545_v52 = vadd.f32 %v544_v49, %v496_v37  ;;  %v593_v0 = vpop.f32.mrf.mxu3  ;;  %v498_v2 = vpop.f32.mrf.mxu1  ;;  %v450_v10 = vadd.f32 %v449_v1, %v5612_v47  ;;  %v1457_v49 = vpack.c.bf16 %v4118_v36, %v4117_v19  ;;  %1580 = vmatpush.bf16.msrb.mxu2 %v1473_v25  ;;  %v4134_v19 = vld [vmem:[%s7491_s0 + $0x6f8] sm:$0xff] }
 0x102   :  { %v5638_v46 = vpop.permute.xlu1 %237  ;;  %v5648_v25 = vpop.permute.xlu2 %242 }
 0x103   :  { %v594_v12 = vadd.f32 %v593_v0, %v545_v52  ;;  %806 = vmatmul.bf16.gmra.mxu0 %v5298_v4  ;;  %v499_v15 = vadd.f32 %v498_v2, %v450_v10  ;;  %7601 = vst [vmem:[#allocation28_spill] sm:$0xff] %v5638_v46  ;;  %v1481_v52 = vpack.c.bf16 %v4166_v40, %v4165_v39 }
 0x104   :  { %855 = vmatmul.bf16.gmra.mxu1 %v5300_v5  ;;  %1482 = vmatpush.bf16.msrb.mxu0 %v1457_v49 }
 0x105   :  { %v617_v14 = vmax.f32 %v594_v12, 0.0  ;;  %904 = vmatmul.bf16.gmra.mxu2 %v5302_v6  ;;  %1629 = vmatpush.bf16.msrb.mxu3 %v1481_v52 }
 0x106   :  { %953 = vmatmul.bf16.gmra.mxu3 %v5304_v7 }
 0x107   :  { %v656_v20 = vsel %vm622_vm0, %v617_v14, 0.0 }
 0x108   :  { %v547_v37 = vpop.f32.mrf.mxu2  ;;  %657 = vadd.xlane.f32.xlu1 %v656_v20  ;;  %v451_v2 = vpop.f32.mrf.mxu0  ;;  %v1465_v20 = vpack.c.bf16 %v4134_v19, %v4133_v17 }
 0x109   :  { %v548_v0 = vadd.f32 %v547_v37, %v499_v15  ;;  %v596_v1 = vpop.f32.mrf.mxu3  ;;  %v500_v10 = vpop.f32.mrf.mxu1  ;;  %v452_v14 = vadd.f32 %v451_v2, %v5638_v46 }
 0x10a   :  { %1531 = vmatpush.bf16.msrb.mxu1 %v1465_v20  ;;  %v4116_v20 = vld [vmem:[%s7491_s0 + $0x668] sm:$0xff] }
 0x10b   :  { %v597_v12 = vadd.f32 %v596_v1, %v548_v0  ;;  %v501_v15 = vadd.f32 %v500_v10, %v452_v14  ;;  %v4148_v14 = vld [vmem:[%s7491_s0 + $0x768] sm:$0xff] }
 0x10d   :  { %v618_v16 = vmax.f32 %v597_v12, 0.0  ;;  %v4147_v12 = vld [vmem:[%s7491_s0 + $0x760] sm:$0xff] }
 0x10e   :  { %v1472_v19 = vpack.c.bf16 %v4148_v14, %v4147_v12 }
 0x10f   :  { %v659_v36 = vsel %vm622_vm0, %v618_v16, 0.0  ;;  %v4115_v16 = vld [vmem:[%s7491_s0 + $0x660] sm:$0xff] }
 0x110   :  { %v549_v39 = vpop.f32.mrf.mxu2  ;;  %660 = vadd.xlane.f32.xlu0 %v659_v36  ;;  %v454_v49 = vpop.f32.mrf.mxu0  ;;  %v4164_v36 = vld [vmem:[%s7491_s0 + $0x7e8] sm:$0xff]  ;;  %1581 = vmatpush.bf16.msrb.mxu2 %v1472_v19 }
 0x111   :  { %v550_v40 = vadd.f32 %v549_v39, %v501_v15  ;;  %v598_v37 = vpop.f32.mrf.mxu3  ;;  %v503_v52 = vpop.f32.mrf.mxu1  ;;  %v455_v0 = vadd.f32 %v454_v49, %v5648_v25  ;;  %v4163_v15 = vld [vmem:[%s7491_s0 + $0x7e0] sm:$0xff] }
 0x112   :  { %v1480_v49 = vpack.c.bf16 %v4164_v36, %v4163_v15 }
 0x113   :  { %v599_v1 = vadd.f32 %v598_v37, %v550_v40  ;;  %811 = vmatmul.bf16.gmra.mxu0 %v5361_v41  ;;  %v504_v10 = vadd.f32 %v503_v52, %v455_v0  ;;  %v5674_v40 = vpop.permute.xlu0 %247  ;;  %v1456_v37 = vpack.c.bf16 %v4116_v20, %v4115_v16  ;;  %v4132_v16 = vld [vmem:[%s7491_s0 + $0x6e8] sm:$0xff] }
 0x114   :  { %860 = vmatmul.bf16.gmra.mxu1 %v5363_v42  ;;  %7602 = vst [vmem:[#allocation29_spill] sm:$0xff] %v5674_v40  ;;  %1630 = vmatpush.bf16.msrb.mxu3 %v1480_v49 }
 0x115   :  { %v619_v2 = vmax.f32 %v599_v1, 0.0  ;;  %909 = vmatmul.bf16.gmra.mxu2 %v5365_v43  ;;  %1483 = vmatpush.bf16.msrb.mxu0 %v1456_v37  ;;  %v4131_v43 = vld [vmem:[%s7491_s0 + $0x6e0] sm:$0xff] }
 0x116   :  { %958 = vmatmul.bf16.gmra.mxu3 %v5367_v44 }
 0x117   :  { %v662_v17 = vsel %vm622_vm0, %v619_v2, 0.0 }
 0x118   :  { %v552_v39 = vpop.f32.mrf.mxu2  ;;  %663 = vadd.xlane.f32.xlu2 %v662_v17  ;;  %v456_v1 = vpop.f32.mrf.mxu0  ;;  %v1464_v17 = vpack.c.bf16 %v4132_v16, %v4131_v43 }
 0x119   :  { %v553_v52 = vadd.f32 %v552_v39, %v504_v10  ;;  %v601_v0 = vpop.f32.mrf.mxu3  ;;  %v505_v2 = vpop.f32.mrf.mxu1  ;;  %v457_v14 = vadd.f32 %v456_v1, %v5674_v40 }
 0x11a   :  { %1532 = vmatpush.bf16.msrb.mxu1 %v1464_v17 }
 0x11b   :  { %v602_v12 = vadd.f32 %v601_v0, %v553_v52  ;;  %v506_v10 = vadd.f32 %v505_v2, %v457_v14  ;;  %v3186_v52 = vlaneseq  ;;  %v4146_v2 = vld [vmem:[%s7491_s0 + $0x758] sm:$0xff]  ;;  %v4113_v14 = vld [vmem:[%s7491_s0 + $0x650] sm:$0xff] }
 0x11d   :  { %v620_v44 = vmax.f32 %v602_v12, 0.0  ;;  %v5688_v43 = vand.u32 127, %v3186_v52 }
 0x11f   :  { %v665_v20 = vsel %vm622_vm0, %v620_v44, 0.0  ;;  %v4145_v44 = vld [vmem:[%s7491_s0 + $0x750] sm:$0xff] }
 0x120   :  { %v554_v19 = vpop.f32.mrf.mxu2  ;;  %666 = vadd.xlane.f32.xlu1 %v665_v20  ;;  %v777_v39 = vpop.f32.mrf.mxu0  ;;  %v1471_v17 = vpack.c.bf16 %v4146_v2, %v4145_v44  ;;  %v4161_v20 = vld [vmem:[%s7491_s0 + $0x7d0] sm:$0xff] }
 0x121   :  { %v555_v15 = vadd.f32 %v554_v19, %v506_v10  ;;  %v603_v36 = vpop.f32.mrf.mxu3  ;;  %v778_v37 = vadd.f32 %v777_v39, %v5397_v8  ;;  %v826_v49 = vpop.f32.mrf.mxu1  ;;  %v4114_v10 = vld [vmem:[%s7491_s0 + $0x658] sm:$0xff]  ;;  %v5711_v39 = vadd.s32 4294967288, %v5688_v43 }
 0x122   :  { %v4162_v19 = vld [vmem:[%s7491_s0 + $0x7d8] sm:$0xff]  ;;  %1582 = vmatpush.bf16.msrb.mxu2 %v1471_v17 }
 0x123   :  { %v604_v0 = vadd.f32 %v603_v36, %v555_v15  ;;  %1133 = vmatmul.bf16.vlgmr.msra.gmra.mxu0 %v4869_v50  ;;  %v827_v12 = vadd.f32 %v826_v49, %v778_v37  ;;  %v625_v15 = vpop.xlane.xlu1 %624  ;;  %v1455_v37 = vpack.c.bf16 %v4114_v10, %v4113_v14  ;;  %v1479_v49 = vpack.c.bf16 %v4162_v19, %v4161_v20  ;;  %v4130_v14 = vld [vmem:[%s7491_s0 + $0x6d8] sm:$0xff] }
 0x124   :  { %1182 = vmatmul.bf16.vlgmr.msra.gmra.mxu1 %v4880_v55  ;;  %v3188_v55 = vperm.slane %v625_v15, %v5688_v43  ;;  %v5725_v15 = vadd.s32 4294967280, %v5688_v43 }
 0x125   :  { %v621_v1 = vmax.f32 %v604_v0, 0.0  ;;  %1231 = vmatmul.bf16.vlgmr.msra.gmra.mxu2 %v4882_v56  ;;  %1484 = vmatpush.bf16.msrb.mxu0 %v1455_v37 }
 0x126   :  { %1280 = vmatmul.bf16.vlgmr.msra.gmra.mxu3 %v4890_v59 }
 0x127   :  { %v668_v16 = vsel %vm622_vm0, %v621_v1, 0.0  ;;  %1631 = vmatpush.bf16.msrb.mxu3 %v1479_v49 }
 0x128   :  { %v875_v36 = vpop.f32.mrf.mxu2  ;;  %669 = vadd.xlane.f32.xlu0 %v668_v16  ;;  %v779_v1 = vpop.f32.mrf.mxu0 }
 0x129   :  { %v876_v52 = vadd.f32 %v875_v36, %v827_v12  ;;  %v924_v0 = vpop.f32.mrf.mxu3  ;;  %v828_v44 = vpop.f32.mrf.mxu1  ;;  %v780_v59 = vadd.f32 %v779_v1, %v5422_v26  ;;  %v4129_v12 = vld [vmem:[%s7491_s0 + $0x6d0] sm:$0xff] }
 0x12a   :  { %v1463_v10 = vpack.c.bf16 %v4130_v14, %v4129_v12  ;;  %v4144_v12 = vld [vmem:[%s7491_s0 + $0x748] sm:$0xff]  ;;  %v4111_v14 = vld [vmem:[%s7491_s0 + $0x640] sm:$0xff] }
 0x12b   :  { %v925_v2 = vadd.f32 %v924_v0, %v876_v52  ;;  %v628_v56 = vpop.xlane.xlu2 %627  ;;  %v829_v20 = vadd.f32 %v828_v44, %v780_v59 }
 0x12c   :  { %v3190_v16 = vperm.slane %v628_v56, %v5711_v39  ;;  %1533 = vmatpush.bf16.msrb.mxu1 %v1463_v10 }
 0x12d   :  { %v964_v50 = vmax.f32 %v925_v2, 0.0 }
 0x12e   :  { %v3192_v17 = vsel %vm3191_vm1, %v3190_v16, %v3188_v55  ;;  %v4143_v16 = vld [vmem:[%s7491_s0 + $0x740] sm:$0xff] }
 0x12f   :  { %v980_v19 = vsel %vm622_vm0, %v964_v50, 0.0 }
 0x130   :  { %v877_v36 = vpop.f32.mrf.mxu2  ;;  %981 = vadd.xlane.f32.xlu0 %v980_v19  ;;  %v782_v49 = vpop.f32.mrf.mxu0  ;;  %v4159_v19 = vld [vmem:[%s7491_s0 + $0x7c0] sm:$0xff] }
 0x131   :  { %v878_v56 = vadd.f32 %v877_v36, %v829_v20  ;;  %v926_v37 = vpop.f32.mrf.mxu3  ;;  %v783_v52 = vadd.f32 %v782_v49, %v5431_v51  ;;  %v831_v0 = vpop.f32.mrf.mxu1  ;;  %v1470_v20 = vpack.c.bf16 %v4144_v12, %v4143_v16  ;;  %v4160_v36 = vld [vmem:[%s7491_s0 + $0x7c8] sm:$0xff] }
 0x133   :  { %v927_v1 = vadd.f32 %v926_v37, %v878_v56  ;;  %v631_v2 = vpop.xlane.xlu1 %630  ;;  %1138 = vmatmul.bf16.gmra.mxu0 %v4965_v29  ;;  %v832_v59 = vadd.f32 %v831_v0, %v783_v52  ;;  %v5754_v37 = vadd.s32 4294967272, %v5688_v43  ;;  %v1478_v52 = vpack.c.bf16 %v4160_v36, %v4159_v19  ;;  %1583 = vmatpush.bf16.msrb.mxu2 %v1470_v20 }
 0x134   :  { %v3194_v55 = vperm.slane %v631_v2, %v5725_v15  ;;  %1187 = vmatmul.bf16.gmra.mxu1 %v4967_v30 }
 0x135   :  { %v965_v50 = vmax.f32 %v927_v1, 0.0  ;;  %1236 = vmatmul.bf16.gmra.mxu2 %v4969_v31  ;;  %7603 = vst [vmem:[#allocation30_spill] sm:$0xff] %v5754_v37  ;;  %1632 = vmatpush.bf16.msrb.mxu3 %v1478_v52 }
 0x136   :  { %v3196_v44 = vsel %vm3195_vm2, %v3194_v55, %v3192_v17  ;;  %1285 = vmatmul.bf16.gmra.mxu3 %v4971_v32  ;;  %v4112_v17 = vld [vmem:[%s7491_s0 + $0x648] sm:$0xff] }
 0x137   :  { %v983_v10 = vsel %vm622_vm0, %v965_v50, 0.0  ;;  %v1454_v49 = vpack.c.bf16 %v4112_v17, %v4111_v14  ;;  %v4127_v14 = vld [vmem:[%s7491_s0 + $0x6c0] sm:$0xff] }
 0x138   :  { %v880_v56 = vpop.f32.mrf.mxu2  ;;  %984 = vadd.xlane.f32.xlu2 %v983_v10  ;;  %v784_v2 = vpop.f32.mrf.mxu0 }
 0x139   :  { %v881_v0 = vadd.f32 %v880_v56, %v832_v59  ;;  %v929_v1 = vpop.f32.mrf.mxu3  ;;  %v833_v55 = vpop.f32.mrf.mxu1  ;;  %1485 = vmatpush.bf16.msrb.mxu0 %v1454_v49  ;;  %v785_v16 = vadd.f32 %v784_v2, %v5458_v38  ;;  %v4128_v59 = vld [vmem:[%s7491_s0 + $0x6c8] sm:$0xff]  ;;  %v5767_v49 = vadd.s32 4294967264, %v5688_v43 }
 0x13a   :  { %v1462_v17 = vpack.c.bf16 %v4128_v59, %v4127_v14  ;;  %v4109_v14 = vld [vmem:[%s7491_s0 + $0x630] sm:$0xff] }
 0x13b   :  { %v930_v50 = vadd.f32 %v929_v1, %v881_v0  ;;  %v634_v12 = vpop.xlane.xlu2 %633  ;;  %v834_v19 = vadd.f32 %v833_v55, %v785_v16 }
 0x13c   :  { %v3198_v32 = vperm.slane %v634_v12, %v5754_v37  ;;  %1534 = vmatpush.bf16.msrb.mxu1 %v1462_v17 }
 0x13d   :  { %v966_v10 = vmax.f32 %v930_v50, 0.0 }
 0x13e   :  { %v3200_v20 = vsel %vm3199_vm3, %v3198_v32, %v3196_v44 }
 0x13f   :  { %v986_v36 = vsel %vm622_vm0, %v966_v10, 0.0  ;;  %v4141_v10 = vld [vmem:[%s7491_s0 + $0x730] sm:$0xff] }
 0x140   :  { %v882_v56 = vpop.f32.mrf.mxu2  ;;  %987 = vadd.xlane.f32.xlu2 %v986_v36  ;;  %v787_v1 = vpop.f32.mrf.mxu0  ;;  %v4158_v36 = vld [vmem:[%s7491_s0 + $0x7b8] sm:$0xff] }
 0x141   :  { %v883_v52 = vadd.f32 %v882_v56, %v834_v19  ;;  %v931_v0 = vpop.f32.mrf.mxu3  ;;  %v788_v2 = vadd.f32 %v787_v1, %v5467_v3  ;;  %v836_v50 = vpop.f32.mrf.mxu1  ;;  %v4157_v19 = vld [vmem:[%s7491_s0 + $0x7b0] sm:$0xff] }
 0x142   :  { %v1477_v1 = vpack.c.bf16 %v4158_v36, %v4157_v19 }
 0x143   :  { %v932_v12 = vadd.f32 %v931_v0, %v883_v52  ;;  %v637_v37 = vpop.xlane.xlu1 %636  ;;  %1143 = vmatmul.bf16.gmra.mxu0 %v5028_v57  ;;  %v837_v55 = vadd.f32 %v836_v50, %v788_v2  ;;  %v5796_v52 = vadd.s32 4294967256, %v5688_v43 }
 0x144   :  { %v3202_v32 = vperm.slane %v637_v37, %v5767_v49  ;;  %1192 = vmatmul.bf16.gmra.mxu1 %v5030_v58  ;;  %v4142_v37 = vld [vmem:[%s7491_s0 + $0x738] sm:$0xff]  ;;  %1633 = vmatpush.bf16.msrb.mxu3 %v1477_v1 }
 0x145   :  { %v967_v44 = vmax.f32 %v932_v12, 0.0  ;;  %1241 = vmatmul.bf16.gmra.mxu2 %v5032_v60  ;;  %v1469_v17 = vpack.c.bf16 %v4142_v37, %v4141_v10  ;;  %7604 = vst [vmem:[#allocation31_spill] sm:$0xff] %v5796_v52 }
 0x146   :  { %v3204_v16 = vsel %vm3203_vm4, %v3202_v32, %v3200_v20  ;;  %1290 = vmatmul.bf16.gmra.mxu3 %v5034_v61  ;;  %v4110_v20 = vld [vmem:[%s7491_s0 + $0x638] sm:$0xff] }
 0x147   :  { %v989_v59 = vsel %vm622_vm0, %v967_v44, 0.0  ;;  %v1453_v0 = vpack.c.bf16 %v4110_v20, %v4109_v14  ;;  %1584 = vmatpush.bf16.msrb.mxu2 %v1469_v17  ;;  %v4125_v14 = vld [vmem:[%s7491_s0 + $0x6b0] sm:$0xff] }
 0x148   :  { %v885_v56 = vpop.f32.mrf.mxu2  ;;  %990 = vadd.xlane.f32.xlu0 %v989_v59  ;;  %v789_v12 = vpop.f32.mrf.mxu0 }
 0x149   :  { %v886_v2 = vadd.f32 %v885_v56, %v837_v55  ;;  %v934_v50 = vpop.f32.mrf.mxu3  ;;  %v838_v32 = vpop.f32.mrf.mxu1  ;;  %1486 = vmatpush.bf16.msrb.mxu0 %v1453_v0  ;;  %v790_v10 = vadd.f32 %v789_v12, %v5494_v48  ;;  %v4126_v55 = vld [vmem:[%s7491_s0 + $0x6b8] sm:$0xff]  ;;  %v5809_v0 = vadd.s32 4294967248, %v5688_v43 }
 0x14a   :  { %v1461_v20 = vpack.c.bf16 %v4126_v55, %v4125_v14  ;;  %v4107_v14 = vld [vmem:[%s7491_s0 + $0x620] sm:$0xff] }
 0x14b   :  { %v935_v44 = vadd.f32 %v934_v50, %v886_v2  ;;  %v640_v37 = vpop.xlane.xlu1 %639  ;;  %v839_v19 = vadd.f32 %v838_v32, %v790_v10 }
 0x14c   :  { %v3206_v61 = vperm.slane %v640_v37, %v5796_v52  ;;  %1535 = vmatpush.bf16.msrb.mxu1 %v1461_v20 }
 0x14d   :  { %v968_v59 = vmax.f32 %v935_v44, 0.0 }
 0x14e   :  { %v3208_v17 = vsel %vm3207_vm5, %v3206_v61, %v3204_v16 }
 0x14f   :  { %v992_v36 = vsel %vm622_vm0, %v968_v59, 0.0  ;;  %v4139_v59 = vld [vmem:[%s7491_s0 + $0x720] sm:$0xff] }
 0x150   :  { %v887_v56 = vpop.f32.mrf.mxu2  ;;  %993 = vadd.xlane.f32.xlu2 %v992_v36  ;;  %v792_v50 = vpop.f32.mrf.mxu0  ;;  %v4156_v36 = vld [vmem:[%s7491_s0 + $0x7a8] sm:$0xff] }
 0x151   :  { %v888_v1 = vadd.f32 %v887_v56, %v839_v19  ;;  %v936_v2 = vpop.f32.mrf.mxu3  ;;  %v793_v12 = vadd.f32 %v792_v50, %v5504_v18  ;;  %v841_v44 = vpop.f32.mrf.mxu1  ;;  %v4155_v19 = vld [vmem:[%s7491_s0 + $0x7a0] sm:$0xff] }
 0x152   :  { %v1476_v50 = vpack.c.bf16 %v4156_v36, %v4155_v19 }
 0x153   :  { %v937_v37 = vadd.f32 %v936_v2, %v888_v1  ;;  %v643_v52 = vpop.xlane.xlu2 %642  ;;  %1148 = vmatmul.bf16.gmra.mxu0 %v5097_v21  ;;  %v842_v32 = vadd.f32 %v841_v44, %v793_v12  ;;  %v5838_v1 = vadd.s32 4294967240, %v5688_v43 }
 0x154   :  { %v3210_v61 = vperm.slane %v643_v52, %v5809_v0  ;;  %1197 = vmatmul.bf16.gmra.mxu1 %v5099_v22  ;;  %v4140_v52 = vld [vmem:[%s7491_s0 + $0x728] sm:$0xff]  ;;  %1634 = vmatpush.bf16.msrb.mxu3 %v1476_v50 }
 0x155   :  { %v969_v16 = vmax.f32 %v937_v37, 0.0  ;;  %1246 = vmatmul.bf16.gmra.mxu2 %v5101_v23  ;;  %v1468_v20 = vpack.c.bf16 %v4140_v52, %v4139_v59  ;;  %7605 = vst [vmem:[#allocation32_spill] sm:$0xff] %v5838_v1 }
 0x156   :  { %v3212_v10 = vsel %vm3211_vm6, %v3210_v61, %v3208_v17  ;;  %1295 = vmatmul.bf16.gmra.mxu3 %v5103_v24  ;;  %v4108_v17 = vld [vmem:[%s7491_s0 + $0x628] sm:$0xff] }
 0x157   :  { %v995_v55 = vsel %vm622_vm0, %v969_v16, 0.0  ;;  %v1452_v2 = vpack.c.bf16 %v4108_v17, %v4107_v14  ;;  %1585 = vmatpush.bf16.msrb.mxu2 %v1468_v20  ;;  %v4123_v14 = vld [vmem:[%s7491_s0 + $0x6a0] sm:$0xff] }
 0x158   :  { %v890_v56 = vpop.f32.mrf.mxu2  ;;  %996 = vadd.xlane.f32.xlu2 %v995_v55  ;;  %v794_v37 = vpop.f32.mrf.mxu0 }
 0x159   :  { %v891_v12 = vadd.f32 %v890_v56, %v842_v32  ;;  %v939_v44 = vpop.f32.mrf.mxu3  ;;  %v843_v61 = vpop.f32.mrf.mxu1  ;;  %1487 = vmatpush.bf16.msrb.mxu0 %v1452_v2  ;;  %v795_v59 = vadd.f32 %v794_v37, %v5530_v11  ;;  %v4124_v32 = vld [vmem:[%s7491_s0 + $0x6a8] sm:$0xff]  ;;  %v5851_v2 = vadd.s32 4294967232, %v5688_v43 }
 0x15a   :  { %v1460_v17 = vpack.c.bf16 %v4124_v32, %v4123_v14  ;;  %v4105_v14 = vld [vmem:[%s7491_s0 + $0x610] sm:$0xff] }
 0x15b   :  { %v940_v16 = vadd.f32 %v939_v44, %v891_v12  ;;  %v646_v52 = vpop.xlane.xlu1 %645  ;;  %v844_v19 = vadd.f32 %v843_v61, %v795_v59 }
 0x15c   :  { %v3214_v24 = vperm.slane %v646_v52, %v5838_v1  ;;  %1536 = vmatpush.bf16.msrb.mxu1 %v1460_v17 }
 0x15d   :  { %v970_v55 = vmax.f32 %v940_v16, 0.0 }
 0x15e   :  { %v3216_v20 = vsel %vm3215_vm7, %v3214_v24, %v3212_v10 }
 0x15f   :  { %v998_v36 = vsel %vm622_vm0, %v970_v55, 0.0  ;;  %v4137_v55 = vld [vmem:[%s7491_s0 + $0x710] sm:$0xff] }
 0x160   :  { %v892_v56 = vpop.f32.mrf.mxu2  ;;  %999 = vadd.xlane.f32.xlu0 %v998_v36  ;;  %v797_v44 = vpop.f32.mrf.mxu0  ;;  %v4154_v36 = vld [vmem:[%s7491_s0 + $0x798] sm:$0xff] }
 0x161   :  { %v893_v50 = vadd.f32 %v892_v56, %v844_v19  ;;  %v941_v12 = vpop.f32.mrf.mxu3  ;;  %v798_v37 = vadd.f32 %v797_v44, %v5540_v45  ;;  %v846_v16 = vpop.f32.mrf.mxu1  ;;  %v4153_v19 = vld [vmem:[%s7491_s0 + $0x790] sm:$0xff] }
 0x162   :  { %v1475_v44 = vpack.c.bf16 %v4154_v36, %v4153_v19 }
 0x163   :  { %v942_v52 = vadd.f32 %v941_v12, %v893_v50  ;;  %v649_v1 = vpop.xlane.xlu1 %648  ;;  %1153 = vmatmul.bf16.gmra.mxu0 %v5166_v53  ;;  %v847_v61 = vadd.f32 %v846_v16, %v798_v37  ;;  %v5880_v50 = vadd.s32 4294967224, %v5688_v43 }
 0x164   :  { %v3218_v24 = vperm.slane %v649_v1, %v5851_v2  ;;  %1202 = vmatmul.bf16.gmra.mxu1 %v5168_v54  ;;  %v4138_v1 = vld [vmem:[%s7491_s0 + $0x718] sm:$0xff]  ;;  %1635 = vmatpush.bf16.msrb.mxu3 %v1475_v44 }
 0x165   :  { %v971_v10 = vmax.f32 %v942_v52, 0.0  ;;  %1251 = vmatmul.bf16.gmra.mxu2 %v5170_v62  ;;  %v1467_v17 = vpack.c.bf16 %v4138_v1, %v4137_v55  ;;  %7606 = vst [vmem:[#allocation33_spill] sm:$0xff] %v5880_v50 }
 0x166   :  { %v3220_v59 = vsel %vm3219_vm8, %v3218_v24, %v3216_v20  ;;  %1300 = vmatmul.bf16.gmra.mxu3 %v5172_v63  ;;  %v4106_v20 = vld [vmem:[%s7491_s0 + $0x618] sm:$0xff] }
 0x167   :  { %v1001_v32 = vsel %vm622_vm0, %v971_v10, 0.0  ;;  %v1451_v12 = vpack.c.bf16 %v4106_v20, %v4105_v14  ;;  %1586 = vmatpush.bf16.msrb.mxu2 %v1467_v17  ;;  %v4121_v14 = vld [vmem:[%s7491_s0 + $0x690] sm:$0xff] }
 0x168   :  { %v895_v56 = vpop.f32.mrf.mxu2  ;;  %1002 = vadd.xlane.f32.xlu2 %v1001_v32  ;;  %v799_v52 = vpop.f32.mrf.mxu0 }
 0x169   :  { %v896_v37 = vadd.f32 %v895_v56, %v847_v61  ;;  %v944_v16 = vpop.f32.mrf.mxu3  ;;  %v848_v24 = vpop.f32.mrf.mxu1  ;;  %1488 = vmatpush.bf16.msrb.mxu0 %v1451_v12  ;;  %v800_v55 = vadd.f32 %v799_v52, %v5566_v27  ;;  %v4122_v61 = vld [vmem:[%s7491_s0 + $0x698] sm:$0xff]  ;;  %v5893_v12 = vadd.s32 4294967216, %v5688_v43 }
 0x16a   :  { %v1459_v20 = vpack.c.bf16 %v4122_v61, %v4121_v14  ;;  %v4103_v14 = vld [vmem:[%s7491_s0 + $0x600] sm:$0xff] }
 0x16b   :  { %v945_v10 = vadd.f32 %v944_v16, %v896_v37  ;;  %v652_v1 = vpop.xlane.xlu0 %651  ;;  %v849_v19 = vadd.f32 %v848_v24, %v800_v55  ;;  %7607 = vst [vmem:[#allocation34_spill] sm:$0xff] %v5893_v12 }
 0x16c   :  { %v3222_v63 = vperm.slane %v652_v1, %v5880_v50  ;;  %1537 = vmatpush.bf16.msrb.mxu1 %v1459_v20 }
 0x16d   :  { %v972_v32 = vmax.f32 %v945_v10, 0.0 }
 0x16e   :  { %v3224_v17 = vsel %vm3223_vm9, %v3222_v63, %v3220_v59 }
 0x16f   :  { %v1004_v36 = vsel %vm622_vm0, %v972_v32, 0.0  ;;  %v4135_v32 = vld [vmem:[%s7491_s0 + $0x700] sm:$0xff] }
 0x170   :  { %v897_v56 = vpop.f32.mrf.mxu2  ;;  %1005 = vadd.xlane.f32.xlu2 %v1004_v36  ;;  %v802_v16 = vpop.f32.mrf.mxu0  ;;  %v4152_v36 = vld [vmem:[%s7491_s0 + $0x788] sm:$0xff] }
 0x171   :  { %v898_v44 = vadd.f32 %v897_v56, %v849_v19  ;;  %v946_v37 = vpop.f32.mrf.mxu3  ;;  %v803_v52 = vadd.f32 %v802_v16, %v5576_v13  ;;  %v851_v10 = vpop.f32.mrf.mxu1  ;;  %v4151_v19 = vld [vmem:[%s7491_s0 + $0x780] sm:$0xff] }
 0x172   :  { %v1474_v16 = vpack.c.bf16 %v4152_v36, %v4151_v19 }
 0x173   :  { %v947_v1 = vadd.f32 %v946_v37, %v898_v44  ;;  %v655_v50 = vpop.xlane.xlu2 %654  ;;  %1158 = vmatmul.bf16.gmra.mxu0 %v5238_v28  ;;  %v852_v24 = vadd.f32 %v851_v10, %v803_v52  ;;  %v5922_v44 = vadd.s32 4294967208, %v5688_v43 }
 0x174   :  { %v3226_v63 = vperm.slane %v655_v50, %v5893_v12  ;;  %1207 = vmatmul.bf16.gmra.mxu1 %v5240_v33  ;;  %v4136_v50 = vld [vmem:[%s7491_s0 + $0x708] sm:$0xff]  ;;  %1636 = vmatpush.bf16.msrb.mxu3 %v1474_v16 }
 0x175   :  { %v973_v59 = vmax.f32 %v947_v1, 0.0  ;;  %1256 = vmatmul.bf16.gmra.mxu2 %v5242_v34  ;;  %v1466_v20 = vpack.c.bf16 %v4136_v50, %v4135_v32  ;;  %7608 = vst [vmem:[#allocation35_spill] sm:$0xff] %v5922_v44 }
 0x176   :  { %v3228_v55 = vsel %vm3227_vm10, %v3226_v63, %v3224_v17  ;;  %1305 = vmatmul.bf16.gmra.mxu3 %v5244_v35  ;;  %v4104_v17 = vld [vmem:[%s7491_s0 + $0x608] sm:$0xff] }
 0x177   :  { %v1007_v61 = vsel %vm622_vm0, %v973_v59, 0.0  ;;  %v1450_v37 = vpack.c.bf16 %v4104_v17, %v4103_v14  ;;  %1587 = vmatpush.bf16.msrb.mxu2 %v1466_v20  ;;  %v4119_v14 = vld [vmem:[%s7491_s0 + $0x680] sm:$0xff] }
 0x178   :  { %v900_v56 = vpop.f32.mrf.mxu2  ;;  %1008 = vadd.xlane.f32.xlu1 %v1007_v61  ;;  %v804_v1 = vpop.f32.mrf.mxu0 }
 0x179   :  { %v901_v52 = vadd.f32 %v900_v56, %v852_v24  ;;  %v949_v10 = vpop.f32.mrf.mxu3  ;;  %v853_v63 = vpop.f32.mrf.mxu1  ;;  %1489 = vmatpush.bf16.msrb.mxu0 %v1450_v37  ;;  %v805_v32 = vadd.f32 %v804_v1, %v5602_v9  ;;  %v4120_v24 = vld [vmem:[%s7491_s0 + $0x688] sm:$0xff]  ;;  %v5935_v37 = vadd.s32 4294967200, %v5688_v43 }
 0x17a   :  { %v1458_v17 = vpack.c.bf16 %v4120_v24, %v4119_v14  ;;  %v4181_v14 = vld [vmem:[%s7491_s0 + $0x870] sm:$0xff] }
 0x17b   :  { %v950_v59 = vadd.f32 %v949_v10, %v901_v52  ;;  %v658_v50 = vpop.xlane.xlu1 %657  ;;  %v854_v19 = vadd.f32 %v853_v63, %v805_v32  ;;  %7609 = vst [vmem:[#allocation36_spill] sm:$0xff] %v5935_v37 }
 0x17c   :  { %v3230_v35 = vperm.slane %v658_v50, %v5922_v44  ;;  %1538 = vmatpush.bf16.msrb.mxu1 %v1458_v17 }
 0x17d   :  { %v974_v61 = vmax.f32 %v950_v59, 0.0 }
 0x17e   :  { %v3232_v20 = vsel %vm3231_vm11, %v3230_v35, %v3228_v55 }
 0x17f   :  { %v1010_v36 = vsel %vm622_vm0, %v974_v61, 0.0  ;;  %v4213_v61 = vld [vmem:[%s7491_s0 + $0x970] sm:$0xff] }
 0x180   :  { %v902_v56 = vpop.f32.mrf.mxu2  ;;  %1011 = vadd.xlane.f32.xlu0 %v1010_v36  ;;  %v807_v10 = vpop.f32.mrf.mxu0  ;;  %v4230_v36 = vld [vmem:[%s7491_s0 + $0x9f8] sm:$0xff] }
 0x181   :  { %v903_v16 = vadd.f32 %v902_v56, %v854_v19  ;;  %v951_v52 = vpop.f32.mrf.mxu3  ;;  %v808_v1 = vadd.f32 %v807_v10, %v5612_v47  ;;  %v856_v59 = vpop.f32.mrf.mxu1  ;;  %v4229_v19 = vld [vmem:[%s7491_s0 + $0x9f0] sm:$0xff] }
 0x182   :  { %v1838_v10 = vpack.c.bf16 %v4230_v36, %v4229_v19 }
 0x183   :  { %v952_v50 = vadd.f32 %v951_v52, %v903_v16  ;;  %v661_v44 = vpop.xlane.xlu0 %660  ;;  %1163 = vmatmul.bf16.gmra.mxu0 %v5298_v4  ;;  %v857_v63 = vadd.f32 %v856_v59, %v808_v1  ;;  %v5964_v16 = vadd.s32 4294967192, %v5688_v43 }
 0x184   :  { %v3234_v35 = vperm.slane %v661_v44, %v5935_v37  ;;  %1212 = vmatmul.bf16.gmra.mxu1 %v5300_v5  ;;  %v4214_v44 = vld [vmem:[%s7491_s0 + $0x978] sm:$0xff]  ;;  %1986 = vmatpush.bf16.msra.mxu3 %v1838_v10 }
 0x185   :  { %v975_v55 = vmax.f32 %v952_v50, 0.0  ;;  %1261 = vmatmul.bf16.gmra.mxu2 %v5302_v6  ;;  %v1830_v17 = vpack.c.bf16 %v4214_v44, %v4213_v61  ;;  %7610 = vst [vmem:[#allocation37_spill] sm:$0xff] %v5964_v16 }
 0x186   :  { %v3236_v32 = vsel %vm3235_vm12, %v3234_v35, %v3232_v20  ;;  %1310 = vmatmul.bf16.gmra.mxu3 %v5304_v7  ;;  %v4182_v20 = vld [vmem:[%s7491_s0 + $0x878] sm:$0xff] }
 0x187   :  { %v1013_v24 = vsel %vm622_vm0, %v975_v55, 0.0  ;;  %v1814_v52 = vpack.c.bf16 %v4182_v20, %v4181_v14  ;;  %1937 = vmatpush.bf16.msra.mxu2 %v1830_v17  ;;  %v4197_v14 = vld [vmem:[%s7491_s0 + $0x8f0] sm:$0xff] }
 0x188   :  { %v905_v56 = vpop.f32.mrf.mxu2  ;;  %1014 = vadd.xlane.f32.xlu2 %v1013_v24  ;;  %v809_v50 = vpop.f32.mrf.mxu0 }
 0x189   :  { %v906_v1 = vadd.f32 %v905_v56, %v857_v63  ;;  %v954_v59 = vpop.f32.mrf.mxu3  ;;  %v858_v35 = vpop.f32.mrf.mxu1  ;;  %1839 = vmatpush.bf16.msra.mxu0 %v1814_v52  ;;  %v810_v61 = vadd.f32 %v809_v50, %v5638_v46  ;;  %v4198_v63 = vld [vmem:[%s7491_s0 + $0x8f8] sm:$0xff] }
 0x18a   :  { %v1822_v20 = vpack.c.bf16 %v4198_v63, %v4197_v14  ;;  %v4212_v14 = vld [vmem:[%s7491_s0 + $0x968] sm:$0xff]  ;;  %v4179_v63 = vld [vmem:[%s7491_s0 + $0x860] sm:$0xff] }
 0x18b   :  { %v955_v55 = vadd.f32 %v954_v59, %v906_v1  ;;  %v664_v44 = vpop.xlane.xlu2 %663  ;;  %v859_v19 = vadd.f32 %v858_v35, %v810_v61  ;;  %v7612_v61 = vld [vmem:[#allocation24_spill] sm:$0xff] }
 0x18c   :  { %v3238_v7 = vperm.slane %v664_v44, %v5964_v16  ;;  %1888 = vmatpush.bf16.msra.mxu1 %v1822_v20 }
 0x18d   :  { %v976_v24 = vmax.f32 %v955_v55, 0.0 }
 0x18e   :  { %v3240_v17 = vsel %vm7555_vm13, %v3238_v7, %v3236_v32  ;;  %v5979_v7 = vadd.s32 4294967184, %v5688_v43  ;;  %v7611_v32 = vld [vmem:[#allocation23_spill] sm:$0xff] }
 0x18f   :  { %v1016_v36 = vsel %vm622_vm0, %v976_v24, 0.0  ;;  %v4211_v24 = vld [vmem:[%s7491_s0 + $0x960] sm:$0xff] }
 0x190   :  { %v907_v56 = vpop.f32.mrf.mxu2  ;;  %1017 = vadd.xlane.f32.xlu1 %v1016_v36  ;;  %v812_v1 = vpop.f32.mrf.mxu0  ;;  %v4180_v36 = vld [vmem:[%s7491_s0 + $0x868] sm:$0xff] }
 0x191   :  { %v908_v52 = vadd.f32 %v907_v56, %v859_v19  ;;  %v956_v10 = vpop.f32.mrf.mxu3  ;;  %v813_v59 = vadd.f32 %v812_v1, %v5648_v25  ;;  %v861_v50 = vpop.f32.mrf.mxu1  ;;  %v1829_v19 = vpack.c.bf16 %v4212_v14, %v4211_v24  ;;  %v4227_v56 = vld [vmem:[%s7491_s0 + $0x9e0] sm:$0xff]  ;;  %v6004_v1 = vadd.s32 4294967176, %v5688_v43 }
 0x193   :  { %v957_v55 = vadd.f32 %v956_v10, %v908_v52  ;;  %1168 = vmatmul.bf16.gmra.mxu0 %v5361_v41  ;;  %v862_v16 = vadd.f32 %v861_v50, %v813_v59  ;;  %v667_v35 = vpop.xlane.xlu1 %666  ;;  %v4228_v52 = vld [vmem:[%s7491_s0 + $0x9e8] sm:$0xff]  ;;  %7613 = vst [vmem:[#allocation38_spill] sm:$0xff] %v6004_v1  ;;  %v1813_v59 = vpack.c.bf16 %v4180_v36, %v4179_v63 }
 0x194   :  { %1217 = vmatmul.bf16.gmra.mxu1 %v5363_v42  ;;  %v1837_v50 = vpack.c.bf16 %v4228_v52, %v4227_v56  ;;  %1938 = vmatpush.bf16.msra.mxu2 %v1829_v19 }
 0x195   :  { %v977_v44 = vmax.f32 %v957_v55, 0.0  ;;  %1266 = vmatmul.bf16.gmra.mxu2 %v7611_v32  ;;  %v3242_v55 = vperm.slane %v667_v35, %v5979_v7  ;;  %1840 = vmatpush.bf16.msra.mxu0 %v1813_v59  ;;  %v4196_v35 = vld [vmem:[%s7491_s0 + $0x8e8] sm:$0xff] }
 0x196   :  { %1315 = vmatmul.bf16.gmra.mxu3 %v7612_v61 }
 0x197   :  { %v1019_v20 = vsel %vm622_vm0, %v977_v44, 0.0  ;;  %1987 = vmatpush.bf16.msra.mxu3 %v1837_v50  ;;  %v3244_v63 = vsel %vm3243_vm14, %v3242_v55, %v3240_v17 }
 0x198   :  { %v910_v10 = vpop.f32.mrf.mxu2  ;;  %1020 = vadd.xlane.f32.xlu0 %v1019_v20  ;;  %v814_v14 = vpop.f32.mrf.mxu0 }
 0x199   :  { %v911_v44 = vadd.f32 %v910_v10, %v862_v16  ;;  %v959_v24 = vpop.f32.mrf.mxu3  ;;  %v863_v61 = vpop.f32.mrf.mxu1  ;;  %v815_v42 = vadd.f32 %v814_v14, %v5674_v40  ;;  %v4195_v16 = vld [vmem:[%s7491_s0 + $0x8e0] sm:$0xff] }
 0x19a   :  { %v1821_v56 = vpack.c.bf16 %v4196_v35, %v4195_v16  ;;  %v7614_v14 = vld [vmem:[#allocation2_spill] sm:$0xff]  ;;  %v4177_v16 = vld [vmem:[%s7491_s0 + $0x850] sm:$0xff] }
 0x19b   :  { %v960_v32 = vadd.f32 %v959_v24, %v911_v44  ;;  %v670_v20 = vpop.xlane.xlu0 %669  ;;  %v864_v52 = vadd.f32 %v863_v61, %v815_v42  ;;  %v7617_v42 = vld [vmem:[#allocation5_spill] sm:$0xff]  ;;  %v4209_v61 = vld [vmem:[%s7491_s0 + $0x950] sm:$0xff] }
 0x19c   :  { %v3246_v41 = vperm.slane %v670_v20, %v6004_v1  ;;  %1889 = vmatpush.bf16.msra.mxu1 %v1821_v56 }
 0x19d   :  { %v978_v36 = vmax.f32 %v960_v32, 0.0 }
 0x19e   :  { %v6017_v19 = vsel %vm3247_vm15, %v3246_v41, %v3244_v63  ;;  %v7615_v41 = vld [vmem:[#allocation3_spill] sm:$0xff]  ;;  %v7616_v63 = vld [vmem:[#allocation4_spill] sm:$0xff] }
 0x19f   :  { %v1022_v10 = vsel %vm622_vm0, %v978_v36, 0.0  ;;  %v4210_v36 = vld [vmem:[%s7491_s0 + $0x958] sm:$0xff] }
 0x1a0   :  { %v912_v59 = vpop.f32.mrf.mxu2  ;;  %1023 = vadd.xlane.f32.xlu2 %v1022_v10  ;;  %v1134_v50 = vpop.f32.mrf.mxu0  ;;  %v1828_v56 = vpack.c.bf16 %v4210_v36, %v4209_v61  ;;  %v4225_v10 = vld [vmem:[%s7491_s0 + $0x9d0] sm:$0xff] }
 0x1a1   :  { %v913_v17 = vadd.f32 %v912_v59, %v864_v52  ;;  %v961_v32 = vpop.f32.mrf.mxu3  ;;  %v1135_v55 = vadd.f32 %v1134_v50, %v5397_v8  ;;  %v1183_v44 = vpop.f32.mrf.mxu1  ;;  %v4178_v52 = vld [vmem:[%s7491_s0 + $0x858] sm:$0xff] }
 0x1a2   :  { %v4226_v59 = vld [vmem:[%s7491_s0 + $0x9d8] sm:$0xff]  ;;  %v1812_v50 = vpack.c.bf16 %v4178_v52, %v4177_v16  ;;  %1939 = vmatpush.bf16.msra.mxu2 %v1828_v56  ;;  %v4193_v16 = vld [vmem:[%s7491_s0 + $0x8d0] sm:$0xff] }
 0x1a3   :  { %v962_v24 = vadd.f32 %v961_v32, %v913_v17  ;;  %1490 = vmatmul.bf16.vlgmr.msrb.gmra.mxu0 %v7614_v14  ;;  %v1184_v1 = vadd.f32 %v1183_v44, %v1135_v55  ;;  %v982_v17 = vpop.xlane.xlu0 %981  ;;  %v1836_v55 = vpack.c.bf16 %v4226_v59, %v4225_v10 }
 0x1a4   :  { %1539 = vmatmul.bf16.vlgmr.msrb.gmra.mxu1 %v7615_v41  ;;  %1841 = vmatpush.bf16.msra.mxu0 %v1812_v50  ;;  %v3266_v41 = vperm.slane %v982_v17, %v5688_v43 }
 0x1a5   :  { %v979_v20 = vmax.f32 %v962_v24, 0.0  ;;  %1588 = vmatmul.bf16.vlgmr.msrb.gmra.mxu2 %v7616_v63  ;;  %1988 = vmatpush.bf16.msra.mxu3 %v1836_v55 }
 0x1a6   :  { %1637 = vmatmul.bf16.vlgmr.msrb.gmra.mxu3 %v7617_v42 }
 0x1a7   :  { %v1025_v35 = vsel %vm622_vm0, %v979_v20, 0.0 }
 0x1a8   :  { %v1232_v32 = vpop.f32.mrf.mxu2  ;;  %1026 = vadd.xlane.f32.xlu1 %v1025_v35  ;;  %v1136_v20 = vpop.f32.mrf.mxu0 }
 0x1a9   :  { %v1233_v44 = vadd.f32 %v1232_v32, %v1184_v1  ;;  %v1281_v24 = vpop.f32.mrf.mxu3  ;;  %v1185_v61 = vpop.f32.mrf.mxu1  ;;  %v1137_v42 = vadd.f32 %v1136_v20, %v5422_v26  ;;  %v4194_v1 = vld [vmem:[%s7491_s0 + $0x8d8] sm:$0xff] }
 0x1aa   :  { %v1820_v56 = vpack.c.bf16 %v4194_v1, %v4193_v16  ;;  %v4175_v16 = vld [vmem:[%s7491_s0 + $0x840] sm:$0xff] }
 0x1ab   :  { %v1282_v36 = vadd.f32 %v1281_v24, %v1233_v44  ;;  %v985_v63 = vpop.xlane.xlu2 %984  ;;  %v1186_v52 = vadd.f32 %v1185_v61, %v1137_v42  ;;  %v7618_v42 = vld [vmem:[#allocation6_spill] sm:$0xff] }
 0x1ac   :  { %v3267_v14 = vperm.slane %v985_v63, %v5711_v39  ;;  %1890 = vmatpush.bf16.msra.mxu1 %v1820_v56  ;;  %v4207_v61 = vld [vmem:[%s7491_s0 + $0x940] sm:$0xff] }
 0x1ad   :  { %v1321_v8 = vmax.f32 %v1282_v36, 0.0  ;;  %v4208_v36 = vld [vmem:[%s7491_s0 + $0x948] sm:$0xff] }
 0x1ae   :  { %v3268_v35 = vsel %vm3191_vm1, %v3267_v14, %v3266_v41  ;;  %v1827_v56 = vpack.c.bf16 %v4208_v36, %v4207_v61  ;;  %v7619_v61 = vld [vmem:[#allocation30_spill] sm:$0xff] }
 0x1af   :  { %v1337_v10 = vsel %vm622_vm0, %v1321_v8, 0.0 }
 0x1b0   :  { %v1234_v59 = vpop.f32.mrf.mxu2  ;;  %1338 = vadd.xlane.f32.xlu0 %v1337_v10  ;;  %v1139_v32 = vpop.f32.mrf.mxu0  ;;  %v4224_v10 = vld [vmem:[%s7491_s0 + $0x9c8] sm:$0xff]  ;;  %1940 = vmatpush.bf16.msra.mxu2 %v1827_v56 }
 0x1b1   :  { %v1235_v17 = vadd.f32 %v1234_v59, %v1186_v52  ;;  %v1283_v63 = vpop.f32.mrf.mxu3  ;;  %v1140_v50 = vadd.f32 %v1139_v32, %v5431_v51  ;;  %v1188_v55 = vpop.f32.mrf.mxu1  ;;  %v4223_v52 = vld [vmem:[%s7491_s0 + $0x9c0] sm:$0xff] }
 0x1b3   :  { %v1284_v44 = vadd.f32 %v1283_v63, %v1235_v17  ;;  %v988_v24 = vpop.xlane.xlu2 %987  ;;  %1495 = vmatmul.bf16.gmra.mxu0 %v4965_v29  ;;  %v1189_v41 = vadd.f32 %v1188_v55, %v1140_v50  ;;  %v1835_v63 = vpack.c.bf16 %v4224_v10, %v4223_v52 }
 0x1b4   :  { %v3269_v20 = vperm.slane %v988_v24, %v5725_v15  ;;  %1544 = vmatmul.bf16.gmra.mxu1 %v4967_v30 }
 0x1b5   :  { %v1322_v14 = vmax.f32 %v1284_v44, 0.0  ;;  %1593 = vmatmul.bf16.gmra.mxu2 %v4969_v31  ;;  %1989 = vmatpush.bf16.msra.mxu3 %v1835_v63 }
 0x1b6   :  { %v3270_v8 = vsel %vm3195_vm2, %v3269_v20, %v3268_v35  ;;  %1642 = vmatmul.bf16.gmra.mxu3 %v7618_v42  ;;  %v4176_v35 = vld [vmem:[%s7491_s0 + $0x848] sm:$0xff] }
 0x1b7   :  { %v1340_v1 = vsel %vm622_vm0, %v1322_v14, 0.0  ;;  %v1811_v17 = vpack.c.bf16 %v4176_v35, %v4175_v16 }
 0x1b8   :  { %v1237_v59 = vpop.f32.mrf.mxu2  ;;  %1341 = vadd.xlane.f32.xlu1 %v1340_v1  ;;  %v1141_v55 = vpop.f32.mrf.mxu0  ;;  %v4191_v1 = vld [vmem:[%s7491_s0 + $0x8c0] sm:$0xff] }
 0x1b9   :  { %v1238_v32 = vadd.f32 %v1237_v59, %v1189_v41  ;;  %v1286_v50 = vpop.f32.mrf.mxu3  ;;  %v1190_v44 = vpop.f32.mrf.mxu1  ;;  %1842 = vmatpush.bf16.msra.mxu0 %v1811_v17  ;;  %v1142_v20 = vadd.f32 %v1141_v55, %v5458_v38  ;;  %v4192_v41 = vld [vmem:[%s7491_s0 + $0x8c8] sm:$0xff] }
 0x1ba   :  { %v1819_v56 = vpack.c.bf16 %v4192_v41, %v4191_v1  ;;  %v4206_v1 = vld [vmem:[%s7491_s0 + $0x938] sm:$0xff]  ;;  %v4173_v41 = vld [vmem:[%s7491_s0 + $0x830] sm:$0xff] }
 0x1bb   :  { %v1287_v24 = vadd.f32 %v1286_v50, %v1238_v32  ;;  %v991_v14 = vpop.xlane.xlu0 %990  ;;  %v1191_v35 = vadd.f32 %v1190_v44, %v1142_v20  ;;  %v7620_v44 = vld [vmem:[#allocation8_spill] sm:$0xff] }
 0x1bc   :  { %v3271_v36 = vperm.slane %v991_v14, %v7619_v61  ;;  %1891 = vmatpush.bf16.msra.mxu1 %v1819_v56  ;;  %v4205_v20 = vld [vmem:[%s7491_s0 + $0x930] sm:$0xff] }
 0x1bd   :  { %v1323_v42 = vmax.f32 %v1287_v24, 0.0 }
 0x1be   :  { %v3272_v16 = vsel %vm3199_vm3, %v3271_v36, %v3270_v8 }
 0x1bf   :  { %v1343_v52 = vsel %vm622_vm0, %v1323_v42, 0.0 }
 0x1c0   :  { %v1239_v10 = vpop.f32.mrf.mxu2  ;;  %1344 = vadd.xlane.f32.xlu1 %v1343_v52  ;;  %v1144_v63 = vpop.f32.mrf.mxu0  ;;  %v4221_v52 = vld [vmem:[%s7491_s0 + $0x9b0] sm:$0xff] }
 0x1c1   :  { %v1240_v59 = vadd.f32 %v1239_v10, %v1191_v35  ;;  %v1288_v17 = vpop.f32.mrf.mxu3  ;;  %v1145_v32 = vadd.f32 %v1144_v63, %v5467_v3  ;;  %v1193_v50 = vpop.f32.mrf.mxu1  ;;  %v1826_v35 = vpack.c.bf16 %v4206_v1, %v4205_v20  ;;  %v4222_v10 = vld [vmem:[%s7491_s0 + $0x9b8] sm:$0xff]  ;;  %v7621_v1 = vld [vmem:[#allocation31_spill] sm:$0xff] }
 0x1c2   :  { %v1834_v63 = vpack.c.bf16 %v4222_v10, %v4221_v52 }
 0x1c3   :  { %v1289_v55 = vadd.f32 %v1288_v17, %v1240_v59  ;;  %v994_v24 = vpop.xlane.xlu2 %993  ;;  %1500 = vmatmul.bf16.gmra.mxu0 %v5028_v57  ;;  %v1194_v36 = vadd.f32 %v1193_v50, %v1145_v32  ;;  %1941 = vmatpush.bf16.msra.mxu2 %v1826_v35 }
 0x1c4   :  { %v3273_v14 = vperm.slane %v994_v24, %v5767_v49  ;;  %1549 = vmatmul.bf16.gmra.mxu1 %v5030_v58  ;;  %1990 = vmatpush.bf16.msra.mxu3 %v1834_v63 }
 0x1c5   :  { %v1324_v8 = vmax.f32 %v1289_v55, 0.0  ;;  %1598 = vmatmul.bf16.gmra.mxu2 %v5032_v60 }
 0x1c6   :  { %v3274_v42 = vsel %vm3203_vm4, %v3273_v14, %v3272_v16  ;;  %1647 = vmatmul.bf16.gmra.mxu3 %v7620_v44  ;;  %v4174_v16 = vld [vmem:[%s7491_s0 + $0x838] sm:$0xff] }
 0x1c7   :  { %v1346_v56 = vsel %vm622_vm0, %v1324_v8, 0.0  ;;  %v1810_v17 = vpack.c.bf16 %v4174_v16, %v4173_v41 }
 0x1c8   :  { %v1242_v59 = vpop.f32.mrf.mxu2  ;;  %1347 = vadd.xlane.f32.xlu0 %v1346_v56  ;;  %v1146_v55 = vpop.f32.mrf.mxu0  ;;  %v4189_v56 = vld [vmem:[%s7491_s0 + $0x8b0] sm:$0xff] }
 0x1c9   :  { %v1243_v32 = vadd.f32 %v1242_v59, %v1194_v36  ;;  %v1291_v50 = vpop.f32.mrf.mxu3  ;;  %v1195_v24 = vpop.f32.mrf.mxu1  ;;  %1843 = vmatpush.bf16.msra.mxu0 %v1810_v17  ;;  %v1147_v8 = vadd.f32 %v1146_v55, %v5494_v48  ;;  %v4190_v36 = vld [vmem:[%s7491_s0 + $0x8b8] sm:$0xff] }
 0x1ca   :  { %v1818_v35 = vpack.c.bf16 %v4190_v36, %v4189_v56  ;;  %v4204_v56 = vld [vmem:[%s7491_s0 + $0x928] sm:$0xff]  ;;  %v4171_v36 = vld [vmem:[%s7491_s0 + $0x820] sm:$0xff] }
 0x1cb   :  { %v1292_v14 = vadd.f32 %v1291_v50, %v1243_v32  ;;  %v997_v20 = vpop.xlane.xlu2 %996  ;;  %v1196_v16 = vadd.f32 %v1195_v24, %v1147_v8  ;;  %v7622_v24 = vld [vmem:[#allocation10_spill] sm:$0xff] }
 0x1cc   :  { %v3275_v44 = vperm.slane %v997_v20, %v7621_v1  ;;  %1892 = vmatpush.bf16.msra.mxu1 %v1818_v35  ;;  %v4203_v8 = vld [vmem:[%s7491_s0 + $0x920] sm:$0xff] }
 0x1cd   :  { %v1325_v60 = vmax.f32 %v1292_v14, 0.0 }
 0x1ce   :  { %v3276_v41 = vsel %vm3207_vm5, %v3275_v44, %v3274_v42 }
 0x1cf   :  { %v1349_v52 = vsel %vm622_vm0, %v1325_v60, 0.0 }
 0x1d0   :  { %v1244_v10 = vpop.f32.mrf.mxu2  ;;  %1350 = vadd.xlane.f32.xlu0 %v1349_v52  ;;  %v1149_v63 = vpop.f32.mrf.mxu0  ;;  %v4219_v52 = vld [vmem:[%s7491_s0 + $0x9a0] sm:$0xff] }
 0x1d1   :  { %v1245_v59 = vadd.f32 %v1244_v10, %v1196_v16  ;;  %v1293_v17 = vpop.f32.mrf.mxu3  ;;  %v1150_v32 = vadd.f32 %v1149_v63, %v5504_v18  ;;  %v1198_v50 = vpop.f32.mrf.mxu1  ;;  %v1825_v16 = vpack.c.bf16 %v4204_v56, %v4203_v8  ;;  %v4220_v10 = vld [vmem:[%s7491_s0 + $0x9a8] sm:$0xff]  ;;  %v7623_v56 = vld [vmem:[#allocation32_spill] sm:$0xff] }
 0x1d2   :  { %v1833_v63 = vpack.c.bf16 %v4220_v10, %v4219_v52 }
 0x1d3   :  { %v1294_v55 = vadd.f32 %v1293_v17, %v1245_v59  ;;  %v1000_v14 = vpop.xlane.xlu0 %999  ;;  %1505 = vmatmul.bf16.gmra.mxu0 %v5097_v21  ;;  %v1199_v44 = vadd.f32 %v1198_v50, %v1150_v32  ;;  %1942 = vmatpush.bf16.msra.mxu2 %v1825_v16 }
 0x1d4   :  { %v3277_v20 = vperm.slane %v1000_v14, %v5809_v0  ;;  %1554 = vmatmul.bf16.gmra.mxu1 %v5099_v22  ;;  %1991 = vmatpush.bf16.msra.mxu3 %v1833_v63 }
 0x1d5   :  { %v1326_v42 = vmax.f32 %v1294_v55, 0.0  ;;  %1603 = vmatmul.bf16.gmra.mxu2 %v5101_v23 }
 0x1d6   :  { %v3278_v60 = vsel %vm3211_vm6, %v3277_v20, %v3276_v41  ;;  %1652 = vmatmul.bf16.gmra.mxu3 %v7622_v24  ;;  %v4172_v41 = vld [vmem:[%s7491_s0 + $0x828] sm:$0xff] }
 0x1d7   :  { %v1352_v35 = vsel %vm622_vm0, %v1326_v42, 0.0  ;;  %v1809_v17 = vpack.c.bf16 %v4172_v41, %v4171_v36 }
 0x1d8   :  { %v1247_v59 = vpop.f32.mrf.mxu2  ;;  %1353 = vadd.xlane.f32.xlu1 %v1352_v35  ;;  %v1151_v55 = vpop.f32.mrf.mxu0  ;;  %v4187_v35 = vld [vmem:[%s7491_s0 + $0x8a0] sm:$0xff] }
 0x1d9   :  { %v1248_v32 = vadd.f32 %v1247_v59, %v1199_v44  ;;  %v1296_v50 = vpop.f32.mrf.mxu3  ;;  %v1200_v14 = vpop.f32.mrf.mxu1  ;;  %1844 = vmatpush.bf16.msra.mxu0 %v1809_v17  ;;  %v1152_v42 = vadd.f32 %v1151_v55, %v5530_v11  ;;  %v4188_v44 = vld [vmem:[%s7491_s0 + $0x8a8] sm:$0xff] }
 0x1da   :  { %v1817_v16 = vpack.c.bf16 %v4188_v44, %v4187_v35  ;;  %v4202_v35 = vld [vmem:[%s7491_s0 + $0x918] sm:$0xff]  ;;  %v4169_v44 = vld [vmem:[%s7491_s0 + $0x810] sm:$0xff] }
 0x1db   :  { %v1297_v20 = vadd.f32 %v1296_v50, %v1248_v32  ;;  %v1003_v8 = vpop.xlane.xlu2 %1002  ;;  %v1201_v41 = vadd.f32 %v1200_v14, %v1152_v42  ;;  %v7624_v14 = vld [vmem:[#allocation12_spill] sm:$0xff] }
 0x1dc   :  { %v3279_v24 = vperm.slane %v1003_v8, %v7623_v56  ;;  %1893 = vmatpush.bf16.msra.mxu1 %v1817_v16  ;;  %v4201_v42 = vld [vmem:[%s7491_s0 + $0x910] sm:$0xff] }
 0x1dd   :  { %v1327_v23 = vmax.f32 %v1297_v20, 0.0 }
 0x1de   :  { %v3280_v36 = vsel %vm3215_vm7, %v3279_v24, %v3278_v60 }
 0x1df   :  { %v1355_v52 = vsel %vm622_vm0, %v1327_v23, 0.0 }
 0x1e0   :  { %v1249_v10 = vpop.f32.mrf.mxu2  ;;  %1356 = vadd.xlane.f32.xlu0 %v1355_v52  ;;  %v1154_v63 = vpop.f32.mrf.mxu0  ;;  %v4217_v52 = vld [vmem:[%s7491_s0 + $0x990] sm:$0xff] }
 0x1e1   :  { %v1250_v59 = vadd.f32 %v1249_v10, %v1201_v41  ;;  %v1298_v17 = vpop.f32.mrf.mxu3  ;;  %v1155_v32 = vadd.f32 %v1154_v63, %v5540_v45  ;;  %v1203_v50 = vpop.f32.mrf.mxu1  ;;  %v1824_v41 = vpack.c.bf16 %v4202_v35, %v4201_v42  ;;  %v4218_v10 = vld [vmem:[%s7491_s0 + $0x998] sm:$0xff] }
 0x1e2   :  { %v1832_v63 = vpack.c.bf16 %v4218_v10, %v4217_v52  ;;  %v7625_v35 = vld [vmem:[#allocation33_spill] sm:$0xff] }
 0x1e3   :  { %v1299_v55 = vadd.f32 %v1298_v17, %v1250_v59  ;;  %v1006_v20 = vpop.xlane.xlu2 %1005  ;;  %1510 = vmatmul.bf16.gmra.mxu0 %v5166_v53  ;;  %v1204_v24 = vadd.f32 %v1203_v50, %v1155_v32  ;;  %1943 = vmatpush.bf16.msra.mxu2 %v1824_v41 }
 0x1e4   :  { %v3281_v8 = vperm.slane %v1006_v20, %v5851_v2  ;;  %1559 = vmatmul.bf16.gmra.mxu1 %v5168_v54  ;;  %1992 = vmatpush.bf16.msra.mxu3 %v1832_v63 }
 0x1e5   :  { %v1328_v60 = vmax.f32 %v1299_v55, 0.0  ;;  %1608 = vmatmul.bf16.gmra.mxu2 %v5170_v62 }
 0x1e6   :  { %v3282_v23 = vsel %vm3219_vm8, %v3281_v8, %v3280_v36  ;;  %1657 = vmatmul.bf16.gmra.mxu3 %v7624_v14  ;;  %v4170_v36 = vld [vmem:[%s7491_s0 + $0x818] sm:$0xff] }
 0x1e7   :  { %v1358_v16 = vsel %vm622_vm0, %v1328_v60, 0.0  ;;  %v1808_v17 = vpack.c.bf16 %v4170_v36, %v4169_v44 }
 0x1e8   :  { %v1252_v59 = vpop.f32.mrf.mxu2  ;;  %1359 = vadd.xlane.f32.xlu0 %v1358_v16  ;;  %v1156_v55 = vpop.f32.mrf.mxu0  ;;  %v4185_v16 = vld [vmem:[%s7491_s0 + $0x890] sm:$0xff] }
 0x1e9   :  { %v1253_v32 = vadd.f32 %v1252_v59, %v1204_v24  ;;  %v1301_v50 = vpop.f32.mrf.mxu3  ;;  %v1205_v20 = vpop.f32.mrf.mxu1  ;;  %1845 = vmatpush.bf16.msra.mxu0 %v1808_v17  ;;  %v1157_v60 = vadd.f32 %v1156_v55, %v5566_v27  ;;  %v4186_v24 = vld [vmem:[%s7491_s0 + $0x898] sm:$0xff] }
 0x1ea   :  { %v1816_v41 = vpack.c.bf16 %v4186_v24, %v4185_v16  ;;  %v4200_v16 = vld [vmem:[%s7491_s0 + $0x908] sm:$0xff]  ;;  %v4167_v24 = vld [vmem:[%s7491_s0 + $0x800] sm:$0xff] }
 0x1eb   :  { %v1302_v8 = vadd.f32 %v1301_v50, %v1253_v32  ;;  %v1009_v42 = vpop.xlane.xlu1 %1008  ;;  %v1206_v36 = vadd.f32 %v1205_v20, %v1157_v60  ;;  %v7626_v20 = vld [vmem:[#allocation16_spill] sm:$0xff]  ;;  %v4199_v60 = vld [vmem:[%s7491_s0 + $0x900] sm:$0xff] }
 0x1ec   :  { %v3283_v14 = vperm.slane %v1009_v42, %v7625_v35  ;;  %1894 = vmatpush.bf16.msra.mxu1 %v1816_v41 }
 0x1ed   :  { %v1329_v62 = vmax.f32 %v1302_v8, 0.0 }
 0x1ee   :  { %v3284_v44 = vsel %vm3223_vm9, %v3283_v14, %v3282_v23 }
 0x1ef   :  { %v1361_v52 = vsel %vm622_vm0, %v1329_v62, 0.0 }
 0x1f0   :  { %v1254_v10 = vpop.f32.mrf.mxu2  ;;  %1362 = vadd.xlane.f32.xlu2 %v1361_v52  ;;  %v1159_v63 = vpop.f32.mrf.mxu0  ;;  %v4215_v52 = vld [vmem:[%s7491_s0 + $0x980] sm:$0xff] }
 0x1f1   :  { %v1255_v59 = vadd.f32 %v1254_v10, %v1206_v36  ;;  %v1303_v17 = vpop.f32.mrf.mxu3  ;;  %v1160_v32 = vadd.f32 %v1159_v63, %v5576_v13  ;;  %v1208_v50 = vpop.f32.mrf.mxu1  ;;  %v1823_v36 = vpack.c.bf16 %v4200_v16, %v4199_v60  ;;  %v4216_v10 = vld [vmem:[%s7491_s0 + $0x988] sm:$0xff] }
 0x1f2   :  { %v1831_v63 = vpack.c.bf16 %v4216_v10, %v4215_v52  ;;  %v7627_v16 = vld [vmem:[#allocation35_spill] sm:$0xff] }
 0x1f3   :  { %v1304_v55 = vadd.f32 %v1303_v17, %v1255_v59  ;;  %v1012_v8 = vpop.xlane.xlu0 %1011  ;;  %1515 = vmatmul.bf16.gmra.mxu0 %v5238_v28  ;;  %v1209_v14 = vadd.f32 %v1208_v50, %v1160_v32  ;;  %1944 = vmatpush.bf16.msra.mxu2 %v1823_v36 }
 0x1f4   :  { %v3285_v42 = vperm.slane %v1012_v8, %v5893_v12  ;;  %1564 = vmatmul.bf16.gmra.mxu1 %v5240_v33  ;;  %1993 = vmatpush.bf16.msra.mxu3 %v1831_v63 }
 0x1f5   :  { %v1330_v23 = vmax.f32 %v1304_v55, 0.0  ;;  %1613 = vmatmul.bf16.gmra.mxu2 %v5242_v34 }
 0x1f6   :  { %v3286_v62 = vsel %vm3227_vm10, %v3285_v42, %v3284_v44  ;;  %1662 = vmatmul.bf16.gmra.mxu3 %v7626_v20  ;;  %v4168_v44 = vld [vmem:[%s7491_s0 + $0x808] sm:$0xff] }
 0x1f7   :  { %v1364_v41 = vsel %vm622_vm0, %v1330_v23, 0.0  ;;  %v1807_v17 = vpack.c.bf16 %v4168_v44, %v4167_v24 }
 0x1f8   :  { %v1257_v59 = vpop.f32.mrf.mxu2  ;;  %1365 = vadd.xlane.f32.xlu1 %v1364_v41  ;;  %v1161_v55 = vpop.f32.mrf.mxu0  ;;  %v4183_v41 = vld [vmem:[%s7491_s0 + $0x880] sm:$0xff] }
 0x1f9   :  { %v1258_v32 = vadd.f32 %v1257_v59, %v1209_v14  ;;  %v1306_v50 = vpop.f32.mrf.mxu3  ;;  %v1210_v8 = vpop.f32.mrf.mxu1  ;;  %1846 = vmatpush.bf16.msra.mxu0 %v1807_v17  ;;  %v1162_v23 = vadd.f32 %v1161_v55, %v5602_v9  ;;  %v4184_v14 = vld [vmem:[%s7491_s0 + $0x888] sm:$0xff] }
 0x1fa   :  { %v1815_v36 = vpack.c.bf16 %v4184_v14, %v4183_v41  ;;  %v4278_v41 = vld [vmem:[%s7491_s0 + $0xb78] sm:$0xff]  ;;  %v4245_v14 = vld [vmem:[%s7491_s0 + $0xa70] sm:$0xff] }
 0x1fb   :  { %v1307_v42 = vadd.f32 %v1306_v50, %v1258_v32  ;;  %v1015_v60 = vpop.xlane.xlu2 %1014  ;;  %v1211_v44 = vadd.f32 %v1210_v8, %v1162_v23  ;;  %v7628_v8 = vld [vmem:[#allocation20_spill] sm:$0xff] }
 0x1fc   :  { %v3287_v20 = vperm.slane %v1015_v60, %v7627_v16  ;;  %1895 = vmatpush.bf16.msra.mxu1 %v1815_v36  ;;  %v4277_v23 = vld [vmem:[%s7491_s0 + $0xb70] sm:$0xff] }
 0x1fd   :  { %v1331_v34 = vmax.f32 %v1307_v42, 0.0 }
 0x1fe   :  { %v3288_v24 = vsel %vm3231_vm11, %v3287_v20, %v3286_v62 }
 0x1ff   :  { %v1367_v52 = vsel %vm622_vm0, %v1331_v34, 0.0 }
 0x200   :  { %v1259_v10 = vpop.f32.mrf.mxu2  ;;  %1368 = vadd.xlane.f32.xlu0 %v1367_v52  ;;  %v1164_v63 = vpop.f32.mrf.mxu0  ;;  %v4293_v52 = vld [vmem:[%s7491_s0 + $0xbf0] sm:$0xff] }
 0x201   :  { %v1260_v59 = vadd.f32 %v1259_v10, %v1211_v44  ;;  %v1308_v17 = vpop.f32.mrf.mxu3  ;;  %v1165_v32 = vadd.f32 %v1164_v63, %v5612_v47  ;;  %v1213_v50 = vpop.f32.mrf.mxu1  ;;  %v2187_v44 = vpack.c.bf16 %v4278_v41, %v4277_v23  ;;  %v4294_v10 = vld [vmem:[%s7491_s0 + $0xbf8] sm:$0xff] }
 0x202   :  { %v2195_v63 = vpack.c.bf16 %v4294_v10, %v4293_v52  ;;  %v7629_v41 = vld [vmem:[#allocation37_spill] sm:$0xff] }
 0x203   :  { %v1309_v55 = vadd.f32 %v1308_v17, %v1260_v59  ;;  %v1018_v42 = vpop.xlane.xlu1 %1017  ;;  %1520 = vmatmul.bf16.gmra.mxu0 %v5298_v4  ;;  %v1214_v20 = vadd.f32 %v1213_v50, %v1165_v32  ;;  %2294 = vmatpush.bf16.msrb.mxu2 %v2187_v44 }
 0x204   :  { %v3289_v60 = vperm.slane %v1018_v42, %v5935_v37  ;;  %1569 = vmatmul.bf16.gmra.mxu1 %v5300_v5  ;;  %2343 = vmatpush.bf16.msrb.mxu3 %v2195_v63 }
 0x205   :  { %v1332_v62 = vmax.f32 %v1309_v55, 0.0  ;;  %1618 = vmatmul.bf16.gmra.mxu2 %v5302_v6 }
 0x206   :  { %v3290_v34 = vsel %vm3235_vm12, %v3289_v60, %v3288_v24  ;;  %1667 = vmatmul.bf16.gmra.mxu3 %v7628_v8  ;;  %v4246_v24 = vld [vmem:[%s7491_s0 + $0xa78] sm:$0xff] }
 0x207   :  { %v1370_v36 = vsel %vm622_vm0, %v1332_v62, 0.0  ;;  %v2171_v17 = vpack.c.bf16 %v4246_v24, %v4245_v14 }
 0x208   :  { %v1262_v59 = vpop.f32.mrf.mxu2  ;;  %1371 = vadd.xlane.f32.xlu2 %v1370_v36  ;;  %v1166_v55 = vpop.f32.mrf.mxu0  ;;  %v4261_v36 = vld [vmem:[%s7491_s0 + $0xaf0] sm:$0xff] }
 0x209   :  { %v1263_v32 = vadd.f32 %v1262_v59, %v1214_v20  ;;  %v1311_v50 = vpop.f32.mrf.mxu3  ;;  %v1215_v42 = vpop.f32.mrf.mxu1  ;;  %2196 = vmatpush.bf16.msrb.mxu0 %v2171_v17  ;;  %v1167_v62 = vadd.f32 %v1166_v55, %v5638_v46  ;;  %v4262_v20 = vld [vmem:[%s7491_s0 + $0xaf8] sm:$0xff]  ;;  %v7631_v46 = vld [vmem:[#allocation22_spill] sm:$0xff] }
 0x20a   :  { %v2179_v44 = vpack.c.bf16 %v4262_v20, %v4261_v36  ;;  %v4243_v36 = vld [vmem:[%s7491_s0 + $0xa60] sm:$0xff] }
 0x20b   :  { %v1312_v60 = vadd.f32 %v1311_v50, %v1263_v32  ;;  %v1021_v23 = vpop.xlane.xlu0 %1020  ;;  %v1216_v24 = vadd.f32 %v1215_v42, %v1167_v62  ;;  %v4275_v42 = vld [vmem:[%s7491_s0 + $0xb60] sm:$0xff]  ;;  %v4276_v62 = vld [vmem:[%s7491_s0 + $0xb68] sm:$0xff] }
 0x20c   :  { %v3291_v8 = vperm.slane %v1021_v23, %v7629_v41  ;;  %2245 = vmatpush.bf16.msrb.mxu1 %v2179_v44  ;;  %v2186_v44 = vpack.c.bf16 %v4276_v62, %v4275_v42 }
 0x20d   :  { %v1333_v6 = vmax.f32 %v1312_v60, 0.0  ;;  %v7630_v60 = vld [vmem:[#allocation21_spill] sm:$0xff] }
 0x20e   :  { %v3292_v14 = vsel %vm7555_vm13, %v3291_v8, %v3290_v34  ;;  %v7632_v34 = vld [vmem:[#allocation23_spill] sm:$0xff]  ;;  %2295 = vmatpush.bf16.msrb.mxu2 %v2186_v44  ;;  %vm3586_vm13 = vcmask 1040384  }
 0x20f   :  { %v1373_v52 = vsel %vm622_vm0, %v1333_v6, 0.0  ;;  %v7633_v6 = vld [vmem:[#allocation24_spill] sm:$0xff] }
 0x210   :  { %v1264_v10 = vpop.f32.mrf.mxu2  ;;  %1374 = vadd.xlane.f32.xlu1 %v1373_v52  ;;  %v1169_v63 = vpop.f32.mrf.mxu0  ;;  %v4291_v52 = vld [vmem:[%s7491_s0 + $0xbe0] sm:$0xff] }
 0x211   :  { %v1265_v59 = vadd.f32 %v1264_v10, %v1216_v24  ;;  %v1313_v17 = vpop.f32.mrf.mxu3  ;;  %v1170_v32 = vadd.f32 %v1169_v63, %v5648_v25  ;;  %v1218_v50 = vpop.f32.mrf.mxu1  ;;  %v4244_v24 = vld [vmem:[%s7491_s0 + $0xa68] sm:$0xff] }
 0x212   :  { %v4292_v10 = vld [vmem:[%s7491_s0 + $0xbe8] sm:$0xff] }
 0x213   :  { %v1314_v55 = vadd.f32 %v1313_v17, %v1265_v59  ;;  %1525 = vmatmul.bf16.gmra.mxu0 %v7630_v60  ;;  %v1219_v41 = vadd.f32 %v1218_v50, %v1170_v32  ;;  %v1024_v8 = vpop.xlane.xlu2 %1023  ;;  %v2170_v17 = vpack.c.bf16 %v4244_v24, %v4243_v36  ;;  %v2194_v63 = vpack.c.bf16 %v4292_v10, %v4291_v52 }
 0x214   :  { %1574 = vmatmul.bf16.gmra.mxu1 %v7631_v46  ;;  %v3293_v32 = vperm.slane %v1024_v8, %v5979_v7  ;;  %v7634_v46 = vld [vmem:[#allocation38_spill] sm:$0xff]  ;;  %v4260_v8 = vld [vmem:[%s7491_s0 + $0xae8] sm:$0xff] }
 0x215   :  { %v1334_v23 = vmax.f32 %v1314_v55, 0.0  ;;  %1623 = vmatmul.bf16.gmra.mxu2 %v7632_v34  ;;  %2197 = vmatpush.bf16.msrb.mxu0 %v2170_v17 }
 0x216   :  { %1672 = vmatmul.bf16.gmra.mxu3 %v7633_v6 }
 0x217   :  { %v1376_v20 = vsel %vm622_vm0, %v1334_v23, 0.0  ;;  %2344 = vmatpush.bf16.msrb.mxu3 %v2194_v63 }
 0x218   :  { %v1267_v59 = vpop.f32.mrf.mxu2  ;;  %1377 = vadd.xlane.f32.xlu0 %v1376_v20  ;;  %v1171_v23 = vpop.f32.mrf.mxu0  ;;  %v3294_v20 = vsel %vm3243_vm14, %v3293_v32, %v3292_v14  ;;  %v7635_v32 = vld [vmem:[#allocation25_spill] sm:$0xff] }
 0x219   :  { %v1268_v50 = vadd.f32 %v1267_v59, %v1219_v41  ;;  %v1316_v55 = vpop.f32.mrf.mxu3  ;;  %v1220_v42 = vpop.f32.mrf.mxu1  ;;  %v1172_v6 = vadd.f32 %v1171_v23, %v5674_v40  ;;  %v4259_v41 = vld [vmem:[%s7491_s0 + $0xae0] sm:$0xff] }
 0x21a   :  { %v2178_v24 = vpack.c.bf16 %v4260_v8, %v4259_v41  ;;  %v4274_v41 = vld [vmem:[%s7491_s0 + $0xb58] sm:$0xff]  ;;  %v4241_v8 = vld [vmem:[%s7491_s0 + $0xa50] sm:$0xff] }
 0x21b   :  { %v1317_v62 = vadd.f32 %v1316_v55, %v1268_v50  ;;  %v1027_v34 = vpop.xlane.xlu1 %1026  ;;  %v1221_v52 = vadd.f32 %v1220_v42, %v1172_v6  ;;  %v7637_v6 = vld [vmem:[#allocation3_spill] sm:$0xff]  ;;  %v7639_v42 = vld [vmem:[#allocation5_spill] sm:$0xff] }
 0x21c   :  { %v3295_v60 = vperm.slane %v1027_v34, %v7634_v46  ;;  %2246 = vmatpush.bf16.msrb.mxu1 %v2178_v24 }
 0x21d   :  { %v1335_v36 = vmax.f32 %v1317_v62, 0.0  ;;  %v7636_v62 = vld [vmem:[#allocation2_spill] sm:$0xff] }
 0x21e   :  { %v3296_v44 = vsel %vm3247_vm15, %v3295_v60, %v3294_v20 }
 0x21f   :  { %v6307_v10 = vsel %vm3586_vm13, %v6017_v19, %v3296_v44  ;;  %v1379_v34 = vsel %vm622_vm0, %v1335_v36, 0.0  ;;  %v7638_v19 = vld [vmem:[#allocation4_spill] sm:$0xff]  ;;  %vm7653_vm13 = vcmask 917312  }
 0x220   :  { %v1269_v59 = vpop.f32.mrf.mxu2  ;;  %1380 = vadd.xlane.f32.xlu2 %v1379_v34  ;;  %v1491_v63 = vpop.f32.mrf.mxu0  ;;  %v4273_v36 = vld [vmem:[%s7491_s0 + $0xb50] sm:$0xff] }
 0x221   :  { %v1270_v14 = vadd.f32 %v1269_v59, %v1221_v52  ;;  %v1318_v17 = vpop.f32.mrf.mxu3  ;;  %v1492_v50 = vadd.f32 %v1491_v63, %v7635_v32  ;;  %v1540_v55 = vpop.f32.mrf.mxu1  ;;  %v2185_v24 = vpack.c.bf16 %v4274_v41, %v4273_v36  ;;  %v4242_v52 = vld [vmem:[%s7491_s0 + $0xa58] sm:$0xff]  ;;  %v4289_v34 = vld [vmem:[%s7491_s0 + $0xbd0] sm:$0xff] }
 0x222   :  { %v4290_v59 = vld [vmem:[%s7491_s0 + $0xbd8] sm:$0xff]  ;;  %v2169_v63 = vpack.c.bf16 %v4242_v52, %v4241_v8  ;;  %v4257_v8 = vld [vmem:[%s7491_s0 + $0xad0] sm:$0xff] }
 0x223   :  { %v1319_v23 = vadd.f32 %v1318_v17, %v1270_v14  ;;  %1847 = vmatmul.bf16.vlgmr.msra.gmra.mxu0 %v7636_v62  ;;  %v1541_v20 = vadd.f32 %v1540_v55, %v1492_v50  ;;  %v1339_v14 = vpop.xlane.xlu0 %1338  ;;  %v2193_v50 = vpack.c.bf16 %v4290_v59, %v4289_v34  ;;  %2296 = vmatpush.bf16.msrb.mxu2 %v2185_v24 }
 0x224   :  { %1896 = vmatmul.bf16.vlgmr.msra.gmra.mxu1 %v7637_v6  ;;  %2198 = vmatpush.bf16.msrb.mxu0 %v2169_v63  ;;  %v3314_v6 = vperm.slane %v1339_v14, %v5688_v43 }
 0x225   :  { %v1336_v60 = vmax.f32 %v1319_v23, 0.0  ;;  %1945 = vmatmul.bf16.vlgmr.msra.gmra.mxu2 %v7638_v19  ;;  %2345 = vmatpush.bf16.msrb.mxu3 %v2193_v50 }
 0x226   :  { %1994 = vmatmul.bf16.vlgmr.msra.gmra.mxu3 %v7639_v42 }
 0x227   :  { %v1382_v44 = vsel %vm622_vm0, %v1336_v60, 0.0 }
 0x228   :  { %v1589_v17 = vpop.f32.mrf.mxu2  ;;  %1383 = vadd.xlane.f32.xlu2 %v1382_v44  ;;  %v1493_v60 = vpop.f32.mrf.mxu0 }
 0x229   :  { %v1590_v55 = vadd.f32 %v1589_v17, %v1541_v20  ;;  %v1638_v23 = vpop.f32.mrf.mxu3  ;;  %v1542_v36 = vpop.f32.mrf.mxu1  ;;  %v1494_v42 = vadd.f32 %v1493_v60, %v5422_v26  ;;  %v4258_v20 = vld [vmem:[%s7491_s0 + $0xad8] sm:$0xff] }
 0x22a   :  { %v2177_v24 = vpack.c.bf16 %v4258_v20, %v4257_v8  ;;  %v4239_v8 = vld [vmem:[%s7491_s0 + $0xa40] sm:$0xff] }
 0x22b   :  { %v1639_v41 = vadd.f32 %v1638_v23, %v1590_v55  ;;  %v1342_v19 = vpop.xlane.xlu1 %1341  ;;  %v1543_v52 = vadd.f32 %v1542_v36, %v1494_v42  ;;  %v7640_v42 = vld [vmem:[#allocation6_spill] sm:$0xff] }
 0x22c   :  { %v3315_v62 = vperm.slane %v1342_v19, %v5711_v39  ;;  %2247 = vmatpush.bf16.msrb.mxu1 %v2177_v24  ;;  %v4271_v36 = vld [vmem:[%s7491_s0 + $0xb40] sm:$0xff] }
 0x22d   :  { %v1678_v32 = vmax.f32 %v1639_v41, 0.0  ;;  %v4272_v41 = vld [vmem:[%s7491_s0 + $0xb48] sm:$0xff] }
 0x22e   :  { %v3316_v44 = vsel %vm3191_vm1, %v3315_v62, %v3314_v6  ;;  %v2184_v24 = vpack.c.bf16 %v4272_v41, %v4271_v36 }
 0x22f   :  { %v1694_v34 = vsel %vm622_vm0, %v1678_v32, 0.0 }
 0x230   :  { %v1591_v59 = vpop.f32.mrf.mxu2  ;;  %1695 = vadd.xlane.f32.xlu2 %v1694_v34  ;;  %v1496_v17 = vpop.f32.mrf.mxu0  ;;  %v4288_v34 = vld [vmem:[%s7491_s0 + $0xbc8] sm:$0xff]  ;;  %2297 = vmatpush.bf16.msrb.mxu2 %v2184_v24 }
 0x231   :  { %v1592_v14 = vadd.f32 %v1591_v59, %v1543_v52  ;;  %v1640_v19 = vpop.f32.mrf.mxu3  ;;  %v1497_v63 = vadd.f32 %v1496_v17, %v5431_v51  ;;  %v1545_v50 = vpop.f32.mrf.mxu1  ;;  %v4287_v52 = vld [vmem:[%s7491_s0 + $0xbc0] sm:$0xff] }
 0x233   :  { %v1641_v55 = vadd.f32 %v1640_v19, %v1592_v14  ;;  %v1345_v23 = vpop.xlane.xlu1 %1344  ;;  %1852 = vmatmul.bf16.gmra.mxu0 %v4965_v29  ;;  %v1546_v6 = vadd.f32 %v1545_v50, %v1497_v63  ;;  %v2192_v19 = vpack.c.bf16 %v4288_v34, %v4287_v52 }
 0x234   :  { %v3317_v60 = vperm.slane %v1345_v23, %v5725_v15  ;;  %1901 = vmatmul.bf16.gmra.mxu1 %v4967_v30 }
 0x235   :  { %v1679_v62 = vmax.f32 %v1641_v55, 0.0  ;;  %1950 = vmatmul.bf16.gmra.mxu2 %v4969_v31  ;;  %2346 = vmatpush.bf16.msrb.mxu3 %v2192_v19 }
 0x236   :  { %v3318_v32 = vsel %vm3195_vm2, %v3317_v60, %v3316_v44  ;;  %1999 = vmatmul.bf16.gmra.mxu3 %v7640_v42  ;;  %v4240_v44 = vld [vmem:[%s7491_s0 + $0xa48] sm:$0xff] }
 0x237   :  { %v1697_v20 = vsel %vm622_vm0, %v1679_v62, 0.0  ;;  %v2168_v14 = vpack.c.bf16 %v4240_v44, %v4239_v8 }
 0x238   :  { %v1594_v59 = vpop.f32.mrf.mxu2  ;;  %1698 = vadd.xlane.f32.xlu0 %v1697_v20  ;;  %v1498_v50 = vpop.f32.mrf.mxu0  ;;  %v4255_v20 = vld [vmem:[%s7491_s0 + $0xac0] sm:$0xff] }
 0x239   :  { %v1595_v17 = vadd.f32 %v1594_v59, %v1546_v6  ;;  %v1643_v63 = vpop.f32.mrf.mxu3  ;;  %v1547_v55 = vpop.f32.mrf.mxu1  ;;  %2199 = vmatpush.bf16.msrb.mxu0 %v2168_v14  ;;  %v1499_v60 = vadd.f32 %v1498_v50, %v5458_v38  ;;  %v4256_v6 = vld [vmem:[%s7491_s0 + $0xac8] sm:$0xff] }
 0x23a   :  { %v2176_v24 = vpack.c.bf16 %v4256_v6, %v4255_v20  ;;  %v4269_v20 = vld [vmem:[%s7491_s0 + $0xb30] sm:$0xff]  ;;  %v4270_v6 = vld [vmem:[%s7491_s0 + $0xb38] sm:$0xff] }
 0x23b   :  { %v1644_v23 = vadd.f32 %v1643_v63, %v1595_v17  ;;  %v1348_v62 = vpop.xlane.xlu0 %1347  ;;  %v1548_v44 = vadd.f32 %v1547_v55, %v1499_v60  ;;  %v7641_v55 = vld [vmem:[#allocation7_spill] sm:$0xff] }
 0x23c   :  { %v3319_v36 = vperm.slane %v1348_v62, %v7619_v61  ;;  %2248 = vmatpush.bf16.msrb.mxu1 %v2176_v24  ;;  %v4237_v24 = vld [vmem:[%s7491_s0 + $0xa30] sm:$0xff] }
 0x23d   :  { %v1680_v41 = vmax.f32 %v1644_v23, 0.0 }
 0x23e   :  { %v3320_v8 = vsel %vm3199_vm3, %v3319_v36, %v3318_v32 }
 0x23f   :  { %v1700_v52 = vsel %vm622_vm0, %v1680_v41, 0.0  ;;  %v7642_v41 = vld [vmem:[#allocation8_spill] sm:$0xff] }
 0x240   :  { %v1596_v34 = vpop.f32.mrf.mxu2  ;;  %1701 = vadd.xlane.f32.xlu1 %v1700_v52  ;;  %v1501_v19 = vpop.f32.mrf.mxu0  ;;  %v2183_v52 = vpack.c.bf16 %v4270_v6, %v4269_v20 }
 0x241   :  { %v1597_v59 = vadd.f32 %v1596_v34, %v1548_v44  ;;  %v1645_v14 = vpop.f32.mrf.mxu3  ;;  %v1502_v17 = vadd.f32 %v1501_v19, %v5467_v3  ;;  %v1550_v63 = vpop.f32.mrf.mxu1  ;;  %v4285_v34 = vld [vmem:[%s7491_s0 + $0xbb0] sm:$0xff] }
 0x242   :  { %2298 = vmatpush.bf16.msrb.mxu2 %v2183_v52 }
 0x243   :  { %v1646_v50 = vadd.f32 %v1645_v14, %v1597_v59  ;;  %v1351_v23 = vpop.xlane.xlu0 %1350  ;;  %1857 = vmatmul.bf16.gmra.mxu0 %v5028_v57  ;;  %v1551_v36 = vadd.f32 %v1550_v63, %v1502_v17  ;;  %v4286_v59 = vld [vmem:[%s7491_s0 + $0xbb8] sm:$0xff] }
 0x244   :  { %v3321_v62 = vperm.slane %v1351_v23, %v5767_v49  ;;  %1906 = vmatmul.bf16.gmra.mxu1 %v5030_v58  ;;  %v2191_v17 = vpack.c.bf16 %v4286_v59, %v4285_v34 }
 0x245   :  { %v1681_v32 = vmax.f32 %v1646_v50, 0.0  ;;  %1955 = vmatmul.bf16.gmra.mxu2 %v7641_v55 }
 0x246   :  { %v3322_v60 = vsel %vm3203_vm4, %v3321_v62, %v3320_v8  ;;  %2004 = vmatmul.bf16.gmra.mxu3 %v7642_v41  ;;  %v4238_v8 = vld [vmem:[%s7491_s0 + $0xa38] sm:$0xff] }
 0x247   :  { %v1703_v44 = vsel %vm622_vm0, %v1681_v32, 0.0  ;;  %v2167_v19 = vpack.c.bf16 %v4238_v8, %v4237_v24  ;;  %2347 = vmatpush.bf16.msrb.mxu3 %v2191_v17 }
 0x248   :  { %v1599_v14 = vpop.f32.mrf.mxu2  ;;  %1704 = vadd.xlane.f32.xlu1 %v1703_v44  ;;  %v1503_v23 = vpop.f32.mrf.mxu0  ;;  %v4253_v44 = vld [vmem:[%s7491_s0 + $0xab0] sm:$0xff] }
 0x249   :  { %v1600_v63 = vadd.f32 %v1599_v14, %v1551_v36  ;;  %v1648_v50 = vpop.f32.mrf.mxu3  ;;  %v1552_v62 = vpop.f32.mrf.mxu1  ;;  %2200 = vmatpush.bf16.msrb.mxu0 %v2167_v19  ;;  %v1504_v20 = vadd.f32 %v1503_v23, %v5494_v48  ;;  %v4254_v36 = vld [vmem:[%s7491_s0 + $0xab8] sm:$0xff] }
 0x24a   :  { %v2175_v52 = vpack.c.bf16 %v4254_v36, %v4253_v44  ;;  %v4267_v44 = vld [vmem:[%s7491_s0 + $0xb20] sm:$0xff]  ;;  %v4268_v36 = vld [vmem:[%s7491_s0 + $0xb28] sm:$0xff] }
 0x24b   :  { %v1649_v32 = vadd.f32 %v1648_v50, %v1600_v63  ;;  %v1354_v6 = vpop.xlane.xlu1 %1353  ;;  %v1553_v8 = vadd.f32 %v1552_v62, %v1504_v20  ;;  %v7644_v20 = vld [vmem:[#allocation10_spill] sm:$0xff] }
 0x24c   :  { %v3323_v41 = vperm.slane %v1354_v6, %v7621_v1  ;;  %2249 = vmatpush.bf16.msrb.mxu1 %v2175_v52  ;;  %v4235_v52 = vld [vmem:[%s7491_s0 + $0xa20] sm:$0xff] }
 0x24d   :  { %v1682_v55 = vmax.f32 %v1649_v32, 0.0 }
 0x24e   :  { %v3324_v24 = vsel %vm3207_vm5, %v3323_v41, %v3322_v60 }
 0x24f   :  { %v1706_v34 = vsel %vm622_vm0, %v1682_v55, 0.0  ;;  %v7643_v55 = vld [vmem:[#allocation9_spill] sm:$0xff] }
 0x250   :  { %v1601_v59 = vpop.f32.mrf.mxu2  ;;  %1707 = vadd.xlane.f32.xlu2 %v1706_v34  ;;  %v1506_v17 = vpop.f32.mrf.mxu0  ;;  %v2182_v34 = vpack.c.bf16 %v4268_v36, %v4267_v44 }
 0x251   :  { %v1602_v14 = vadd.f32 %v1601_v59, %v1553_v8  ;;  %v1650_v19 = vpop.f32.mrf.mxu3  ;;  %v1507_v63 = vadd.f32 %v1506_v17, %v5504_v18  ;;  %v1555_v50 = vpop.f32.mrf.mxu1  ;;  %v4283_v59 = vld [vmem:[%s7491_s0 + $0xba0] sm:$0xff] }
 0x252   :  { %2299 = vmatpush.bf16.msrb.mxu2 %v2182_v34 }
 0x253   :  { %v1651_v23 = vadd.f32 %v1650_v19, %v1602_v14  ;;  %v1357_v32 = vpop.xlane.xlu0 %1356  ;;  %1862 = vmatmul.bf16.gmra.mxu0 %v5097_v21  ;;  %v1556_v41 = vadd.f32 %v1555_v50, %v1507_v63  ;;  %v4284_v14 = vld [vmem:[%s7491_s0 + $0xba8] sm:$0xff] }
 0x254   :  { %v3325_v6 = vperm.slane %v1357_v32, %v5809_v0  ;;  %1911 = vmatmul.bf16.gmra.mxu1 %v5099_v22  ;;  %v2190_v63 = vpack.c.bf16 %v4284_v14, %v4283_v59 }
 0x255   :  { %v1683_v60 = vmax.f32 %v1651_v23, 0.0  ;;  %1960 = vmatmul.bf16.gmra.mxu2 %v7643_v55 }
 0x256   :  { %v3326_v62 = vsel %vm3211_vm6, %v3325_v6, %v3324_v24  ;;  %2009 = vmatmul.bf16.gmra.mxu3 %v7644_v20  ;;  %v4236_v24 = vld [vmem:[%s7491_s0 + $0xa28] sm:$0xff] }
 0x257   :  { %v1709_v8 = vsel %vm622_vm0, %v1683_v60, 0.0  ;;  %v2166_v17 = vpack.c.bf16 %v4236_v24, %v4235_v52  ;;  %2348 = vmatpush.bf16.msrb.mxu3 %v2190_v63 }
 0x258   :  { %v1604_v19 = vpop.f32.mrf.mxu2  ;;  %1710 = vadd.xlane.f32.xlu1 %v1709_v8  ;;  %v1508_v32 = vpop.f32.mrf.mxu0  ;;  %v4251_v8 = vld [vmem:[%s7491_s0 + $0xaa0] sm:$0xff] }
 0x259   :  { %v1605_v50 = vadd.f32 %v1604_v19, %v1556_v41  ;;  %v1653_v23 = vpop.f32.mrf.mxu3  ;;  %v1557_v6 = vpop.f32.mrf.mxu1  ;;  %2201 = vmatpush.bf16.msrb.mxu0 %v2166_v17  ;;  %v1509_v44 = vadd.f32 %v1508_v32, %v5530_v11  ;;  %v4252_v41 = vld [vmem:[%s7491_s0 + $0xaa8] sm:$0xff] }
 0x25a   :  { %v2174_v34 = vpack.c.bf16 %v4252_v41, %v4251_v8  ;;  %v4265_v8 = vld [vmem:[%s7491_s0 + $0xb10] sm:$0xff]  ;;  %v4266_v41 = vld [vmem:[%s7491_s0 + $0xb18] sm:$0xff] }
 0x25b   :  { %v1654_v60 = vadd.f32 %v1653_v23, %v1605_v50  ;;  %v1360_v36 = vpop.xlane.xlu0 %1359  ;;  %v1558_v24 = vadd.f32 %v1557_v6, %v1509_v44  ;;  %v7646_v44 = vld [vmem:[#allocation12_spill] sm:$0xff] }
 0x25c   :  { %v3327_v20 = vperm.slane %v1360_v36, %v7623_v56  ;;  %2250 = vmatpush.bf16.msrb.mxu1 %v2174_v34  ;;  %v4233_v34 = vld [vmem:[%s7491_s0 + $0xa10] sm:$0xff] }
 0x25d   :  { %v1684_v55 = vmax.f32 %v1654_v60, 0.0 }
 0x25e   :  { %v3328_v52 = vsel %vm3215_vm7, %v3327_v20, %v3326_v62 }
 0x25f   :  { %v1712_v59 = vsel %vm622_vm0, %v1684_v55, 0.0  ;;  %v7645_v55 = vld [vmem:[#allocation11_spill] sm:$0xff] }
 0x260   :  { %v1606_v14 = vpop.f32.mrf.mxu2  ;;  %1713 = vadd.xlane.f32.xlu1 %v1712_v59  ;;  %v1511_v63 = vpop.f32.mrf.mxu0  ;;  %v2181_v59 = vpack.c.bf16 %v4266_v41, %v4265_v8 }
 0x261   :  { %v1607_v19 = vadd.f32 %v1606_v14, %v1558_v24  ;;  %v1655_v17 = vpop.f32.mrf.mxu3  ;;  %v1512_v50 = vadd.f32 %v1511_v63, %v5540_v45  ;;  %v1560_v23 = vpop.f32.mrf.mxu1  ;;  %v4281_v14 = vld [vmem:[%s7491_s0 + $0xb90] sm:$0xff] }
 0x262   :  { %2300 = vmatpush.bf16.msrb.mxu2 %v2181_v59 }
 0x263   :  { %v1656_v32 = vadd.f32 %v1655_v17, %v1607_v19  ;;  %v1363_v60 = vpop.xlane.xlu2 %1362  ;;  %1867 = vmatmul.bf16.gmra.mxu0 %v5166_v53  ;;  %v1561_v20 = vadd.f32 %v1560_v23, %v1512_v50  ;;  %v4282_v19 = vld [vmem:[%s7491_s0 + $0xb98] sm:$0xff] }
 0x264   :  { %v3329_v36 = vperm.slane %v1363_v60, %v5851_v2  ;;  %1916 = vmatmul.bf16.gmra.mxu1 %v5168_v54  ;;  %v2189_v50 = vpack.c.bf16 %v4282_v19, %v4281_v14 }
 0x265   :  { %v1685_v62 = vmax.f32 %v1656_v32, 0.0  ;;  %1965 = vmatmul.bf16.gmra.mxu2 %v7645_v55 }
 0x266   :  { %v3330_v6 = vsel %vm3219_vm8, %v3329_v36, %v3328_v52  ;;  %2014 = vmatmul.bf16.gmra.mxu3 %v7646_v44  ;;  %v4234_v52 = vld [vmem:[%s7491_s0 + $0xa18] sm:$0xff] }
 0x267   :  { %v1715_v24 = vsel %vm622_vm0, %v1685_v62, 0.0  ;;  %v2165_v63 = vpack.c.bf16 %v4234_v52, %v4233_v34  ;;  %2349 = vmatpush.bf16.msrb.mxu3 %v2189_v50 }
 0x268   :  { %v1609_v17 = vpop.f32.mrf.mxu2  ;;  %1716 = vadd.xlane.f32.xlu0 %v1715_v24  ;;  %v1513_v60 = vpop.f32.mrf.mxu0  ;;  %v4249_v24 = vld [vmem:[%s7491_s0 + $0xa90] sm:$0xff] }
 0x269   :  { %v1610_v23 = vadd.f32 %v1609_v17, %v1561_v20  ;;  %v1658_v32 = vpop.f32.mrf.mxu3  ;;  %v1562_v36 = vpop.f32.mrf.mxu1  ;;  %2202 = vmatpush.bf16.msrb.mxu0 %v2165_v63  ;;  %v1514_v8 = vadd.f32 %v1513_v60, %v5566_v27  ;;  %v4250_v20 = vld [vmem:[%s7491_s0 + $0xa98] sm:$0xff] }
 0x26a   :  { %v2173_v59 = vpack.c.bf16 %v4250_v20, %v4249_v24  ;;  %v4263_v24 = vld [vmem:[%s7491_s0 + $0xb00] sm:$0xff]  ;;  %v4264_v20 = vld [vmem:[%s7491_s0 + $0xb08] sm:$0xff] }
 0x26b   :  { %v1659_v62 = vadd.f32 %v1658_v32, %v1610_v23  ;;  %v1366_v41 = vpop.xlane.xlu1 %1365  ;;  %v1563_v52 = vadd.f32 %v1562_v36, %v1514_v8  ;;  %v7648_v8 = vld [vmem:[#allocation16_spill] sm:$0xff] }
 0x26c   :  { %v3331_v44 = vperm.slane %v1366_v41, %v7625_v35  ;;  %2251 = vmatpush.bf16.msrb.mxu1 %v2173_v59  ;;  %v4231_v59 = vld [vmem:[%s7491_s0 + $0xa00] sm:$0xff] }
 0x26d   :  { %v1686_v55 = vmax.f32 %v1659_v62, 0.0 }
 0x26e   :  { %v3332_v34 = vsel %vm3223_vm9, %v3331_v44, %v3330_v6 }
 0x26f   :  { %v1718_v14 = vsel %vm622_vm0, %v1686_v55, 0.0  ;;  %v7647_v55 = vld [vmem:[#allocation15_spill] sm:$0xff] }
 0x270   :  { %v1611_v19 = vpop.f32.mrf.mxu2  ;;  %1719 = vadd.xlane.f32.xlu2 %v1718_v14  ;;  %v1516_v50 = vpop.f32.mrf.mxu0  ;;  %v2180_v14 = vpack.c.bf16 %v4264_v20, %v4263_v24 }
 0x271   :  { %v1612_v17 = vadd.f32 %v1611_v19, %v1563_v52  ;;  %v1660_v63 = vpop.f32.mrf.mxu3  ;;  %v1517_v23 = vadd.f32 %v1516_v50, %v5576_v13  ;;  %v1565_v32 = vpop.f32.mrf.mxu1  ;;  %v4279_v19 = vld [vmem:[%s7491_s0 + $0xb80] sm:$0xff] }
 0x272   :  { %2301 = vmatpush.bf16.msrb.mxu2 %v2180_v14 }
 0x273   :  { %v1661_v60 = vadd.f32 %v1660_v63, %v1612_v17  ;;  %v1369_v62 = vpop.xlane.xlu0 %1368  ;;  %1872 = vmatmul.bf16.gmra.mxu0 %v5238_v28  ;;  %v1566_v44 = vadd.f32 %v1565_v32, %v1517_v23  ;;  %v4280_v17 = vld [vmem:[%s7491_s0 + $0xb88] sm:$0xff] }
 0x274   :  { %v3333_v41 = vperm.slane %v1369_v62, %v5893_v12  ;;  %1921 = vmatmul.bf16.gmra.mxu1 %v5240_v33  ;;  %v2188_v23 = vpack.c.bf16 %v4280_v17, %v4279_v19 }
 0x275   :  { %v1687_v6 = vmax.f32 %v1661_v60, 0.0  ;;  %1970 = vmatmul.bf16.gmra.mxu2 %v7647_v55 }
 0x276   :  { %v3334_v36 = vsel %vm3227_vm10, %v3333_v41, %v3332_v34  ;;  %2019 = vmatmul.bf16.gmra.mxu3 %v7648_v8  ;;  %v4232_v34 = vld [vmem:[%s7491_s0 + $0xa08] sm:$0xff] }
 0x277   :  { %v1721_v52 = vsel %vm622_vm0, %v1687_v6, 0.0  ;;  %v2164_v50 = vpack.c.bf16 %v4232_v34, %v4231_v59  ;;  %2350 = vmatpush.bf16.msrb.mxu3 %v2188_v23 }
 0x278   :  { %v1614_v63 = vpop.f32.mrf.mxu2  ;;  %1722 = vadd.xlane.f32.xlu1 %v1721_v52  ;;  %v1518_v62 = vpop.f32.mrf.mxu0  ;;  %v4247_v52 = vld [vmem:[%s7491_s0 + $0xa80] sm:$0xff] }
 0x279   :  { %v1615_v32 = vadd.f32 %v1614_v63, %v1566_v44  ;;  %v1663_v60 = vpop.f32.mrf.mxu3  ;;  %v1567_v41 = vpop.f32.mrf.mxu1  ;;  %2203 = vmatpush.bf16.msrb.mxu0 %v2164_v50  ;;  %v1519_v24 = vadd.f32 %v1518_v62, %v5602_v9  ;;  %v4248_v44 = vld [vmem:[%s7491_s0 + $0xa88] sm:$0xff] }
 0x27a   :  { %v2172_v14 = vpack.c.bf16 %v4248_v44, %v4247_v52  ;;  %v4341_v52 = vld [vmem:[%s7491_s0 + $0xd70] sm:$0xff]  ;;  %v4342_v44 = vld [vmem:[%s7491_s0 + $0xd78] sm:$0xff] }
 0x27b   :  { %v1664_v6 = vadd.f32 %v1663_v60, %v1615_v32  ;;  %v1372_v20 = vpop.xlane.xlu2 %1371  ;;  %v1568_v34 = vadd.f32 %v1567_v41, %v1519_v24  ;;  %v7650_v24 = vld [vmem:[#allocation20_spill] sm:$0xff] }
 0x27c   :  { %v3335_v8 = vperm.slane %v1372_v20, %v7627_v16  ;;  %2252 = vmatpush.bf16.msrb.mxu1 %v2172_v14  ;;  %v4309_v14 = vld [vmem:[%s7491_s0 + $0xc70] sm:$0xff] }
 0x27d   :  { %v1688_v55 = vmax.f32 %v1664_v6, 0.0 }
 0x27e   :  { %v3336_v59 = vsel %vm3231_vm11, %v3335_v8, %v3334_v36 }
 0x27f   :  { %v1724_v19 = vsel %vm622_vm0, %v1688_v55, 0.0  ;;  %v7649_v55 = vld [vmem:[#allocation19_spill] sm:$0xff] }
 0x280   :  { %v1616_v17 = vpop.f32.mrf.mxu2  ;;  %1725 = vadd.xlane.f32.xlu0 %v1724_v19  ;;  %v1521_v23 = vpop.f32.mrf.mxu0  ;;  %v2544_v19 = vpack.c.bf16 %v4342_v44, %v4341_v52  ;;  %v7651_v52 = vld [vmem:[#allocation28_spill] sm:$0xff] }
 0x281   :  { %v1617_v63 = vadd.f32 %v1616_v17, %v1568_v34  ;;  %v1665_v50 = vpop.f32.mrf.mxu3  ;;  %v1522_v32 = vadd.f32 %v1521_v23, %v5612_v47  ;;  %v1570_v60 = vpop.f32.mrf.mxu1  ;;  %v4357_v17 = vld [vmem:[%s7491_s0 + $0xdf0] sm:$0xff] }
 0x282   :  { %2651 = vmatpush.bf16.msra.mxu2 %v2544_v19 }
 0x283   :  { %v1666_v62 = vadd.f32 %v1665_v50, %v1617_v63  ;;  %v1375_v6 = vpop.xlane.xlu1 %1374  ;;  %1877 = vmatmul.bf16.gmra.mxu0 %v5298_v4  ;;  %v1571_v8 = vadd.f32 %v1570_v60, %v1522_v32  ;;  %v4358_v63 = vld [vmem:[%s7491_s0 + $0xdf8] sm:$0xff] }
 0x284   :  { %v3337_v20 = vperm.slane %v1375_v6, %v5935_v37  ;;  %1926 = vmatmul.bf16.gmra.mxu1 %v5300_v5  ;;  %v2552_v32 = vpack.c.bf16 %v4358_v63, %v4357_v17 }
 0x285   :  { %v1689_v36 = vmax.f32 %v1666_v62, 0.0  ;;  %1975 = vmatmul.bf16.gmra.mxu2 %v7649_v55 }
 0x286   :  { %v3338_v41 = vsel %vm3235_vm12, %v3337_v20, %v3336_v59  ;;  %2024 = vmatmul.bf16.gmra.mxu3 %v7650_v24  ;;  %v4310_v59 = vld [vmem:[%s7491_s0 + $0xc78] sm:$0xff] }
 0x287   :  { %v1727_v34 = vsel %vm622_vm0, %v1689_v36, 0.0  ;;  %v2528_v23 = vpack.c.bf16 %v4310_v59, %v4309_v14  ;;  %2700 = vmatpush.bf16.msra.mxu3 %v2552_v32  ;;  %v7652_v24 = vld [vmem:[#allocation37_spill] sm:$0xff] }
 0x288   :  { %v1619_v50 = vpop.f32.mrf.mxu2  ;;  %1728 = vadd.xlane.f32.xlu2 %v1727_v34  ;;  %v1523_v6 = vpop.f32.mrf.mxu0  ;;  %v4325_v34 = vld [vmem:[%s7491_s0 + $0xcf0] sm:$0xff] }
 0x289   :  { %v1620_v60 = vadd.f32 %v1619_v50, %v1571_v8  ;;  %v1668_v62 = vpop.f32.mrf.mxu3  ;;  %v1572_v20 = vpop.f32.mrf.mxu1  ;;  %2553 = vmatpush.bf16.msra.mxu0 %v2528_v23  ;;  %v1524_v44 = vadd.f32 %v1523_v6, %v7651_v52  ;;  %v4326_v8 = vld [vmem:[%s7491_s0 + $0xcf8] sm:$0xff] }
 0x28a   :  { %v2536_v19 = vpack.c.bf16 %v4326_v8, %v4325_v34  ;;  %v7657_v34 = vld [vmem:[#allocation24_spill] sm:$0xff]  ;;  %v4339_v8 = vld [vmem:[%s7491_s0 + $0xd60] sm:$0xff] }
 0x28b   :  { %v1669_v36 = vadd.f32 %v1668_v62, %v1620_v60  ;;  %v1378_v37 = vpop.xlane.xlu0 %1377  ;;  %v1573_v59 = vadd.f32 %v1572_v20, %v1524_v44  ;;  %v7655_v20 = vld [vmem:[#allocation22_spill] sm:$0xff] }
 0x28c   :  { %v3339_v55 = vperm.slane %v1378_v37, %v7652_v24  ;;  %2602 = vmatpush.bf16.msra.mxu1 %v2536_v19  ;;  %v7654_v24 = vld [vmem:[#allocation21_spill] sm:$0xff]  ;;  %v4340_v19 = vld [vmem:[%s7491_s0 + $0xd68] sm:$0xff] }
 0x28d   :  { %v1690_v5 = vmax.f32 %v1669_v36, 0.0 }
 0x28e   :  { %v3340_v14 = vsel %vm7653_vm13, %v3339_v55, %v3338_v41  ;;  %vm3588_vm13 = vcmask 1041408  }
 0x28f   :  { %v1730_v17 = vsel %vm622_vm0, %v1690_v5, 0.0  ;;  %v7656_v5 = vld [vmem:[#allocation23_spill] sm:$0xff] }
 0x290   :  { %v1621_v63 = vpop.f32.mrf.mxu2  ;;  %1731 = vadd.xlane.f32.xlu1 %v1730_v17  ;;  %v1526_v23 = vpop.f32.mrf.mxu0 }
 0x291   :  { %v1622_v50 = vadd.f32 %v1621_v63, %v1573_v59  ;;  %v1670_v37 = vpop.f32.mrf.mxu3  ;;  %v1527_v32 = vadd.f32 %v1526_v23, %v5648_v25  ;;  %v1575_v60 = vpop.f32.mrf.mxu1  ;;  %v4307_v59 = vld [vmem:[%s7491_s0 + $0xc60] sm:$0xff]  ;;  %v2543_v63 = vpack.c.bf16 %v4340_v19, %v4339_v8 }
 0x293   :  { %v1671_v62 = vadd.f32 %v1670_v37, %v1622_v50  ;;  %v1381_v6 = vpop.xlane.xlu2 %1380  ;;  %1882 = vmatmul.bf16.gmra.mxu0 %v7654_v24  ;;  %v1576_v41 = vadd.f32 %v1575_v60, %v1527_v32  ;;  %v4355_v50 = vld [vmem:[%s7491_s0 + $0xde0] sm:$0xff]  ;;  %v4356_v37 = vld [vmem:[%s7491_s0 + $0xde8] sm:$0xff]  ;;  %2652 = vmatpush.bf16.msra.mxu2 %v2543_v63 }
 0x294   :  { %v3341_v36 = vperm.slane %v1381_v6, %v5979_v7  ;;  %1931 = vmatmul.bf16.gmra.mxu1 %v7655_v20  ;;  %v2551_v60 = vpack.c.bf16 %v4356_v37, %v4355_v50 }
 0x295   :  { %v1691_v55 = vmax.f32 %v1671_v62, 0.0  ;;  %1980 = vmatmul.bf16.gmra.mxu2 %v7656_v5 }
 0x296   :  { %v3342_v44 = vsel %vm3243_vm14, %v3341_v36, %v3340_v14  ;;  %2029 = vmatmul.bf16.gmra.mxu3 %v7657_v34  ;;  %v4308_v14 = vld [vmem:[%s7491_s0 + $0xc68] sm:$0xff] }
 0x297   :  { %v1733_v17 = vsel %vm622_vm0, %v1691_v55, 0.0  ;;  %v2527_v32 = vpack.c.bf16 %v4308_v14, %v4307_v59  ;;  %2701 = vmatpush.bf16.msra.mxu3 %v2551_v60  ;;  %v4323_v59 = vld [vmem:[%s7491_s0 + $0xce0] sm:$0xff] }
 0x298   :  { %v1624_v23 = vpop.f32.mrf.mxu2  ;;  %1734 = vadd.xlane.f32.xlu0 %v1733_v17  ;;  %v1528_v36 = vpop.f32.mrf.mxu0 }
 0x299   :  { %v1625_v62 = vadd.f32 %v1624_v23, %v1576_v41  ;;  %v1673_v6 = vpop.f32.mrf.mxu3  ;;  %v1577_v55 = vpop.f32.mrf.mxu1  ;;  %2554 = vmatpush.bf16.msra.mxu0 %v2527_v32  ;;  %v1529_v19 = vadd.f32 %v1528_v36, %v5674_v40  ;;  %v4324_v41 = vld [vmem:[%s7491_s0 + $0xce8] sm:$0xff] }
 0x29a   :  { %v2535_v63 = vpack.c.bf16 %v4324_v41, %v4323_v59  ;;  %v4338_v59 = vld [vmem:[%s7491_s0 + $0xd58] sm:$0xff]  ;;  %v4305_v41 = vld [vmem:[%s7491_s0 + $0xc50] sm:$0xff] }
 0x29b   :  { %v1674_v8 = vadd.f32 %v1673_v6, %v1625_v62  ;;  %v1384_v34 = vpop.xlane.xlu2 %1383  ;;  %v1578_v14 = vadd.f32 %v1577_v55, %v1529_v19  ;;  %v7658_v62 = vld [vmem:[#allocation25_spill] sm:$0xff]  ;;  %v7660_v55 = vld [vmem:[#allocation3_spill] sm:$0xff] }
 0x29c   :  { %v3343_v5 = vperm.slane %v1384_v34, %v7634_v46  ;;  %2603 = vmatpush.bf16.msra.mxu1 %v2535_v63  ;;  %v7659_v46 = vld [vmem:[#allocation2_spill] sm:$0xff]  ;;  %v7662_v19 = vld [vmem:[#allocation5_spill] sm:$0xff] }
 0x29d   :  { %v1692_v20 = vmax.f32 %v1674_v8, 0.0 }
 0x29e   :  { %v3344_v17 = vsel %vm3247_vm15, %v3343_v5, %v3342_v44 }
 0x29f   :  { %v6597_v50 = vsel %vm3588_vm13, %v6307_v10, %v3344_v17  ;;  %v1736_v37 = vsel %vm622_vm0, %v1692_v20, 0.0  ;;  %v7661_v10 = vld [vmem:[#allocation4_spill] sm:$0xff]  ;;  %vm7676_vm13 = vcmask 917312  }
 0x2a0   :  { %v1626_v23 = vpop.f32.mrf.mxu2  ;;  %1737 = vadd.xlane.f32.xlu0 %v1736_v37  ;;  %v1848_v60 = vpop.f32.mrf.mxu0  ;;  %v4337_v20 = vld [vmem:[%s7491_s0 + $0xd50] sm:$0xff] }
 0x2a1   :  { %v1627_v34 = vadd.f32 %v1626_v23, %v1578_v14  ;;  %v1675_v32 = vpop.f32.mrf.mxu3  ;;  %v1849_v6 = vadd.f32 %v1848_v60, %v7658_v62  ;;  %v1897_v36 = vpop.f32.mrf.mxu1  ;;  %v2542_v63 = vpack.c.bf16 %v4338_v59, %v4337_v20  ;;  %v4306_v14 = vld [vmem:[%s7491_s0 + $0xc58] sm:$0xff]  ;;  %v4353_v37 = vld [vmem:[%s7491_s0 + $0xdd0] sm:$0xff] }
 0x2a2   :  { %v4354_v23 = vld [vmem:[%s7491_s0 + $0xdd8] sm:$0xff]  ;;  %v2526_v60 = vpack.c.bf16 %v4306_v14, %v4305_v41  ;;  %v4321_v41 = vld [vmem:[%s7491_s0 + $0xcd0] sm:$0xff] }
 0x2a3   :  { %v1676_v8 = vadd.f32 %v1675_v32, %v1627_v34  ;;  %2204 = vmatmul.bf16.vlgmr.msrb.gmra.mxu0 %v7659_v46  ;;  %v1898_v44 = vadd.f32 %v1897_v36, %v1849_v6  ;;  %v1696_v34 = vpop.xlane.xlu2 %1695  ;;  %v2550_v6 = vpack.c.bf16 %v4354_v23, %v4353_v37  ;;  %2653 = vmatpush.bf16.msra.mxu2 %v2542_v63 }
 0x2a4   :  { %2253 = vmatmul.bf16.vlgmr.msrb.gmra.mxu1 %v7660_v55  ;;  %2555 = vmatpush.bf16.msra.mxu0 %v2526_v60  ;;  %v3362_v55 = vperm.slane %v1696_v34, %v5688_v43 }
 0x2a5   :  { %v1693_v5 = vmax.f32 %v1676_v8, 0.0  ;;  %2302 = vmatmul.bf16.vlgmr.msrb.gmra.mxu2 %v7661_v10  ;;  %2702 = vmatpush.bf16.msra.mxu3 %v2550_v6 }
 0x2a6   :  { %2351 = vmatmul.bf16.vlgmr.msrb.gmra.mxu3 %v7662_v19 }
 0x2a7   :  { %v1739_v17 = vsel %vm622_vm0, %v1693_v5, 0.0 }
 0x2a8   :  { %v1946_v32 = vpop.f32.mrf.mxu2  ;;  %1740 = vadd.xlane.f32.xlu2 %v1739_v17  ;;  %v1850_v5 = vpop.f32.mrf.mxu0 }
 0x2a9   :  { %v1947_v36 = vadd.f32 %v1946_v32, %v1898_v44  ;;  %v1995_v8 = vpop.f32.mrf.mxu3  ;;  %v1899_v20 = vpop.f32.mrf.mxu1  ;;  %v1851_v19 = vadd.f32 %v1850_v5, %v5422_v26  ;;  %v4322_v44 = vld [vmem:[%s7491_s0 + $0xcd8] sm:$0xff] }
 0x2aa   :  { %v2534_v63 = vpack.c.bf16 %v4322_v44, %v4321_v41 }
 0x2ab   :  { %v1996_v59 = vadd.f32 %v1995_v8, %v1947_v36  ;;  %v1699_v10 = vpop.xlane.xlu0 %1698  ;;  %v1900_v14 = vadd.f32 %v1899_v20, %v1851_v19  ;;  %v4335_v19 = vld [vmem:[%s7491_s0 + $0xd40] sm:$0xff]  ;;  %v4336_v20 = vld [vmem:[%s7491_s0 + $0xd48] sm:$0xff] }
 0x2ac   :  { %v3363_v46 = vperm.slane %v1699_v10, %v5711_v39  ;;  %2604 = vmatpush.bf16.msra.mxu1 %v2534_v63  ;;  %v2541_v44 = vpack.c.bf16 %v4336_v20, %v4335_v19  ;;  %v4351_v63 = vld [vmem:[%s7491_s0 + $0xdc0] sm:$0xff] }
 0x2ad   :  { %v2035_v62 = vmax.f32 %v1996_v59, 0.0  ;;  %v4303_v59 = vld [vmem:[%s7491_s0 + $0xc40] sm:$0xff] }
 0x2ae   :  { %v3364_v17 = vsel %vm3191_vm1, %v3363_v46, %v3362_v55  ;;  %2654 = vmatpush.bf16.msra.mxu2 %v2541_v44  ;;  %v4319_v20 = vld [vmem:[%s7491_s0 + $0xcc0] sm:$0xff] }
 0x2af   :  { %v2051_v37 = vsel %vm622_vm0, %v2035_v62, 0.0 }
 0x2b0   :  { %v1948_v23 = vpop.f32.mrf.mxu2  ;;  %2052 = vadd.xlane.f32.xlu2 %v2051_v37  ;;  %v1853_v32 = vpop.f32.mrf.mxu0 }
 0x2b1   :  { %v1949_v34 = vadd.f32 %v1948_v23, %v1900_v14  ;;  %v1997_v10 = vpop.f32.mrf.mxu3  ;;  %v1854_v60 = vadd.f32 %v1853_v32, %v5431_v51  ;;  %v1902_v6 = vpop.f32.mrf.mxu1  ;;  %v4352_v14 = vld [vmem:[%s7491_s0 + $0xdc8] sm:$0xff] }
 0x2b3   :  { %v1998_v36 = vadd.f32 %v1997_v10, %v1949_v34  ;;  %v1702_v8 = vpop.xlane.xlu1 %1701  ;;  %2209 = vmatmul.bf16.gmra.mxu0 %v4965_v29  ;;  %v1903_v55 = vadd.f32 %v1902_v6, %v1854_v60  ;;  %v2549_v34 = vpack.c.bf16 %v4352_v14, %v4351_v63 }
 0x2b4   :  { %v3365_v5 = vperm.slane %v1702_v8, %v5725_v15  ;;  %2258 = vmatmul.bf16.gmra.mxu1 %v4967_v30 }
 0x2b5   :  { %v2036_v46 = vmax.f32 %v1998_v36, 0.0  ;;  %2307 = vmatmul.bf16.gmra.mxu2 %v4969_v31  ;;  %2703 = vmatpush.bf16.msra.mxu3 %v2549_v34 }
 0x2b6   :  { %v3366_v62 = vsel %vm3195_vm2, %v3365_v5, %v3364_v17  ;;  %2356 = vmatmul.bf16.gmra.mxu3 %v7640_v42  ;;  %v4304_v17 = vld [vmem:[%s7491_s0 + $0xc48] sm:$0xff] }
 0x2b7   :  { %v2054_v41 = vsel %vm622_vm0, %v2036_v46, 0.0  ;;  %v2525_v23 = vpack.c.bf16 %v4304_v17, %v4303_v59 }
 0x2b8   :  { %v1951_v37 = vpop.f32.mrf.mxu2  ;;  %2055 = vadd.xlane.f32.xlu0 %v2054_v41  ;;  %v1855_v60 = vpop.f32.mrf.mxu0 }
 0x2b9   :  { %v1952_v10 = vadd.f32 %v1951_v37, %v1903_v55  ;;  %v2000_v32 = vpop.f32.mrf.mxu3  ;;  %v1904_v6 = vpop.f32.mrf.mxu1  ;;  %2556 = vmatpush.bf16.msra.mxu0 %v2525_v23  ;;  %v1856_v8 = vadd.f32 %v1855_v60, %v5458_v38  ;;  %v4320_v55 = vld [vmem:[%s7491_s0 + $0xcc8] sm:$0xff] }
 0x2ba   :  { %v2533_v41 = vpack.c.bf16 %v4320_v55, %v4319_v20  ;;  %v4334_v20 = vld [vmem:[%s7491_s0 + $0xd38] sm:$0xff]  ;;  %v4301_v55 = vld [vmem:[%s7491_s0 + $0xc30] sm:$0xff] }
 0x2bb   :  { %v2001_v36 = vadd.f32 %v2000_v32, %v1952_v10  ;;  %v1705_v5 = vpop.xlane.xlu1 %1704  ;;  %v1905_v44 = vadd.f32 %v1904_v6, %v1856_v8  ;;  %v7663_v6 = vld [vmem:[#allocation7_spill] sm:$0xff] }
 0x2bc   :  { %v3367_v46 = vperm.slane %v1705_v5, %v7619_v61  ;;  %2605 = vmatpush.bf16.msra.mxu1 %v2533_v41 }
 0x2bd   :  { %v2037_v19 = vmax.f32 %v2001_v36, 0.0 }
 0x2be   :  { %v3368_v59 = vsel %vm3199_vm3, %v3367_v46, %v3366_v62  ;;  %v7664_v46 = vld [vmem:[#allocation8_spill] sm:$0xff] }
 0x2bf   :  { %v2057_v17 = vsel %vm622_vm0, %v2037_v19, 0.0  ;;  %v4333_v19 = vld [vmem:[%s7491_s0 + $0xd30] sm:$0xff] }
 0x2c0   :  { %v1953_v63 = vpop.f32.mrf.mxu2  ;;  %2058 = vadd.xlane.f32.xlu2 %v2057_v17  ;;  %v1858_v23 = vpop.f32.mrf.mxu0  ;;  %v4349_v17 = vld [vmem:[%s7491_s0 + $0xdb0] sm:$0xff] }
 0x2c1   :  { %v1954_v14 = vadd.f32 %v1953_v63, %v1905_v44  ;;  %v2002_v37 = vpop.f32.mrf.mxu3  ;;  %v1859_v34 = vadd.f32 %v1858_v23, %v5467_v3  ;;  %v1907_v10 = vpop.f32.mrf.mxu1  ;;  %v2540_v44 = vpack.c.bf16 %v4334_v20, %v4333_v19  ;;  %v4350_v63 = vld [vmem:[%s7491_s0 + $0xdb8] sm:$0xff] }
 0x2c2   :  { %v2548_v23 = vpack.c.bf16 %v4350_v63, %v4349_v17 }
 0x2c3   :  { %v2003_v32 = vadd.f32 %v2002_v37, %v1954_v14  ;;  %v1708_v60 = vpop.xlane.xlu2 %1707  ;;  %2214 = vmatmul.bf16.gmra.mxu0 %v5028_v57  ;;  %v1908_v5 = vadd.f32 %v1907_v10, %v1859_v34  ;;  %2655 = vmatpush.bf16.msra.mxu2 %v2540_v44 }
 0x2c4   :  { %v3369_v36 = vperm.slane %v1708_v60, %v5767_v49  ;;  %2263 = vmatmul.bf16.gmra.mxu1 %v5030_v58  ;;  %2704 = vmatpush.bf16.msra.mxu3 %v2548_v23 }
 0x2c5   :  { %v2038_v62 = vmax.f32 %v2003_v32, 0.0  ;;  %2312 = vmatmul.bf16.gmra.mxu2 %v7663_v6 }
 0x2c6   :  { %v3370_v8 = vsel %vm3203_vm4, %v3369_v36, %v3368_v59  ;;  %2361 = vmatmul.bf16.gmra.mxu3 %v7664_v46  ;;  %v4302_v59 = vld [vmem:[%s7491_s0 + $0xc38] sm:$0xff] }
 0x2c7   :  { %v2060_v41 = vsel %vm622_vm0, %v2038_v62, 0.0  ;;  %v2524_v37 = vpack.c.bf16 %v4302_v59, %v4301_v55 }
 0x2c8   :  { %v1956_v14 = vpop.f32.mrf.mxu2  ;;  %2061 = vadd.xlane.f32.xlu0 %v2060_v41  ;;  %v1860_v32 = vpop.f32.mrf.mxu0  ;;  %v4317_v41 = vld [vmem:[%s7491_s0 + $0xcb0] sm:$0xff] }
 0x2c9   :  { %v1957_v34 = vadd.f32 %v1956_v14, %v1908_v5  ;;  %v2005_v10 = vpop.f32.mrf.mxu3  ;;  %v1909_v60 = vpop.f32.mrf.mxu1  ;;  %2557 = vmatpush.bf16.msra.mxu0 %v2524_v37  ;;  %v1861_v62 = vadd.f32 %v1860_v32, %v5494_v48  ;;  %v4318_v5 = vld [vmem:[%s7491_s0 + $0xcb8] sm:$0xff] }
 0x2ca   :  { %v2532_v44 = vpack.c.bf16 %v4318_v5, %v4317_v41  ;;  %v4331_v41 = vld [vmem:[%s7491_s0 + $0xd20] sm:$0xff]  ;;  %v4332_v5 = vld [vmem:[%s7491_s0 + $0xd28] sm:$0xff] }
 0x2cb   :  { %v2006_v36 = vadd.f32 %v2005_v10, %v1957_v34  ;;  %v1711_v19 = vpop.xlane.xlu1 %1710  ;;  %v1910_v59 = vadd.f32 %v1909_v60, %v1861_v62  ;;  %v7666_v62 = vld [vmem:[#allocation10_spill] sm:$0xff] }
 0x2cc   :  { %v3371_v20 = vperm.slane %v1711_v19, %v7621_v1  ;;  %2606 = vmatpush.bf16.msra.mxu1 %v2532_v44  ;;  %v4299_v44 = vld [vmem:[%s7491_s0 + $0xc20] sm:$0xff] }
 0x2cd   :  { %v2039_v46 = vmax.f32 %v2006_v36, 0.0 }
 0x2ce   :  { %v3372_v55 = vsel %vm3207_vm5, %v3371_v20, %v3370_v8 }
 0x2cf   :  { %v2063_v17 = vsel %vm622_vm0, %v2039_v46, 0.0  ;;  %v7665_v46 = vld [vmem:[#allocation9_spill] sm:$0xff] }
 0x2d0   :  { %v1958_v63 = vpop.f32.mrf.mxu2  ;;  %2064 = vadd.xlane.f32.xlu2 %v2063_v17  ;;  %v1863_v23 = vpop.f32.mrf.mxu0  ;;  %v2539_v17 = vpack.c.bf16 %v4332_v5, %v4331_v41 }
 0x2d1   :  { %v1959_v14 = vadd.f32 %v1958_v63, %v1910_v59  ;;  %v2007_v37 = vpop.f32.mrf.mxu3  ;;  %v1864_v34 = vadd.f32 %v1863_v23, %v5504_v18  ;;  %v1912_v10 = vpop.f32.mrf.mxu1  ;;  %v4347_v63 = vld [vmem:[%s7491_s0 + $0xda0] sm:$0xff] }
 0x2d2   :  { %2656 = vmatpush.bf16.msra.mxu2 %v2539_v17 }
 0x2d3   :  { %v2008_v32 = vadd.f32 %v2007_v37, %v1959_v14  ;;  %v1714_v36 = vpop.xlane.xlu1 %1713  ;;  %2219 = vmatmul.bf16.gmra.mxu0 %v5097_v21  ;;  %v1913_v20 = vadd.f32 %v1912_v10, %v1864_v34  ;;  %v4348_v14 = vld [vmem:[%s7491_s0 + $0xda8] sm:$0xff] }
 0x2d4   :  { %v3373_v19 = vperm.slane %v1714_v36, %v5809_v0  ;;  %2268 = vmatmul.bf16.gmra.mxu1 %v5099_v22  ;;  %v2547_v34 = vpack.c.bf16 %v4348_v14, %v4347_v63 }
 0x2d5   :  { %v2040_v8 = vmax.f32 %v2008_v32, 0.0  ;;  %2317 = vmatmul.bf16.gmra.mxu2 %v7665_v46 }
 0x2d6   :  { %v3374_v60 = vsel %vm3211_vm6, %v3373_v19, %v3372_v55  ;;  %2366 = vmatmul.bf16.gmra.mxu3 %v7666_v62  ;;  %v4300_v55 = vld [vmem:[%s7491_s0 + $0xc28] sm:$0xff] }
 0x2d7   :  { %v2066_v59 = vsel %vm622_vm0, %v2040_v8, 0.0  ;;  %v2523_v23 = vpack.c.bf16 %v4300_v55, %v4299_v44  ;;  %2705 = vmatpush.bf16.msra.mxu3 %v2547_v34 }
 0x2d8   :  { %v1961_v37 = vpop.f32.mrf.mxu2  ;;  %2067 = vadd.xlane.f32.xlu2 %v2066_v59  ;;  %v1865_v36 = vpop.f32.mrf.mxu0  ;;  %v4315_v59 = vld [vmem:[%s7491_s0 + $0xca0] sm:$0xff] }
 0x2d9   :  { %v1962_v10 = vadd.f32 %v1961_v37, %v1913_v20  ;;  %v2010_v32 = vpop.f32.mrf.mxu3  ;;  %v1914_v19 = vpop.f32.mrf.mxu1  ;;  %2558 = vmatpush.bf16.msra.mxu0 %v2523_v23  ;;  %v1866_v41 = vadd.f32 %v1865_v36, %v5530_v11  ;;  %v4316_v20 = vld [vmem:[%s7491_s0 + $0xca8] sm:$0xff] }
 0x2da   :  { %v2531_v17 = vpack.c.bf16 %v4316_v20, %v4315_v59  ;;  %v4329_v59 = vld [vmem:[%s7491_s0 + $0xd10] sm:$0xff]  ;;  %v4330_v20 = vld [vmem:[%s7491_s0 + $0xd18] sm:$0xff] }
 0x2db   :  { %v2011_v8 = vadd.f32 %v2010_v32, %v1962_v10  ;;  %v1717_v5 = vpop.xlane.xlu0 %1716  ;;  %v1915_v55 = vadd.f32 %v1914_v19, %v1866_v41  ;;  %v7668_v41 = vld [vmem:[#allocation12_spill] sm:$0xff] }
 0x2dc   :  { %v3375_v62 = vperm.slane %v1717_v5, %v7623_v56  ;;  %2607 = vmatpush.bf16.msra.mxu1 %v2531_v17  ;;  %v4297_v17 = vld [vmem:[%s7491_s0 + $0xc10] sm:$0xff] }
 0x2dd   :  { %v2041_v46 = vmax.f32 %v2011_v8, 0.0 }
 0x2de   :  { %v3376_v44 = vsel %vm3215_vm7, %v3375_v62, %v3374_v60 }
 0x2df   :  { %v2069_v63 = vsel %vm622_vm0, %v2041_v46, 0.0  ;;  %v7667_v46 = vld [vmem:[#allocation11_spill] sm:$0xff] }
 0x2e0   :  { %v1963_v14 = vpop.f32.mrf.mxu2  ;;  %2070 = vadd.xlane.f32.xlu1 %v2069_v63  ;;  %v1868_v34 = vpop.f32.mrf.mxu0  ;;  %v2538_v63 = vpack.c.bf16 %v4330_v20, %v4329_v59 }
 0x2e1   :  { %v1964_v37 = vadd.f32 %v1963_v14, %v1915_v55  ;;  %v2012_v23 = vpop.f32.mrf.mxu3  ;;  %v1869_v10 = vadd.f32 %v1868_v34, %v5540_v45  ;;  %v1917_v32 = vpop.f32.mrf.mxu1  ;;  %v4345_v14 = vld [vmem:[%s7491_s0 + $0xd90] sm:$0xff] }
 0x2e2   :  { %2657 = vmatpush.bf16.msra.mxu2 %v2538_v63 }
 0x2e3   :  { %v2013_v36 = vadd.f32 %v2012_v23, %v1964_v37  ;;  %v1720_v8 = vpop.xlane.xlu2 %1719  ;;  %2224 = vmatmul.bf16.gmra.mxu0 %v5166_v53  ;;  %v1918_v62 = vadd.f32 %v1917_v32, %v1869_v10  ;;  %v4346_v37 = vld [vmem:[%s7491_s0 + $0xd98] sm:$0xff] }
 0x2e4   :  { %v3377_v5 = vperm.slane %v1720_v8, %v5851_v2  ;;  %2273 = vmatmul.bf16.gmra.mxu1 %v5168_v54  ;;  %v2546_v10 = vpack.c.bf16 %v4346_v37, %v4345_v14 }
 0x2e5   :  { %v2042_v60 = vmax.f32 %v2013_v36, 0.0  ;;  %2322 = vmatmul.bf16.gmra.mxu2 %v7667_v46 }
 0x2e6   :  { %v3378_v19 = vsel %vm3219_vm8, %v3377_v5, %v3376_v44  ;;  %2371 = vmatmul.bf16.gmra.mxu3 %v7668_v41  ;;  %v4298_v44 = vld [vmem:[%s7491_s0 + $0xc18] sm:$0xff] }
 0x2e7   :  { %v2072_v55 = vsel %vm622_vm0, %v2042_v60, 0.0  ;;  %v2522_v34 = vpack.c.bf16 %v4298_v44, %v4297_v17  ;;  %2706 = vmatpush.bf16.msra.mxu3 %v2546_v10 }
 0x2e8   :  { %v1966_v23 = vpop.f32.mrf.mxu2  ;;  %2073 = vadd.xlane.f32.xlu0 %v2072_v55  ;;  %v1870_v8 = vpop.f32.mrf.mxu0  ;;  %v4313_v55 = vld [vmem:[%s7491_s0 + $0xc90] sm:$0xff] }
 0x2e9   :  { %v1967_v32 = vadd.f32 %v1966_v23, %v1918_v62  ;;  %v2015_v36 = vpop.f32.mrf.mxu3  ;;  %v1919_v5 = vpop.f32.mrf.mxu1  ;;  %2559 = vmatpush.bf16.msra.mxu0 %v2522_v34  ;;  %v1871_v59 = vadd.f32 %v1870_v8, %v5566_v27  ;;  %v4314_v62 = vld [vmem:[%s7491_s0 + $0xc98] sm:$0xff] }
 0x2ea   :  { %v2530_v63 = vpack.c.bf16 %v4314_v62, %v4313_v55  ;;  %v4327_v55 = vld [vmem:[%s7491_s0 + $0xd00] sm:$0xff]  ;;  %v4328_v62 = vld [vmem:[%s7491_s0 + $0xd08] sm:$0xff] }
 0x2eb   :  { %v2016_v60 = vadd.f32 %v2015_v36, %v1967_v32  ;;  %v1723_v20 = vpop.xlane.xlu1 %1722  ;;  %v1920_v44 = vadd.f32 %v1919_v5, %v1871_v59  ;;  %v7670_v59 = vld [vmem:[#allocation16_spill] sm:$0xff] }
 0x2ec   :  { %v3379_v41 = vperm.slane %v1723_v20, %v7625_v35  ;;  %2608 = vmatpush.bf16.msra.mxu1 %v2530_v63  ;;  %v4295_v63 = vld [vmem:[%s7491_s0 + $0xc00] sm:$0xff] }
 0x2ed   :  { %v2043_v46 = vmax.f32 %v2016_v60, 0.0 }
 0x2ee   :  { %v3380_v17 = vsel %vm3223_vm9, %v3379_v41, %v3378_v19 }
 0x2ef   :  { %v2075_v14 = vsel %vm622_vm0, %v2043_v46, 0.0  ;;  %v7669_v46 = vld [vmem:[#allocation15_spill] sm:$0xff] }
 0x2f0   :  { %v1968_v37 = vpop.f32.mrf.mxu2  ;;  %2076 = vadd.xlane.f32.xlu2 %v2075_v14  ;;  %v1873_v10 = vpop.f32.mrf.mxu0  ;;  %v2537_v14 = vpack.c.bf16 %v4328_v62, %v4327_v55 }
 0x2f1   :  { %v1969_v23 = vadd.f32 %v1968_v37, %v1920_v44  ;;  %v2017_v34 = vpop.f32.mrf.mxu3  ;;  %v1874_v32 = vadd.f32 %v1873_v10, %v5576_v13  ;;  %v1922_v36 = vpop.f32.mrf.mxu1  ;;  %v4343_v37 = vld [vmem:[%s7491_s0 + $0xd80] sm:$0xff] }
 0x2f2   :  { %2658 = vmatpush.bf16.msra.mxu2 %v2537_v14 }
 0x2f3   :  { %v2018_v8 = vadd.f32 %v2017_v34, %v1969_v23  ;;  %v1726_v60 = vpop.xlane.xlu0 %1725  ;;  %2229 = vmatmul.bf16.gmra.mxu0 %v5238_v28  ;;  %v1923_v41 = vadd.f32 %v1922_v36, %v1874_v32  ;;  %v4344_v23 = vld [vmem:[%s7491_s0 + $0xd88] sm:$0xff] }
 0x2f4   :  { %v3381_v20 = vperm.slane %v1726_v60, %v5893_v12  ;;  %2278 = vmatmul.bf16.gmra.mxu1 %v5240_v33  ;;  %v2545_v32 = vpack.c.bf16 %v4344_v23, %v4343_v37 }
 0x2f5   :  { %v2044_v19 = vmax.f32 %v2018_v8, 0.0  ;;  %2327 = vmatmul.bf16.gmra.mxu2 %v7669_v46 }
 0x2f6   :  { %v3382_v5 = vsel %vm3227_vm10, %v3381_v20, %v3380_v17  ;;  %2376 = vmatmul.bf16.gmra.mxu3 %v7670_v59  ;;  %v4296_v17 = vld [vmem:[%s7491_s0 + $0xc08] sm:$0xff] }
 0x2f7   :  { %v2078_v44 = vsel %vm622_vm0, %v2044_v19, 0.0  ;;  %v2521_v10 = vpack.c.bf16 %v4296_v17, %v4295_v63  ;;  %2707 = vmatpush.bf16.msra.mxu3 %v2545_v32 }
 0x2f8   :  { %v1971_v34 = vpop.f32.mrf.mxu2  ;;  %2079 = vadd.xlane.f32.xlu1 %v2078_v44  ;;  %v1875_v60 = vpop.f32.mrf.mxu0  ;;  %v4311_v44 = vld [vmem:[%s7491_s0 + $0xc80] sm:$0xff] }
 0x2f9   :  { %v1972_v36 = vadd.f32 %v1971_v34, %v1923_v41  ;;  %v2020_v8 = vpop.f32.mrf.mxu3  ;;  %v1924_v20 = vpop.f32.mrf.mxu1  ;;  %2560 = vmatpush.bf16.msra.mxu0 %v2521_v10  ;;  %v1876_v55 = vadd.f32 %v1875_v60, %v5602_v9  ;;  %v4312_v41 = vld [vmem:[%s7491_s0 + $0xc88] sm:$0xff] }
 0x2fa   :  { %v2529_v14 = vpack.c.bf16 %v4312_v41, %v4311_v44  ;;  %v4373_v44 = vld [vmem:[%s7491_s0 + $0xe70] sm:$0xff] }
 0x2fb   :  { %v2021_v19 = vadd.f32 %v2020_v8, %v1972_v36  ;;  %v1729_v62 = vpop.xlane.xlu2 %1728  ;;  %v1925_v17 = vadd.f32 %v1924_v20, %v1876_v55  ;;  %v4405_v20 = vld [vmem:[%s7491_s0 + $0xf70] sm:$0xff]  ;;  %v4406_v55 = vld [vmem:[%s7491_s0 + $0xf78] sm:$0xff] }
 0x2fc   :  { %v3383_v59 = vperm.slane %v1729_v62, %v7627_v16  ;;  %2609 = vmatpush.bf16.msra.mxu1 %v2529_v14  ;;  %v7671_v16 = vld [vmem:[#allocation18_spill] sm:$0xff]  ;;  %v2901_v14 = vpack.c.bf16 %v4406_v55, %v4405_v20 }
 0x2fd   :  { %v2045_v46 = vmax.f32 %v2021_v19, 0.0 }
 0x2fe   :  { %v3384_v63 = vsel %vm3231_vm11, %v3383_v59, %v3382_v5  ;;  %v7672_v5 = vld [vmem:[#allocation19_spill] sm:$0xff]  ;;  %3008 = vmatpush.bf16.msrb.mxu2 %v2901_v14 }
 0x2ff   :  { %v2081_v37 = vsel %vm622_vm0, %v2045_v46, 0.0  ;;  %v7673_v46 = vld [vmem:[#allocation20_spill] sm:$0xff] }
 0x300   :  { %v1973_v23 = vpop.f32.mrf.mxu2  ;;  %2082 = vadd.xlane.f32.xlu0 %v2081_v37  ;;  %v1878_v32 = vpop.f32.mrf.mxu0  ;;  %v4421_v37 = vld [vmem:[%s7491_s0 + $0xff0] sm:$0xff] }
 0x301   :  { %v1974_v34 = vadd.f32 %v1973_v23, %v1925_v17  ;;  %v2022_v10 = vpop.f32.mrf.mxu3  ;;  %v1879_v36 = vadd.f32 %v1878_v32, %v5612_v47  ;;  %v1927_v8 = vpop.f32.mrf.mxu1  ;;  %v4374_v17 = vld [vmem:[%s7491_s0 + $0xe78] sm:$0xff] }
 0x302   :  { %v4422_v23 = vld [vmem:[%s7491_s0 + $0xff8] sm:$0xff] }
 0x303   :  { %v2023_v60 = vadd.f32 %v2022_v10, %v1974_v34  ;;  %2234 = vmatmul.bf16.gmra.mxu0 %v5298_v4  ;;  %v1928_v62 = vadd.f32 %v1927_v8, %v1879_v36  ;;  %v1732_v59 = vpop.xlane.xlu1 %1731  ;;  %v2885_v10 = vpack.c.bf16 %v4374_v17, %v4373_v44  ;;  %v2909_v32 = vpack.c.bf16 %v4422_v23, %v4421_v37  ;;  %v7674_v36 = vld [vmem:[#allocation36_spill] sm:$0xff]  ;;  %v7675_v4 = vld [vmem:[#allocation37_spill] sm:$0xff] }
 0x304   :  { %2283 = vmatmul.bf16.gmra.mxu1 %v7671_v16  ;;  %v3385_v8 = vperm.slane %v1732_v59, %v7674_v36  ;;  %v4389_v59 = vld [vmem:[%s7491_s0 + $0xef0] sm:$0xff] }
 0x305   :  { %v2046_v19 = vmax.f32 %v2023_v60, 0.0  ;;  %2332 = vmatmul.bf16.gmra.mxu2 %v7672_v5  ;;  %2910 = vmatpush.bf16.msrb.mxu0 %v2885_v10 }
 0x306   :  { %2381 = vmatmul.bf16.gmra.mxu3 %v7673_v46  ;;  %v3386_v9 = vsel %vm3235_vm12, %v3385_v8, %v3384_v63 }
 0x307   :  { %v2084_v41 = vsel %vm622_vm0, %v2046_v19, 0.0  ;;  %3057 = vmatpush.bf16.msrb.mxu3 %v2909_v32 }
 0x308   :  { %v1976_v34 = vpop.f32.mrf.mxu2  ;;  %2085 = vadd.xlane.f32.xlu2 %v2084_v41  ;;  %v1880_v20 = vpop.f32.mrf.mxu0 }
 0x309   :  { %v1977_v60 = vadd.f32 %v1976_v34, %v1928_v62  ;;  %v2025_v19 = vpop.f32.mrf.mxu3  ;;  %v1929_v55 = vpop.f32.mrf.mxu1  ;;  %v1881_v5 = vadd.f32 %v1880_v20, %v7651_v52  ;;  %v4390_v62 = vld [vmem:[%s7491_s0 + $0xef8] sm:$0xff] }
 0x30a   :  { %v2893_v14 = vpack.c.bf16 %v4390_v62, %v4389_v59  ;;  %v4404_v59 = vld [vmem:[%s7491_s0 + $0xf68] sm:$0xff]  ;;  %v4371_v62 = vld [vmem:[%s7491_s0 + $0xe60] sm:$0xff] }
 0x30b   :  { %v2026_v46 = vadd.f32 %v2025_v19, %v1977_v60  ;;  %v1735_v16 = vpop.xlane.xlu0 %1734  ;;  %v1930_v17 = vadd.f32 %v1929_v55, %v1881_v5  ;;  %v7677_v5 = vld [vmem:[#allocation22_spill] sm:$0xff]  ;;  %v7678_v19 = vld [vmem:[#allocation23_spill] sm:$0xff]  ;;  %v7679_v55 = vld [vmem:[#allocation24_spill] sm:$0xff] }
 0x30c   :  { %v3387_v47 = vperm.slane %v1735_v16, %v7675_v4  ;;  %2959 = vmatpush.bf16.msrb.mxu1 %v2893_v14 }
 0x30d   :  { %v2047_v41 = vmax.f32 %v2026_v46, 0.0 }
 0x30e   :  { %v3388_v44 = vsel %vm7676_vm13, %v3387_v47, %v3386_v9  ;;  %vm3590_vm13 = vcmask 1042432  }
 0x30f   :  { %v2087_v37 = vsel %vm622_vm0, %v2047_v41, 0.0  ;;  %v4403_v41 = vld [vmem:[%s7491_s0 + $0xf60] sm:$0xff] }
 0x310   :  { %v1978_v23 = vpop.f32.mrf.mxu2  ;;  %2088 = vadd.xlane.f32.xlu1 %v2087_v37  ;;  %v1883_v46 = vpop.f32.mrf.mxu0  ;;  %v4419_v37 = vld [vmem:[%s7491_s0 + $0xfe0] sm:$0xff] }
 0x311   :  { %v1979_v16 = vadd.f32 %v1978_v23, %v1930_v17  ;;  %v2027_v63 = vpop.f32.mrf.mxu3  ;;  %v1884_v34 = vadd.f32 %v1883_v46, %v5648_v25  ;;  %v1932_v10 = vpop.f32.mrf.mxu1  ;;  %v2900_v17 = vpack.c.bf16 %v4404_v59, %v4403_v41  ;;  %v4420_v23 = vld [vmem:[%s7491_s0 + $0xfe8] sm:$0xff]  ;;  %v7680_v59 = vld [vmem:[#allocation38_spill] sm:$0xff] }
 0x312   :  { %v2908_v46 = vpack.c.bf16 %v4420_v23, %v4419_v37 }
 0x313   :  { %v2028_v32 = vadd.f32 %v2027_v63, %v1979_v16  ;;  %v1738_v8 = vpop.xlane.xlu0 %1737  ;;  %2239 = vmatmul.bf16.gmra.mxu0 %v7654_v24  ;;  %v1933_v47 = vadd.f32 %v1932_v10, %v1884_v34  ;;  %3009 = vmatpush.bf16.msrb.mxu2 %v2900_v17 }
 0x314   :  { %v3389_v60 = vperm.slane %v1738_v8, %v5979_v7  ;;  %2288 = vmatmul.bf16.gmra.mxu1 %v7677_v5  ;;  %3058 = vmatpush.bf16.msrb.mxu3 %v2908_v46 }
 0x315   :  { %v2048_v9 = vmax.f32 %v2028_v32, 0.0  ;;  %2337 = vmatmul.bf16.gmra.mxu2 %v7678_v19 }
 0x316   :  { %v3390_v20 = vsel %vm3243_vm14, %v3389_v60, %v3388_v44  ;;  %2386 = vmatmul.bf16.gmra.mxu3 %v7679_v55  ;;  %v4372_v44 = vld [vmem:[%s7491_s0 + $0xe68] sm:$0xff] }
 0x317   :  { %v2090_v14 = vsel %vm622_vm0, %v2048_v9, 0.0  ;;  %v2884_v63 = vpack.c.bf16 %v4372_v44, %v4371_v62  ;;  %v4387_v62 = vld [vmem:[%s7491_s0 + $0xee0] sm:$0xff] }
 0x318   :  { %v1981_v16 = vpop.f32.mrf.mxu2  ;;  %2091 = vadd.xlane.f32.xlu1 %v2090_v14  ;;  %v1885_v32 = vpop.f32.mrf.mxu0 }
 0x319   :  { %v1982_v34 = vadd.f32 %v1981_v16, %v1933_v47  ;;  %v2030_v10 = vpop.f32.mrf.mxu3  ;;  %v1934_v8 = vpop.f32.mrf.mxu1  ;;  %2911 = vmatpush.bf16.msrb.mxu0 %v2884_v63  ;;  %v1886_v9 = vadd.f32 %v1885_v32, %v5674_v40  ;;  %v4388_v47 = vld [vmem:[%s7491_s0 + $0xee8] sm:$0xff] }
 0x31a   :  { %v2892_v17 = vpack.c.bf16 %v4388_v47, %v4387_v62  ;;  %v4402_v62 = vld [vmem:[%s7491_s0 + $0xf58] sm:$0xff]  ;;  %v4369_v47 = vld [vmem:[%s7491_s0 + $0xe50] sm:$0xff] }
 0x31b   :  { %v2031_v60 = vadd.f32 %v2030_v10, %v1982_v34  ;;  %v1741_v41 = vpop.xlane.xlu2 %1740  ;;  %v1935_v44 = vadd.f32 %v1934_v8, %v1886_v9  ;;  %v7681_v10 = vld [vmem:[#allocation25_spill] sm:$0xff]  ;;  %v7683_v8 = vld [vmem:[#allocation3_spill] sm:$0xff] }
 0x31c   :  { %v3391_v55 = vperm.slane %v1741_v41, %v7680_v59  ;;  %2960 = vmatpush.bf16.msrb.mxu1 %v2892_v17  ;;  %v7682_v59 = vld [vmem:[#allocation2_spill] sm:$0xff]  ;;  %v7685_v9 = vld [vmem:[#allocation5_spill] sm:$0xff] }
 0x31d   :  { %v2049_v19 = vmax.f32 %v2031_v60, 0.0 }
 0x31e   :  { %v3392_v14 = vsel %vm3247_vm15, %v3391_v55, %v3390_v20 }
 0x31f   :  { %v6887_v37 = vsel %vm3590_vm13, %v6597_v50, %v3392_v14  ;;  %v2093_v23 = vsel %vm622_vm0, %v2049_v19, 0.0  ;;  %v7684_v50 = vld [vmem:[#allocation4_spill] sm:$0xff]  ;;  %vm7700_vm13 = vcmask 917312  }
 0x320   :  { %v1983_v16 = vpop.f32.mrf.mxu2  ;;  %2094 = vadd.xlane.f32.xlu0 %v2093_v23  ;;  %v2205_v34 = vpop.f32.mrf.mxu0  ;;  %v4401_v19 = vld [vmem:[%s7491_s0 + $0xf50] sm:$0xff] }
 0x321   :  { %v1984_v63 = vadd.f32 %v1983_v16, %v1935_v44  ;;  %v2032_v46 = vpop.f32.mrf.mxu3  ;;  %v2206_v32 = vadd.f32 %v2205_v34, %v7681_v10  ;;  %v2254_v60 = vpop.f32.mrf.mxu1  ;;  %v2899_v17 = vpack.c.bf16 %v4402_v62, %v4401_v19  ;;  %v4370_v44 = vld [vmem:[%s7491_s0 + $0xe58] sm:$0xff]  ;;  %v4417_v23 = vld [vmem:[%s7491_s0 + $0xfd0] sm:$0xff] }
 0x322   :  { %v4418_v16 = vld [vmem:[%s7491_s0 + $0xfd8] sm:$0xff]  ;;  %v2883_v34 = vpack.c.bf16 %v4370_v44, %v4369_v47  ;;  %v4385_v47 = vld [vmem:[%s7491_s0 + $0xed0] sm:$0xff] }
 0x323   :  { %v2033_v41 = vadd.f32 %v2032_v46, %v1984_v63  ;;  %2561 = vmatmul.bf16.vlgmr.msra.gmra.mxu0 %v7682_v59  ;;  %v2255_v55 = vadd.f32 %v2254_v60, %v2206_v32  ;;  %v2053_v63 = vpop.xlane.xlu2 %2052  ;;  %v2907_v32 = vpack.c.bf16 %v4418_v16, %v4417_v23  ;;  %3010 = vmatpush.bf16.msrb.mxu2 %v2899_v17 }
 0x324   :  { %2610 = vmatmul.bf16.vlgmr.msra.gmra.mxu1 %v7683_v8  ;;  %2912 = vmatpush.bf16.msrb.mxu0 %v2883_v34  ;;  %v3410_v8 = vperm.slane %v2053_v63, %v5688_v43 }
 0x325   :  { %v2050_v20 = vmax.f32 %v2033_v41, 0.0  ;;  %2659 = vmatmul.bf16.vlgmr.msra.gmra.mxu2 %v7684_v50  ;;  %3059 = vmatpush.bf16.msrb.mxu3 %v2907_v32 }
 0x326   :  { %2708 = vmatmul.bf16.vlgmr.msra.gmra.mxu3 %v7685_v9 }
 0x327   :  { %v2096_v14 = vsel %vm622_vm0, %v2050_v20, 0.0 }
 0x328   :  { %v2303_v46 = vpop.f32.mrf.mxu2  ;;  %2097 = vadd.xlane.f32.xlu1 %v2096_v14  ;;  %v2207_v20 = vpop.f32.mrf.mxu0 }
 0x329   :  { %v2304_v60 = vadd.f32 %v2303_v46, %v2255_v55  ;;  %v2352_v41 = vpop.f32.mrf.mxu3  ;;  %v2256_v19 = vpop.f32.mrf.mxu1  ;;  %v2208_v9 = vadd.f32 %v2207_v20, %v5422_v26  ;;  %v4386_v55 = vld [vmem:[%s7491_s0 + $0xed8] sm:$0xff] }
 0x32a   :  { %v2891_v17 = vpack.c.bf16 %v4386_v55, %v4385_v47 }
 0x32b   :  { %v2353_v62 = vadd.f32 %v2352_v41, %v2304_v60  ;;  %v2056_v50 = vpop.xlane.xlu0 %2055  ;;  %v2257_v44 = vadd.f32 %v2256_v19, %v2208_v9  ;;  %v4399_v9 = vld [vmem:[%s7491_s0 + $0xf40] sm:$0xff]  ;;  %v4400_v19 = vld [vmem:[%s7491_s0 + $0xf48] sm:$0xff] }
 0x32c   :  { %v3411_v59 = vperm.slane %v2056_v50, %v5711_v39  ;;  %2961 = vmatpush.bf16.msrb.mxu1 %v2891_v17  ;;  %v2898_v55 = vpack.c.bf16 %v4400_v19, %v4399_v9  ;;  %v4415_v17 = vld [vmem:[%s7491_s0 + $0xfc0] sm:$0xff] }
 0x32d   :  { %v2392_v10 = vmax.f32 %v2353_v62, 0.0  ;;  %v4367_v62 = vld [vmem:[%s7491_s0 + $0xe40] sm:$0xff] }
 0x32e   :  { %v3412_v14 = vsel %vm3191_vm1, %v3411_v59, %v3410_v8  ;;  %3011 = vmatpush.bf16.msrb.mxu2 %v2898_v55  ;;  %v4383_v19 = vld [vmem:[%s7491_s0 + $0xec0] sm:$0xff] }
 0x32f   :  { %v2408_v23 = vsel %vm622_vm0, %v2392_v10, 0.0 }
 0x330   :  { %v2305_v16 = vpop.f32.mrf.mxu2  ;;  %2409 = vadd.xlane.f32.xlu0 %v2408_v23  ;;  %v2210_v46 = vpop.f32.mrf.mxu0 }
 0x331   :  { %v2306_v63 = vadd.f32 %v2305_v16, %v2257_v44  ;;  %v2354_v50 = vpop.f32.mrf.mxu3  ;;  %v2211_v34 = vadd.f32 %v2210_v46, %v5431_v51  ;;  %v2259_v32 = vpop.f32.mrf.mxu1  ;;  %v4416_v44 = vld [vmem:[%s7491_s0 + $0xfc8] sm:$0xff] }
 0x333   :  { %v2355_v60 = vadd.f32 %v2354_v50, %v2306_v63  ;;  %v2059_v41 = vpop.xlane.xlu2 %2058  ;;  %2566 = vmatmul.bf16.gmra.mxu0 %v4965_v29  ;;  %v2260_v8 = vadd.f32 %v2259_v32, %v2211_v34  ;;  %v2906_v63 = vpack.c.bf16 %v4416_v44, %v4415_v17 }
 0x334   :  { %v3413_v20 = vperm.slane %v2059_v41, %v5725_v15  ;;  %2615 = vmatmul.bf16.gmra.mxu1 %v4967_v30 }
 0x335   :  { %v2393_v59 = vmax.f32 %v2355_v60, 0.0  ;;  %2664 = vmatmul.bf16.gmra.mxu2 %v4969_v31  ;;  %3060 = vmatpush.bf16.msrb.mxu3 %v2906_v63 }
 0x336   :  { %v3414_v10 = vsel %vm3195_vm2, %v3413_v20, %v3412_v14  ;;  %2713 = vmatmul.bf16.gmra.mxu3 %v7640_v42  ;;  %v4368_v14 = vld [vmem:[%s7491_s0 + $0xe48] sm:$0xff] }
 0x337   :  { %v2411_v47 = vsel %vm622_vm0, %v2393_v59, 0.0  ;;  %v2882_v16 = vpack.c.bf16 %v4368_v14, %v4367_v62 }
 0x338   :  { %v2308_v23 = vpop.f32.mrf.mxu2  ;;  %2412 = vadd.xlane.f32.xlu1 %v2411_v47  ;;  %v2212_v34 = vpop.f32.mrf.mxu0 }
 0x339   :  { %v2309_v50 = vadd.f32 %v2308_v23, %v2260_v8  ;;  %v2357_v46 = vpop.f32.mrf.mxu3  ;;  %v2261_v32 = vpop.f32.mrf.mxu1  ;;  %2913 = vmatpush.bf16.msrb.mxu0 %v2882_v16  ;;  %v2213_v41 = vadd.f32 %v2212_v34, %v5458_v38  ;;  %v4384_v8 = vld [vmem:[%s7491_s0 + $0xec8] sm:$0xff] }
 0x33a   :  { %v2890_v47 = vpack.c.bf16 %v4384_v8, %v4383_v19  ;;  %v4365_v19 = vld [vmem:[%s7491_s0 + $0xe30] sm:$0xff] }
 0x33b   :  { %v2358_v60 = vadd.f32 %v2357_v46, %v2309_v50  ;;  %v2062_v20 = vpop.xlane.xlu0 %2061  ;;  %v2262_v55 = vadd.f32 %v2261_v32, %v2213_v41  ;;  %v7686_v41 = vld [vmem:[#allocation8_spill] sm:$0xff] }
 0x33c   :  { %v3415_v59 = vperm.slane %v2062_v20, %v7619_v61  ;;  %2962 = vmatpush.bf16.msrb.mxu1 %v2890_v47 }
 0x33d   :  { %v2394_v9 = vmax.f32 %v2358_v60, 0.0 }
 0x33e   :  { %v3416_v62 = vsel %vm3199_vm3, %v3415_v59, %v3414_v10  ;;  %v4397_v59 = vld [vmem:[%s7491_s0 + $0xf30] sm:$0xff] }
 0x33f   :  { %v2414_v14 = vsel %vm622_vm0, %v2394_v9, 0.0  ;;  %v4398_v9 = vld [vmem:[%s7491_s0 + $0xf38] sm:$0xff] }
 0x340   :  { %v2310_v17 = vpop.f32.mrf.mxu2  ;;  %2415 = vadd.xlane.f32.xlu1 %v2414_v14  ;;  %v2215_v16 = vpop.f32.mrf.mxu0  ;;  %v2897_v47 = vpack.c.bf16 %v4398_v9, %v4397_v59  ;;  %v4414_v14 = vld [vmem:[%s7491_s0 + $0xfb8] sm:$0xff] }
 0x341   :  { %v2311_v44 = vadd.f32 %v2310_v17, %v2262_v55  ;;  %v2359_v23 = vpop.f32.mrf.mxu3  ;;  %v2216_v63 = vadd.f32 %v2215_v16, %v5467_v3  ;;  %v2264_v50 = vpop.f32.mrf.mxu1  ;;  %v4413_v55 = vld [vmem:[%s7491_s0 + $0xfb0] sm:$0xff] }
 0x342   :  { %3012 = vmatpush.bf16.msrb.mxu2 %v2897_v47 }
 0x343   :  { %v2360_v46 = vadd.f32 %v2359_v23, %v2311_v44  ;;  %v2065_v34 = vpop.xlane.xlu2 %2064  ;;  %2571 = vmatmul.bf16.gmra.mxu0 %v5028_v57  ;;  %v2265_v20 = vadd.f32 %v2264_v50, %v2216_v63  ;;  %v2905_v23 = vpack.c.bf16 %v4414_v14, %v4413_v55 }
 0x344   :  { %v3417_v60 = vperm.slane %v2065_v34, %v5767_v49  ;;  %2620 = vmatmul.bf16.gmra.mxu1 %v5030_v58 }
 0x345   :  { %v2395_v10 = vmax.f32 %v2360_v46, 0.0  ;;  %2669 = vmatmul.bf16.gmra.mxu2 %v7663_v6  ;;  %3061 = vmatpush.bf16.msrb.mxu3 %v2905_v23 }
 0x346   :  { %v3418_v32 = vsel %vm3203_vm4, %v3417_v60, %v3416_v62  ;;  %2718 = vmatmul.bf16.gmra.mxu3 %v7686_v41  ;;  %v4366_v62 = vld [vmem:[%s7491_s0 + $0xe38] sm:$0xff] }
 0x347   :  { %v2417_v8 = vsel %vm622_vm0, %v2395_v10, 0.0  ;;  %v2881_v44 = vpack.c.bf16 %v4366_v62, %v4365_v19 }
 0x348   :  { %v2313_v17 = vpop.f32.mrf.mxu2  ;;  %2418 = vadd.xlane.f32.xlu0 %v2417_v8  ;;  %v2217_v50 = vpop.f32.mrf.mxu0  ;;  %v4381_v8 = vld [vmem:[%s7491_s0 + $0xeb0] sm:$0xff] }
 0x349   :  { %v2314_v16 = vadd.f32 %v2313_v17, %v2265_v20  ;;  %v2362_v63 = vpop.f32.mrf.mxu3  ;;  %v2266_v46 = vpop.f32.mrf.mxu1  ;;  %2914 = vmatpush.bf16.msrb.mxu0 %v2881_v44  ;;  %v2218_v60 = vadd.f32 %v2217_v50, %v5494_v48  ;;  %v4382_v20 = vld [vmem:[%s7491_s0 + $0xeb8] sm:$0xff] }
 0x34a   :  { %v2889_v47 = vpack.c.bf16 %v4382_v20, %v4381_v8  ;;  %v4396_v8 = vld [vmem:[%s7491_s0 + $0xf28] sm:$0xff]  ;;  %v4363_v20 = vld [vmem:[%s7491_s0 + $0xe20] sm:$0xff] }
 0x34b   :  { %v2363_v34 = vadd.f32 %v2362_v63, %v2314_v16  ;;  %v2068_v10 = vpop.xlane.xlu2 %2067  ;;  %v2267_v62 = vadd.f32 %v2266_v46, %v2218_v60  ;;  %v7687_v46 = vld [vmem:[#allocation9_spill] sm:$0xff] }
 0x34c   :  { %v3419_v59 = vperm.slane %v2068_v10, %v7621_v1  ;;  %2963 = vmatpush.bf16.msrb.mxu1 %v2889_v47 }
 0x34d   :  { %v2396_v9 = vmax.f32 %v2363_v34, 0.0 }
 0x34e   :  { %v3420_v19 = vsel %vm3207_vm5, %v3419_v59, %v3418_v32  ;;  %v7688_v59 = vld [vmem:[#allocation10_spill] sm:$0xff] }
 0x34f   :  { %v2420_v55 = vsel %vm622_vm0, %v2396_v9, 0.0  ;;  %v4395_v9 = vld [vmem:[%s7491_s0 + $0xf20] sm:$0xff] }
 0x350   :  { %v2315_v14 = vpop.f32.mrf.mxu2  ;;  %2421 = vadd.xlane.f32.xlu0 %v2420_v55  ;;  %v2220_v23 = vpop.f32.mrf.mxu0  ;;  %v2896_v55 = vpack.c.bf16 %v4396_v8, %v4395_v9 }
 0x351   :  { %v2316_v17 = vadd.f32 %v2315_v14, %v2267_v62  ;;  %v2364_v44 = vpop.f32.mrf.mxu3  ;;  %v2269_v16 = vpop.f32.mrf.mxu1  ;;  %v2221_v50 = vadd.f32 %v2220_v23, %v5504_v18  ;;  %v4411_v14 = vld [vmem:[%s7491_s0 + $0xfa0] sm:$0xff] }
 0x352   :  { %3013 = vmatpush.bf16.msrb.mxu2 %v2896_v55 }
 0x353   :  { %v2365_v63 = vadd.f32 %v2364_v44, %v2316_v17  ;;  %v2071_v34 = vpop.xlane.xlu1 %2070  ;;  %2576 = vmatmul.bf16.gmra.mxu0 %v5097_v21  ;;  %v2270_v47 = vadd.f32 %v2269_v16, %v2221_v50  ;;  %v4412_v17 = vld [vmem:[%s7491_s0 + $0xfa8] sm:$0xff] }
 0x354   :  { %v3421_v10 = vperm.slane %v2071_v34, %v5809_v0  ;;  %2625 = vmatmul.bf16.gmra.mxu1 %v5099_v22 }
 0x355   :  { %v2397_v32 = vmax.f32 %v2365_v63, 0.0  ;;  %2674 = vmatmul.bf16.gmra.mxu2 %v7687_v46  ;;  %v2904_v63 = vpack.c.bf16 %v4412_v17, %v4411_v14 }
 0x356   :  { %v3422_v60 = vsel %vm3211_vm6, %v3421_v10, %v3420_v19  ;;  %2723 = vmatmul.bf16.gmra.mxu3 %v7688_v59  ;;  %v4364_v19 = vld [vmem:[%s7491_s0 + $0xe28] sm:$0xff] }
 0x357   :  { %v2423_v62 = vsel %vm622_vm0, %v2397_v32, 0.0  ;;  %v2880_v23 = vpack.c.bf16 %v4364_v19, %v4363_v20  ;;  %3062 = vmatpush.bf16.msrb.mxu3 %v2904_v63  ;;  %v4380_v20 = vld [vmem:[%s7491_s0 + $0xea8] sm:$0xff] }
 0x358   :  { %v2318_v44 = vpop.f32.mrf.mxu2  ;;  %2424 = vadd.xlane.f32.xlu2 %v2423_v62  ;;  %v2222_v34 = vpop.f32.mrf.mxu0  ;;  %v4379_v62 = vld [vmem:[%s7491_s0 + $0xea0] sm:$0xff] }
 0x359   :  { %v2319_v16 = vadd.f32 %v2318_v44, %v2270_v47  ;;  %v2367_v50 = vpop.f32.mrf.mxu3  ;;  %v2271_v10 = vpop.f32.mrf.mxu1  ;;  %2915 = vmatpush.bf16.msrb.mxu0 %v2880_v23  ;;  %v2223_v9 = vadd.f32 %v2222_v34, %v5530_v11  ;;  %v2888_v55 = vpack.c.bf16 %v4380_v20, %v4379_v62  ;;  %v4394_v62 = vld [vmem:[%s7491_s0 + $0xf18] sm:$0xff]  ;;  %v4361_v20 = vld [vmem:[%s7491_s0 + $0xe10] sm:$0xff] }
 0x35b   :  { %v2368_v32 = vadd.f32 %v2367_v50, %v2319_v16  ;;  %v2074_v8 = vpop.xlane.xlu0 %2073  ;;  %v2272_v19 = vadd.f32 %v2271_v10, %v2223_v9  ;;  %2964 = vmatpush.bf16.msrb.mxu1 %v2888_v55  ;;  %v7690_v10 = vld [vmem:[#allocation12_spill] sm:$0xff] }
 0x35c   :  { %v3423_v59 = vperm.slane %v2074_v8, %v7623_v56  ;;  %v4393_v9 = vld [vmem:[%s7491_s0 + $0xf10] sm:$0xff] }
 0x35d   :  { %v2398_v46 = vmax.f32 %v2368_v32, 0.0 }
 0x35e   :  { %v3424_v47 = vsel %vm3215_vm7, %v3423_v59, %v3422_v60  ;;  %v7689_v59 = vld [vmem:[#allocation11_spill] sm:$0xff] }
 0x35f   :  { %v2426_v14 = vsel %vm622_vm0, %v2398_v46, 0.0 }
 0x360   :  { %v2320_v17 = vpop.f32.mrf.mxu2  ;;  %2427 = vadd.xlane.f32.xlu1 %v2426_v14  ;;  %v2225_v63 = vpop.f32.mrf.mxu0  ;;  %v2895_v14 = vpack.c.bf16 %v4394_v62, %v4393_v9 }
 0x361   :  { %v2321_v44 = vadd.f32 %v2320_v17, %v2272_v19  ;;  %v2369_v23 = vpop.f32.mrf.mxu3  ;;  %v2274_v16 = vpop.f32.mrf.mxu1  ;;  %v2226_v34 = vadd.f32 %v2225_v63, %v5540_v45  ;;  %v4409_v17 = vld [vmem:[%s7491_s0 + $0xf90] sm:$0xff] }
 0x362   :  { %3014 = vmatpush.bf16.msrb.mxu2 %v2895_v14 }
 0x363   :  { %v2370_v50 = vadd.f32 %v2369_v23, %v2321_v44  ;;  %v2077_v32 = vpop.xlane.xlu2 %2076  ;;  %2581 = vmatmul.bf16.gmra.mxu0 %v5166_v53  ;;  %v2275_v55 = vadd.f32 %v2274_v16, %v2226_v34  ;;  %v4410_v44 = vld [vmem:[%s7491_s0 + $0xf98] sm:$0xff] }
 0x364   :  { %v3425_v8 = vperm.slane %v2077_v32, %v5851_v2  ;;  %2630 = vmatmul.bf16.gmra.mxu1 %v5168_v54 }
 0x365   :  { %v2399_v60 = vmax.f32 %v2370_v50, 0.0  ;;  %2679 = vmatmul.bf16.gmra.mxu2 %v7689_v59  ;;  %v2903_v50 = vpack.c.bf16 %v4410_v44, %v4409_v17 }
 0x366   :  { %v3426_v46 = vsel %vm3219_vm8, %v3425_v8, %v3424_v47  ;;  %2728 = vmatmul.bf16.gmra.mxu3 %v7690_v10  ;;  %v4362_v47 = vld [vmem:[%s7491_s0 + $0xe18] sm:$0xff] }
 0x367   :  { %v2429_v19 = vsel %vm622_vm0, %v2399_v60, 0.0  ;;  %v2879_v63 = vpack.c.bf16 %v4362_v47, %v4361_v20  ;;  %3063 = vmatpush.bf16.msrb.mxu3 %v2903_v50  ;;  %v4378_v20 = vld [vmem:[%s7491_s0 + $0xe98] sm:$0xff] }
 0x368   :  { %v2323_v23 = vpop.f32.mrf.mxu2  ;;  %2430 = vadd.xlane.f32.xlu0 %v2429_v19  ;;  %v2227_v32 = vpop.f32.mrf.mxu0  ;;  %v4377_v19 = vld [vmem:[%s7491_s0 + $0xe90] sm:$0xff] }
 0x369   :  { %v2324_v16 = vadd.f32 %v2323_v23, %v2275_v55  ;;  %v2372_v34 = vpop.f32.mrf.mxu3  ;;  %v2276_v8 = vpop.f32.mrf.mxu1  ;;  %2916 = vmatpush.bf16.msrb.mxu0 %v2879_v63  ;;  %v2228_v9 = vadd.f32 %v2227_v32, %v5566_v27  ;;  %v2887_v14 = vpack.c.bf16 %v4378_v20, %v4377_v19  ;;  %v4392_v19 = vld [vmem:[%s7491_s0 + $0xf08] sm:$0xff]  ;;  %v4359_v20 = vld [vmem:[%s7491_s0 + $0xe00] sm:$0xff] }
 0x36b   :  { %v2373_v60 = vadd.f32 %v2372_v34, %v2324_v16  ;;  %v2080_v62 = vpop.xlane.xlu1 %2079  ;;  %v2277_v47 = vadd.f32 %v2276_v8, %v2228_v9  ;;  %2965 = vmatpush.bf16.msrb.mxu1 %v2887_v14  ;;  %v7692_v8 = vld [vmem:[#allocation16_spill] sm:$0xff]  ;;  %v4391_v9 = vld [vmem:[%s7491_s0 + $0xf00] sm:$0xff] }
 0x36c   :  { %v3427_v10 = vperm.slane %v2080_v62, %v7625_v35 }
 0x36d   :  { %v2400_v59 = vmax.f32 %v2373_v60, 0.0 }
 0x36e   :  { %v3428_v55 = vsel %vm3223_vm9, %v3427_v10, %v3426_v46  ;;  %v7691_v10 = vld [vmem:[#allocation15_spill] sm:$0xff] }
 0x36f   :  { %v2432_v17 = vsel %vm622_vm0, %v2400_v59, 0.0 }
 0x370   :  { %v2325_v44 = vpop.f32.mrf.mxu2  ;;  %2433 = vadd.xlane.f32.xlu2 %v2432_v17  ;;  %v2230_v50 = vpop.f32.mrf.mxu0  ;;  %v2894_v17 = vpack.c.bf16 %v4392_v19, %v4391_v9  ;;  %v7693_v9 = vld [vmem:[#allocation26_spill] sm:$0xff] }
 0x371   :  { %v2326_v23 = vadd.f32 %v2325_v44, %v2277_v47  ;;  %v2374_v63 = vpop.f32.mrf.mxu3  ;;  %v2279_v16 = vpop.f32.mrf.mxu1  ;;  %v2231_v32 = vadd.f32 %v2230_v50, %v5576_v13  ;;  %v4407_v44 = vld [vmem:[%s7491_s0 + $0xf80] sm:$0xff] }
 0x372   :  { %3015 = vmatpush.bf16.msrb.mxu2 %v2894_v17 }
 0x373   :  { %v2375_v34 = vadd.f32 %v2374_v63, %v2326_v23  ;;  %v2083_v60 = vpop.xlane.xlu0 %2082  ;;  %2586 = vmatmul.bf16.gmra.mxu0 %v5238_v28  ;;  %v2280_v14 = vadd.f32 %v2279_v16, %v2231_v32  ;;  %v4408_v23 = vld [vmem:[%s7491_s0 + $0xf88] sm:$0xff] }
 0x374   :  { %v3429_v62 = vperm.slane %v2083_v60, %v5893_v12  ;;  %2635 = vmatmul.bf16.gmra.mxu1 %v5240_v33  ;;  %v7696_v12 = vld [vmem:[#allocation17_spill] sm:$0xff] }
 0x375   :  { %v2401_v46 = vmax.f32 %v2375_v34, 0.0  ;;  %2684 = vmatmul.bf16.gmra.mxu2 %v7691_v10  ;;  %v2902_v34 = vpack.c.bf16 %v4408_v23, %v4407_v44  ;;  %v4375_v10 = vld [vmem:[%s7491_s0 + $0xe80] sm:$0xff]  ;;  %v7694_v23 = vld [vmem:[#allocation35_spill] sm:$0xff] }
 0x376   :  { %v3430_v59 = vsel %vm3227_vm10, %v3429_v62, %v3428_v55  ;;  %2733 = vmatmul.bf16.gmra.mxu3 %v7692_v8  ;;  %v4360_v55 = vld [vmem:[%s7491_s0 + $0xe08] sm:$0xff] }
 0x377   :  { %v2435_v47 = vsel %vm622_vm0, %v2401_v46, 0.0  ;;  %v2878_v50 = vpack.c.bf16 %v4360_v55, %v4359_v20  ;;  %3064 = vmatpush.bf16.msrb.mxu3 %v2902_v34  ;;  %v4376_v20 = vld [vmem:[%s7491_s0 + $0xe88] sm:$0xff] }
 0x378   :  { %v2328_v63 = vpop.f32.mrf.mxu2  ;;  %2436 = vadd.xlane.f32.xlu1 %v2435_v47  ;;  %v2232_v60 = vpop.f32.mrf.mxu0 }
 0x379   :  { %v2329_v16 = vadd.f32 %v2328_v63, %v2280_v14  ;;  %v2377_v32 = vpop.f32.mrf.mxu3  ;;  %v2281_v62 = vpop.f32.mrf.mxu1  ;;  %2917 = vmatpush.bf16.msrb.mxu0 %v2878_v50  ;;  %v2233_v19 = vadd.f32 %v2232_v60, %v7693_v9  ;;  %v2886_v14 = vpack.c.bf16 %v4376_v20, %v4375_v10 }
 0x37b   :  { %v2378_v46 = vadd.f32 %v2377_v32, %v2329_v16  ;;  %v2086_v47 = vpop.xlane.xlu2 %2085  ;;  %v2282_v55 = vadd.f32 %v2281_v62, %v2233_v19  ;;  %2966 = vmatpush.bf16.msrb.mxu1 %v2886_v14  ;;  %v7697_v62 = vld [vmem:[#allocation18_spill] sm:$0xff]  ;;  %v7698_v19 = vld [vmem:[#allocation19_spill] sm:$0xff] }
 0x37c   :  { %v3431_v63 = vperm.slane %v2086_v47, %v7694_v23  ;;  %v7699_v47 = vld [vmem:[#allocation20_spill] sm:$0xff] }
 0x37d   :  { %v2402_v8 = vmax.f32 %v2378_v46, 0.0  ;;  %v7695_v46 = vld [vmem:[#allocation27_spill] sm:$0xff] }
 0x37e   :  { %v3432_v10 = vsel %vm3231_vm11, %v3431_v63, %v3430_v59 }
 0x37f   :  { %v2438_v17 = vsel %vm622_vm0, %v2402_v8, 0.0 }
 0x380   :  { %v2330_v44 = vpop.f32.mrf.mxu2  ;;  %2439 = vadd.xlane.f32.xlu0 %v2438_v17  ;;  %v2235_v16 = vpop.f32.mrf.mxu0 }
 0x381   :  { %v2331_v50 = vadd.f32 %v2330_v44, %v2282_v55  ;;  %v2379_v34 = vpop.f32.mrf.mxu3  ;;  %v2284_v32 = vpop.f32.mrf.mxu1  ;;  %v2236_v9 = vadd.f32 %v2235_v16, %v7695_v46 }
 0x383   :  { %v2380_v60 = vadd.f32 %v2379_v34, %v2331_v50  ;;  %v2089_v33 = vpop.xlane.xlu1 %2088  ;;  %2591 = vmatmul.bf16.gmra.mxu0 %v7696_v12  ;;  %v2285_v14 = vadd.f32 %v2284_v32, %v2236_v9 }
 0x384   :  { %v3433_v28 = vperm.slane %v2089_v33, %v7674_v36  ;;  %2640 = vmatmul.bf16.gmra.mxu1 %v7697_v62 }
 0x385   :  { %v2403_v8 = vmax.f32 %v2380_v60, 0.0  ;;  %2689 = vmatmul.bf16.gmra.mxu2 %v7698_v19 }
 0x386   :  { %v3434_v20 = vsel %vm3235_vm12, %v3433_v28, %v3432_v10  ;;  %2738 = vmatmul.bf16.gmra.mxu3 %v7699_v47 }
 0x387   :  { %v2441_v55 = vsel %vm622_vm0, %v2403_v8, 0.0 }
 0x388   :  { %v2333_v17 = vpop.f32.mrf.mxu2  ;;  %2442 = vadd.xlane.f32.xlu2 %v2441_v55  ;;  %v2237_v50 = vpop.f32.mrf.mxu0 }
 0x389   :  { %v2334_v44 = vadd.f32 %v2333_v17, %v2285_v14  ;;  %v2382_v33 = vpop.f32.mrf.mxu3  ;;  %v2286_v34 = vpop.f32.mrf.mxu1  ;;  %v2238_v59 = vadd.f32 %v2237_v50, %v7651_v52 }
 0x38b   :  { %v2383_v16 = vadd.f32 %v2382_v33, %v2334_v44  ;;  %v2092_v63 = vpop.xlane.xlu1 %2091  ;;  %v2287_v10 = vadd.f32 %v2286_v34, %v2238_v59  ;;  %v7702_v34 = vld [vmem:[#allocation24_spill] sm:$0xff] }
 0x38c   :  { %v3435_v60 = vperm.slane %v2092_v63, %v7675_v4 }
 0x38d   :  { %v2404_v19 = vmax.f32 %v2383_v16, 0.0 }
 0x38e   :  { %v3436_v28 = vsel %vm7700_vm13, %v3435_v60, %v3434_v20  ;;  %v7701_v20 = vld [vmem:[#allocation23_spill] sm:$0xff]  ;;  %vm3592_vm13 = vcmask 1043456  }
 0x38f   :  { %v2444_v9 = vsel %vm622_vm0, %v2404_v19, 0.0 }
 0x390   :  { %v2335_v32 = vpop.f32.mrf.mxu2  ;;  %2445 = vadd.xlane.f32.xlu2 %v2444_v9  ;;  %v2240_v14 = vpop.f32.mrf.mxu0 }
 0x391   :  { %v2336_v8 = vadd.f32 %v2335_v32, %v2287_v10  ;;  %v2384_v55 = vpop.f32.mrf.mxu3  ;;  %v2289_v17 = vpop.f32.mrf.mxu1  ;;  %v2241_v44 = vadd.f32 %v2240_v14, %v5648_v25 }
 0x393   :  { %v2385_v47 = vadd.f32 %v2384_v55, %v2336_v8  ;;  %v2095_v33 = vpop.xlane.xlu0 %2094  ;;  %2596 = vmatmul.bf16.gmra.mxu0 %v7654_v24  ;;  %v2290_v59 = vadd.f32 %v2289_v17, %v2241_v44 }
 0x394   :  { %v3437_v50 = vperm.slane %v2095_v33, %v5979_v7  ;;  %2645 = vmatmul.bf16.gmra.mxu1 %v7677_v5  ;;  %v7703_v33 = vld [vmem:[#allocation38_spill] sm:$0xff] }
 0x395   :  { %v2405_v16 = vmax.f32 %v2385_v47, 0.0  ;;  %2694 = vmatmul.bf16.gmra.mxu2 %v7701_v20 }
 0x396   :  { %v3438_v19 = vsel %vm3243_vm14, %v3437_v50, %v3436_v28  ;;  %2743 = vmatmul.bf16.gmra.mxu3 %v7702_v34  ;;  %v7705_v34 = vld [vmem:[#allocation2_spill] sm:$0xff] }
 0x397   :  { %v2447_v63 = vsel %vm622_vm0, %v2405_v16, 0.0 }
 0x398   :  { %v2338_v60 = vpop.f32.mrf.mxu2  ;;  %2448 = vadd.xlane.f32.xlu1 %v2447_v63  ;;  %v2242_v32 = vpop.f32.mrf.mxu0 }
 0x399   :  { %v2339_v10 = vadd.f32 %v2338_v60, %v2290_v59  ;;  %v2387_v9 = vpop.f32.mrf.mxu3  ;;  %v2291_v8 = vpop.f32.mrf.mxu1  ;;  %v2243_v47 = vadd.f32 %v2242_v32, %v5674_v40  ;;  %v7704_v32 = vld [vmem:[#allocation25_spill] sm:$0xff] }
 0x39b   :  { %v2388_v55 = vadd.f32 %v2387_v9, %v2339_v10  ;;  %v2098_v14 = vpop.xlane.xlu1 %2097  ;;  %v2292_v50 = vadd.f32 %v2291_v8, %v2243_v47 }
 0x39c   :  { %v3439_v20 = vperm.slane %v2098_v14, %v7703_v33  ;;  %v7706_v14 = vld [vmem:[#allocation3_spill] sm:$0xff] }
 0x39d   :  { %v2406_v5 = vmax.f32 %v2388_v55, 0.0 }
 0x39e   :  { %v3440_v28 = vsel %vm3247_vm15, %v3439_v20, %v3438_v19  ;;  %v7707_v20 = vld [vmem:[#allocation4_spill] sm:$0xff] }
 0x39f   :  { %v7129_v17 = vsel %vm3592_vm13, %v6887_v37, %v3440_v28  ;;  %v2450_v44 = vsel %vm622_vm0, %v2406_v5, 0.0  ;;  %v7708_v37 = vld [vmem:[#allocation5_spill] sm:$0xff]  ;;  %vm7721_vm13 = vcmask 917312  }
 0x3a0   :  { %v2340_v16 = vpop.f32.mrf.mxu2  ;;  %2451 = vadd.xlane.f32.xlu2 %v2450_v44  ;;  %v2562_v60 = vpop.f32.mrf.mxu0 }
 0x3a1   :  { %v2341_v59 = vadd.f32 %v2340_v16, %v2292_v50  ;;  %v2389_v63 = vpop.f32.mrf.mxu3  ;;  %v2611_v10 = vpop.f32.mrf.mxu1  ;;  %v2563_v40 = vadd.f32 %v2562_v60, %v7704_v32 }
 0x3a3   :  { %v2390_v9 = vadd.f32 %v2389_v63, %v2341_v59  ;;  %2918 = vmatmul.bf16.vlgmr.msrb.gmra.mxu0 %v7705_v34  ;;  %v2612_v19 = vadd.f32 %v2611_v10, %v2563_v40  ;;  %v2410_v8 = vpop.xlane.xlu0 %2409 }
 0x3a4   :  { %2967 = vmatmul.bf16.vlgmr.msrb.gmra.mxu1 %v7706_v14  ;;  %v3458_v60 = vperm.slane %v2410_v8, %v5688_v43 }
 0x3a5   :  { %v2407_v55 = vmax.f32 %v2390_v9, 0.0  ;;  %3016 = vmatmul.bf16.vlgmr.msrb.gmra.mxu2 %v7707_v20 }
 0x3a6   :  { %3065 = vmatmul.bf16.vlgmr.msrb.gmra.mxu3 %v7708_v37 }
 0x3a7   :  { %v2453_v5 = vsel %vm622_vm0, %v2407_v55, 0.0 }
 0x3a8   :  { %v2660_v47 = vpop.f32.mrf.mxu2  ;;  %2454 = vadd.xlane.f32.xlu2 %v2453_v5  ;;  %v2564_v44 = vpop.f32.mrf.mxu0 }
 0x3a9   :  { %v2661_v28 = vadd.f32 %v2660_v47, %v2612_v19  ;;  %v2709_v50 = vpop.f32.mrf.mxu3  ;;  %v2613_v16 = vpop.f32.mrf.mxu1  ;;  %v2565_v34 = vadd.f32 %v2564_v44, %v5422_v26 }
 0x3ab   :  { %v2710_v59 = vadd.f32 %v2709_v50, %v2661_v28  ;;  %v2413_v63 = vpop.xlane.xlu1 %2412  ;;  %v2614_v10 = vadd.f32 %v2613_v16, %v2565_v34 }
 0x3ac   :  { %v3459_v9 = vperm.slane %v2413_v63, %v5711_v39 }
 0x3ad   :  { %v2749_v14 = vmax.f32 %v2710_v59, 0.0 }
 0x3ae   :  { %v3460_v40 = vsel %vm3191_vm1, %v3459_v9, %v3458_v60 }
 0x3af   :  { %v2765_v55 = vsel %vm622_vm0, %v2749_v14, 0.0 }
 0x3b0   :  { %v2662_v20 = vpop.f32.mrf.mxu2  ;;  %2766 = vadd.xlane.f32.xlu2 %v2765_v55  ;;  %v2567_v5 = vpop.f32.mrf.mxu0 }
 0x3b1   :  { %v2663_v37 = vadd.f32 %v2662_v20, %v2614_v10  ;;  %v2711_v19 = vpop.f32.mrf.mxu3  ;;  %v2616_v47 = vpop.f32.mrf.mxu1  ;;  %v2568_v50 = vadd.f32 %v2567_v5, %v5431_v51 }
 0x3b3   :  { %v2712_v28 = vadd.f32 %v2711_v19, %v2663_v37  ;;  %v2416_v44 = vpop.xlane.xlu1 %2415  ;;  %2923 = vmatmul.bf16.gmra.mxu0 %v4965_v29  ;;  %v2617_v34 = vadd.f32 %v2616_v47, %v2568_v50 }
 0x3b4   :  { %v3461_v8 = vperm.slane %v2416_v44, %v5725_v15  ;;  %2972 = vmatmul.bf16.gmra.mxu1 %v4967_v30 }
 0x3b5   :  { %v2750_v59 = vmax.f32 %v2712_v28, 0.0  ;;  %3021 = vmatmul.bf16.gmra.mxu2 %v4969_v31 }
 0x3b6   :  { %v3462_v16 = vsel %vm3195_vm2, %v3461_v8, %v3460_v40  ;;  %3070 = vmatmul.bf16.gmra.mxu3 %v7640_v42 }
 0x3b7   :  { %v2768_v63 = vsel %vm622_vm0, %v2750_v59, 0.0 }
 0x3b8   :  { %v2665_v60 = vpop.f32.mrf.mxu2  ;;  %2769 = vadd.xlane.f32.xlu0 %v2768_v63  ;;  %v2569_v10 = vpop.f32.mrf.mxu0 }
 0x3b9   :  { %v2666_v9 = vadd.f32 %v2665_v60, %v2617_v34  ;;  %v2714_v14 = vpop.f32.mrf.mxu3  ;;  %v2618_v55 = vpop.f32.mrf.mxu1  ;;  %v2570_v29 = vadd.f32 %v2569_v10, %v5458_v38 }
 0x3bb   :  { %v2715_v20 = vadd.f32 %v2714_v14, %v2666_v9  ;;  %v2419_v37 = vpop.xlane.xlu0 %2418  ;;  %v2619_v19 = vadd.f32 %v2618_v55, %v2570_v29 }
 0x3bc   :  { %v3463_v30 = vperm.slane %v2419_v37, %v7619_v61 }
 0x3bd   :  { %v2751_v31 = vmax.f32 %v2715_v20, 0.0 }
 0x3be   :  { %v3464_v40 = vsel %vm3199_vm3, %v3463_v30, %v3462_v16 }
 0x3bf   :  { %v2771_v42 = vsel %vm622_vm0, %v2751_v31, 0.0 }
 0x3c0   :  { %v2667_v5 = vpop.f32.mrf.mxu2  ;;  %2772 = vadd.xlane.f32.xlu1 %v2771_v42  ;;  %v2572_v50 = vpop.f32.mrf.mxu0 }
 0x3c1   :  { %v2668_v47 = vadd.f32 %v2667_v5, %v2619_v19  ;;  %v2716_v28 = vpop.f32.mrf.mxu3  ;;  %v2621_v44 = vpop.f32.mrf.mxu1  ;;  %v2573_v59 = vadd.f32 %v2572_v50, %v5467_v3 }
 0x3c3   :  { %v2717_v8 = vadd.f32 %v2716_v28, %v2668_v47  ;;  %v2422_v34 = vpop.xlane.xlu0 %2421  ;;  %2928 = vmatmul.bf16.gmra.mxu0 %v5028_v57  ;;  %v2622_v9 = vadd.f32 %v2621_v44, %v2573_v59 }
 0x3c4   :  { %v3465_v63 = vperm.slane %v2422_v34, %v5767_v49  ;;  %2977 = vmatmul.bf16.gmra.mxu1 %v5030_v58 }
 0x3c5   :  { %v2752_v60 = vmax.f32 %v2717_v8, 0.0  ;;  %3026 = vmatmul.bf16.gmra.mxu2 %v7663_v6 }
 0x3c6   :  { %v3466_v16 = vsel %vm3203_vm4, %v3465_v63, %v3464_v40  ;;  %3075 = vmatmul.bf16.gmra.mxu3 %v7686_v41 }
 0x3c7   :  { %v2774_v14 = vsel %vm622_vm0, %v2752_v60, 0.0  ;;  %v7709_v60 = vld [vmem:[#allocation9_spill] sm:$0xff] }
 0x3c8   :  { %v2670_v10 = vpop.f32.mrf.mxu2  ;;  %2775 = vadd.xlane.f32.xlu1 %v2774_v14  ;;  %v2574_v29 = vpop.f32.mrf.mxu0 }
 0x3c9   :  { %v2671_v55 = vadd.f32 %v2670_v10, %v2622_v9  ;;  %v2719_v20 = vpop.f32.mrf.mxu3  ;;  %v2623_v37 = vpop.f32.mrf.mxu1  ;;  %v2575_v57 = vadd.f32 %v2574_v29, %v5494_v48  ;;  %v7710_v9 = vld [vmem:[#allocation10_spill] sm:$0xff] }
 0x3cb   :  { %v2720_v30 = vadd.f32 %v2719_v20, %v2671_v55  ;;  %v2425_v31 = vpop.xlane.xlu2 %2424  ;;  %v2624_v19 = vadd.f32 %v2623_v37, %v2575_v57 }
 0x3cc   :  { %v3467_v58 = vperm.slane %v2425_v31, %v7621_v1 }
 0x3cd   :  { %v2753_v6 = vmax.f32 %v2720_v30, 0.0 }
 0x3ce   :  { %v3468_v40 = vsel %vm3207_vm5, %v3467_v58, %v3466_v16 }
 0x3cf   :  { %v2777_v41 = vsel %vm622_vm0, %v2753_v6, 0.0 }
 0x3d0   :  { %v2672_v42 = vpop.f32.mrf.mxu2  ;;  %2778 = vadd.xlane.f32.xlu0 %v2777_v41  ;;  %v2577_v28 = vpop.f32.mrf.mxu0 }
 0x3d1   :  { %v2673_v5 = vadd.f32 %v2672_v42, %v2624_v19  ;;  %v2721_v47 = vpop.f32.mrf.mxu3  ;;  %v2626_v50 = vpop.f32.mrf.mxu1  ;;  %v2578_v8 = vadd.f32 %v2577_v28, %v5504_v18 }
 0x3d3   :  { %v2722_v44 = vadd.f32 %v2721_v47, %v2673_v5  ;;  %v2428_v59 = vpop.xlane.xlu1 %2427  ;;  %2933 = vmatmul.bf16.gmra.mxu0 %v5097_v21  ;;  %v2627_v14 = vadd.f32 %v2626_v50, %v2578_v8 }
 0x3d4   :  { %v3469_v34 = vperm.slane %v2428_v59, %v5809_v0  ;;  %2982 = vmatmul.bf16.gmra.mxu1 %v5099_v22 }
 0x3d5   :  { %v2754_v63 = vmax.f32 %v2722_v44, 0.0  ;;  %3031 = vmatmul.bf16.gmra.mxu2 %v7709_v60 }
 0x3d6   :  { %v3470_v16 = vsel %vm3211_vm6, %v3469_v34, %v3468_v40  ;;  %3080 = vmatmul.bf16.gmra.mxu3 %v7710_v9 }
 0x3d7   :  { %v2780_v10 = vsel %vm622_vm0, %v2754_v63, 0.0  ;;  %v7711_v63 = vld [vmem:[#allocation11_spill] sm:$0xff] }
 0x3d8   :  { %v2675_v55 = vpop.f32.mrf.mxu2  ;;  %2781 = vadd.xlane.f32.xlu2 %v2780_v10  ;;  %v2579_v37 = vpop.f32.mrf.mxu0 }
 0x3d9   :  { %v2676_v20 = vadd.f32 %v2675_v55, %v2627_v14  ;;  %v2724_v29 = vpop.f32.mrf.mxu3  ;;  %v2628_v30 = vpop.f32.mrf.mxu1  ;;  %v2580_v21 = vadd.f32 %v2579_v37, %v5530_v11 }
 0x3db   :  { %v2725_v57 = vadd.f32 %v2724_v29, %v2676_v20  ;;  %v2431_v31 = vpop.xlane.xlu0 %2430  ;;  %v2629_v40 = vadd.f32 %v2628_v30, %v2580_v21 }
 0x3dc   :  { %v3471_v22 = vperm.slane %v2431_v31, %v7623_v56 }
 0x3dd   :  { %v2755_v58 = vmax.f32 %v2725_v57, 0.0 }
 0x3de   :  { %v3472_v6 = vsel %vm3215_vm7, %v3471_v22, %v3470_v16  ;;  %v7712_v16 = vld [vmem:[#allocation12_spill] sm:$0xff] }
 0x3df   :  { %v2783_v19 = vsel %vm622_vm0, %v2755_v58, 0.0 }
 0x3e0   :  { %v2677_v41 = vpop.f32.mrf.mxu2  ;;  %2784 = vadd.xlane.f32.xlu1 %v2783_v19  ;;  %v2582_v47 = vpop.f32.mrf.mxu0 }
 0x3e1   :  { %v2678_v42 = vadd.f32 %v2677_v41, %v2629_v40  ;;  %v2726_v5 = vpop.f32.mrf.mxu3  ;;  %v2631_v28 = vpop.f32.mrf.mxu1  ;;  %v2583_v44 = vadd.f32 %v2582_v47, %v5540_v45 }
 0x3e3   :  { %v2727_v50 = vadd.f32 %v2726_v5, %v2678_v42  ;;  %v2434_v8 = vpop.xlane.xlu2 %2433  ;;  %2938 = vmatmul.bf16.gmra.mxu0 %v5166_v53  ;;  %v2632_v9 = vadd.f32 %v2631_v28, %v2583_v44 }
 0x3e4   :  { %v3473_v59 = vperm.slane %v2434_v8, %v5851_v2  ;;  %2987 = vmatmul.bf16.gmra.mxu1 %v5168_v54  ;;  %v7714_v8 = vld [vmem:[#allocation13_spill] sm:$0xff] }
 0x3e5   :  { %v2756_v34 = vmax.f32 %v2727_v50, 0.0  ;;  %3036 = vmatmul.bf16.gmra.mxu2 %v7711_v63  ;;  %v7713_v50 = vld [vmem:[#allocation34_spill] sm:$0xff]  ;;  %v7716_v63 = vld [vmem:[#allocation15_spill] sm:$0xff] }
 0x3e6   :  { %v3474_v60 = vsel %vm3219_vm8, %v3473_v59, %v3472_v6  ;;  %3085 = vmatmul.bf16.gmra.mxu3 %v7712_v16  ;;  %v7717_v16 = vld [vmem:[#allocation16_spill] sm:$0xff] }
 0x3e7   :  { %v2786_v14 = vsel %vm622_vm0, %v2756_v34, 0.0  ;;  %v7715_v34 = vld [vmem:[#allocation14_spill] sm:$0xff] }
 0x3e8   :  { %v2680_v10 = vpop.f32.mrf.mxu2  ;;  %2787 = vadd.xlane.f32.xlu0 %v2786_v14  ;;  %v2584_v29 = vpop.f32.mrf.mxu0 }
 0x3e9   :  { %v2681_v55 = vadd.f32 %v2680_v10, %v2632_v9  ;;  %v2729_v20 = vpop.f32.mrf.mxu3  ;;  %v2633_v37 = vpop.f32.mrf.mxu1  ;;  %v2585_v53 = vadd.f32 %v2584_v29, %v5566_v27 }
 0x3eb   :  { %v2730_v30 = vadd.f32 %v2729_v20, %v2681_v55  ;;  %v2437_v57 = vpop.xlane.xlu1 %2436  ;;  %v2634_v22 = vadd.f32 %v2633_v37, %v2585_v53  ;;  %v7718_v53 = vld [vmem:[#allocation26_spill] sm:$0xff] }
 0x3ec   :  { %v3475_v54 = vperm.slane %v2437_v57, %v7625_v35 }
 0x3ed   :  { %v2757_v21 = vmax.f32 %v2730_v30, 0.0 }
 0x3ee   :  { %v3476_v31 = vsel %vm3223_vm9, %v3475_v54, %v3474_v60 }
 0x3ef   :  { %v2789_v58 = vsel %vm622_vm0, %v2757_v21, 0.0 }
 0x3f0   :  { %v2682_v6 = vpop.f32.mrf.mxu2  ;;  %2790 = vadd.xlane.f32.xlu2 %v2789_v58  ;;  %v2587_v41 = vpop.f32.mrf.mxu0 }
 0x3f1   :  { %v2683_v40 = vadd.f32 %v2682_v6, %v2634_v22  ;;  %v2731_v19 = vpop.f32.mrf.mxu3  ;;  %v2636_v42 = vpop.f32.mrf.mxu1  ;;  %v2588_v47 = vadd.f32 %v2587_v41, %v5576_v13 }
 0x3f3   :  { %v2732_v5 = vadd.f32 %v2731_v19, %v2683_v40  ;;  %v2440_v28 = vpop.xlane.xlu0 %2439  ;;  %2943 = vmatmul.bf16.gmra.mxu0 %v7714_v8  ;;  %v2637_v9 = vadd.f32 %v2636_v42, %v2588_v47 }
 0x3f4   :  { %v3477_v44 = vperm.slane %v2440_v28, %v7713_v50  ;;  %2992 = vmatmul.bf16.gmra.mxu1 %v7715_v34  ;;  %v7719_v34 = vld [vmem:[#allocation19_spill] sm:$0xff] }
 0x3f5   :  { %v2758_v59 = vmax.f32 %v2732_v5, 0.0  ;;  %3041 = vmatmul.bf16.gmra.mxu2 %v7716_v63 }
 0x3f6   :  { %v3478_v60 = vsel %vm3227_vm10, %v3477_v44, %v3476_v31  ;;  %3090 = vmatmul.bf16.gmra.mxu3 %v7717_v16 }
 0x3f7   :  { %v2792_v14 = vsel %vm622_vm0, %v2758_v59, 0.0 }
 0x3f8   :  { %v2685_v10 = vpop.f32.mrf.mxu2  ;;  %2793 = vadd.xlane.f32.xlu1 %v2792_v14  ;;  %v2589_v29 = vpop.f32.mrf.mxu0 }
 0x3f9   :  { %v2686_v55 = vadd.f32 %v2685_v10, %v2637_v9  ;;  %v2734_v20 = vpop.f32.mrf.mxu3  ;;  %v2638_v37 = vpop.f32.mrf.mxu1  ;;  %v2590_v57 = vadd.f32 %v2589_v29, %v7718_v53 }
 0x3fb   :  { %v2735_v30 = vadd.f32 %v2734_v20, %v2686_v55  ;;  %v2443_v54 = vpop.xlane.xlu2 %2442  ;;  %v2639_v58 = vadd.f32 %v2638_v37, %v2590_v57 }
 0x3fc   :  { %v3479_v21 = vperm.slane %v2443_v54, %v7694_v23 }
 0x3fd   :  { %v2759_v22 = vmax.f32 %v2735_v30, 0.0 }
 0x3fe   :  { %v3480_v31 = vsel %vm3231_vm11, %v3479_v21, %v3478_v60  ;;  %v7720_v60 = vld [vmem:[#allocation20_spill] sm:$0xff] }
 0x3ff   :  { %v2795_v6 = vsel %vm622_vm0, %v2759_v22, 0.0 }
 0x400   :  { %v2687_v40 = vpop.f32.mrf.mxu2  ;;  %2796 = vadd.xlane.f32.xlu0 %v2795_v6  ;;  %v2592_v42 = vpop.f32.mrf.mxu0 }
 0x401   :  { %v2688_v19 = vadd.f32 %v2687_v40, %v2639_v58  ;;  %v2736_v41 = vpop.f32.mrf.mxu3  ;;  %v2641_v5 = vpop.f32.mrf.mxu1  ;;  %v2593_v28 = vadd.f32 %v2592_v42, %v7695_v46 }
 0x403   :  { %v2737_v47 = vadd.f32 %v2736_v41, %v2688_v19  ;;  %v2446_v44 = vpop.xlane.xlu2 %2445  ;;  %2948 = vmatmul.bf16.gmra.mxu0 %v7696_v12  ;;  %v2642_v16 = vadd.f32 %v2641_v5, %v2593_v28 }
 0x404   :  { %v3481_v8 = vperm.slane %v2446_v44, %v7674_v36  ;;  %2997 = vmatmul.bf16.gmra.mxu1 %v7697_v62  ;;  %v7722_v44 = vld [vmem:[#allocation22_spill] sm:$0xff] }
 0x405   :  { %v2760_v59 = vmax.f32 %v2737_v47, 0.0  ;;  %3046 = vmatmul.bf16.gmra.mxu2 %v7719_v34  ;;  %v7724_v34 = vld [vmem:[#allocation24_spill] sm:$0xff] }
 0x406   :  { %v3482_v63 = vsel %vm3235_vm12, %v3481_v8, %v3480_v31  ;;  %3095 = vmatmul.bf16.gmra.mxu3 %v7720_v60  ;;  %v7723_v8 = vld [vmem:[#allocation23_spill] sm:$0xff] }
 0x407   :  { %v2798_v9 = vsel %vm622_vm0, %v2760_v59, 0.0 }
 0x408   :  { %v2690_v14 = vpop.f32.mrf.mxu2  ;;  %2799 = vadd.xlane.f32.xlu0 %v2798_v9  ;;  %v2594_v20 = vpop.f32.mrf.mxu0 }
 0x409   :  { %v2691_v10 = vadd.f32 %v2690_v14, %v2642_v16  ;;  %v2739_v55 = vpop.f32.mrf.mxu3  ;;  %v2643_v29 = vpop.f32.mrf.mxu1  ;;  %v2595_v12 = vadd.f32 %v2594_v20, %v7651_v52 }
 0x40b   :  { %v2740_v37 = vadd.f32 %v2739_v55, %v2691_v10  ;;  %v2449_v30 = vpop.xlane.xlu1 %2448  ;;  %v2644_v21 = vadd.f32 %v2643_v29, %v2595_v12  ;;  %v7725_v55 = vld [vmem:[#allocation29_spill] sm:$0xff] }
 0x40c   :  { %v3483_v62 = vperm.slane %v2449_v30, %v7675_v4 }
 0x40d   :  { %v2761_v57 = vmax.f32 %v2740_v37, 0.0 }
 0x40e   :  { %v3484_v54 = vsel %vm7721_vm13, %v3483_v62, %v3482_v63  ;;  %vm3594_vm13 = vcmask 1044480  }
 0x40f   :  { %v2801_v22 = vsel %vm622_vm0, %v2761_v57, 0.0 }
 0x410   :  { %v2692_v31 = vpop.f32.mrf.mxu2  ;;  %2802 = vadd.xlane.f32.xlu2 %v2801_v22  ;;  %v2597_v40 = vpop.f32.mrf.mxu0 }
 0x411   :  { %v2693_v58 = vadd.f32 %v2692_v31, %v2644_v21  ;;  %v2741_v6 = vpop.f32.mrf.mxu3  ;;  %v2646_v19 = vpop.f32.mrf.mxu1  ;;  %v2598_v42 = vadd.f32 %v2597_v40, %v5648_v25 }
 0x413   :  { %v2742_v41 = vadd.f32 %v2741_v6, %v2693_v58  ;;  %v2452_v5 = vpop.xlane.xlu2 %2451  ;;  %2953 = vmatmul.bf16.gmra.mxu0 %v7654_v24  ;;  %v2647_v63 = vadd.f32 %v2646_v19, %v2598_v42 }
 0x414   :  { %v3485_v47 = vperm.slane %v2452_v5, %v5979_v7  ;;  %3002 = vmatmul.bf16.gmra.mxu1 %v7722_v44 }
 0x415   :  { %v2762_v28 = vmax.f32 %v2742_v41, 0.0  ;;  %3051 = vmatmul.bf16.gmra.mxu2 %v7723_v8 }
 0x416   :  { %v3486_v59 = vsel %vm3243_vm14, %v3485_v47, %v3484_v54  ;;  %3100 = vmatmul.bf16.gmra.mxu3 %v7724_v34 }
 0x417   :  { %v2804_v60 = vsel %vm622_vm0, %v2762_v28, 0.0 }
 0x418   :  { %v2695_v16 = vpop.f32.mrf.mxu2  ;;  %2805 = vadd.xlane.f32.xlu0 %v2804_v60  ;;  %v2599_v10 = vpop.f32.mrf.mxu0 }
 0x419   :  { %v2696_v9 = vadd.f32 %v2695_v16, %v2647_v63  ;;  %v2744_v14 = vpop.f32.mrf.mxu3  ;;  %v2600_v20 = vadd.f32 %v2599_v10, %v7725_v55  ;;  %v2648_v24 = vpop.f32.mrf.mxu1 }
 0x41b   :  { %v2745_v29 = vadd.f32 %v2744_v14, %v2696_v9  ;;  %v2455_v37 = vpop.xlane.xlu2 %2454  ;;  %v2649_v12 = vadd.f32 %v2648_v24, %v2600_v20 }
 0x41c   :  { %v3487_v30 = vperm.slane %v2455_v37, %v7703_v33 }
 0x41d   :  { %v2763_v62 = vmax.f32 %v2745_v29, 0.0 }
 0x41e   :  { %v3488_v57 = vsel %vm3247_vm15, %v3487_v30, %v3486_v59 }
 0x41f   :  { %v7227_v54 = vsel %vm3594_vm13, %v7129_v17, %v3488_v57  ;;  %v2807_v21 = vsel %vm622_vm0, %v2763_v62, 0.0  ;;  %vm3596_vm13 = vcmask 1045504  }
 0x420   :  { %v2697_v22 = vpop.f32.mrf.mxu2  ;;  %2808 = vadd.xlane.f32.xlu0 %v2807_v21  ;;  %v2919_v6 = vpop.f32.mrf.mxu0 }
 0x421   :  { %v2698_v31 = vadd.f32 %v2697_v22, %v2649_v12  ;;  %v2746_v58 = vpop.f32.mrf.mxu3  ;;  %v2968_v40 = vpop.f32.mrf.mxu1  ;;  %v2920_v41 = vadd.f32 %v2919_v6, %v7704_v32 }
 0x423   :  { %v7230_v19 = vadd.f32 %v2746_v58, %v2698_v31  ;;  %v2969_v42 = vadd.f32 %v2968_v40, %v2920_v41  ;;  %v2767_v9 = vpop.xlane.xlu2 %2766 }
 0x424   :  { %v3506_v37 = vperm.slane %v2767_v9, %v5688_v43 }
 0x428   :  { %v3017_v5 = vpop.f32.mrf.mxu2  ;;  %v2921_v44 = vpop.f32.mrf.mxu0 }
 0x429   :  { %v3018_v47 = vadd.f32 %v3017_v5, %v2969_v42  ;;  %v3066_v28 = vpop.f32.mrf.mxu3  ;;  %v2970_v8 = vpop.f32.mrf.mxu1  ;;  %v2922_v59 = vadd.f32 %v2921_v44, %v5422_v26 }
 0x42b   :  { %v3067_v17 = vadd.f32 %v3066_v28, %v3018_v47  ;;  %v2770_v63 = vpop.xlane.xlu0 %2769  ;;  %v2971_v60 = vadd.f32 %v2970_v8, %v2922_v59 }
 0x42c   :  { %v3507_v10 = vperm.slane %v2770_v63, %v5711_v39 }
 0x42d   :  { %v3106_v34 = vmax.f32 %v3067_v17, 0.0 }
 0x42e   :  { %v3508_v57 = vsel %vm3191_vm1, %v3507_v10, %v3506_v37 }
 0x42f   :  { %v3122_v16 = vsel %vm622_vm0, %v3106_v34, 0.0 }
 0x430   :  { %v3019_v14 = vpop.f32.mrf.mxu2  ;;  %3123 = vadd.xlane.f32.xlu2 %v3122_v16  ;;  %v2924_v24 = vpop.f32.mrf.mxu0 }
 0x431   :  { %v3020_v32 = vadd.f32 %v3019_v14, %v2971_v60  ;;  %v3068_v20 = vpop.f32.mrf.mxu3  ;;  %v2973_v29 = vpop.f32.mrf.mxu1  ;;  %v2925_v30 = vadd.f32 %v2924_v24, %v5431_v51 }
 0x433   :  { %v3069_v12 = vadd.f32 %v3068_v20, %v3020_v32  ;;  %v2773_v26 = vpop.xlane.xlu1 %2772  ;;  %v2974_v31 = vadd.f32 %v2973_v29, %v2925_v30 }
 0x434   :  { %v3509_v62 = vperm.slane %v2773_v26, %v5725_v15 }
 0x435   :  { %v3107_v21 = vmax.f32 %v3069_v12, 0.0 }
 0x436   :  { %v3510_v22 = vsel %vm3195_vm2, %v3509_v62, %v3508_v57 }
 0x437   :  { %v3125_v58 = vsel %vm622_vm0, %v3107_v21, 0.0 }
 0x438   :  { %v3022_v6 = vpop.f32.mrf.mxu2  ;;  %3126 = vadd.xlane.f32.xlu0 %v3125_v58  ;;  %v2926_v42 = vpop.f32.mrf.mxu0 }
 0x439   :  { %v3023_v40 = vadd.f32 %v3022_v6, %v2974_v31  ;;  %v3071_v41 = vpop.f32.mrf.mxu3  ;;  %v2975_v5 = vpop.f32.mrf.mxu1  ;;  %v2927_v51 = vadd.f32 %v2926_v42, %v5458_v38 }
 0x43b   :  { %v3072_v47 = vadd.f32 %v3071_v41, %v3023_v40  ;;  %v2776_v44 = vpop.xlane.xlu1 %2775  ;;  %v2976_v8 = vadd.f32 %v2975_v5, %v2927_v51 }
 0x43c   :  { %v3511_v34 = vperm.slane %v2776_v44, %v7619_v61 }
 0x43d   :  { %v3108_v28 = vmax.f32 %v3072_v47, 0.0 }
 0x43e   :  { %v3512_v38 = vsel %vm3199_vm3, %v3511_v34, %v3510_v22 }
 0x43f   :  { %v3128_v17 = vsel %vm622_vm0, %v3108_v28, 0.0 }
 0x440   :  { %v3024_v59 = vpop.f32.mrf.mxu2  ;;  %3129 = vadd.xlane.f32.xlu2 %v3128_v17  ;;  %v2929_v16 = vpop.f32.mrf.mxu0 }
 0x441   :  { %v3025_v63 = vadd.f32 %v3024_v59, %v2976_v8  ;;  %v3073_v60 = vpop.f32.mrf.mxu3  ;;  %v2978_v9 = vpop.f32.mrf.mxu1  ;;  %v2930_v10 = vadd.f32 %v2929_v16, %v5467_v3 }
 0x443   :  { %v3074_v14 = vadd.f32 %v3073_v60, %v3025_v63  ;;  %v2779_v32 = vpop.xlane.xlu0 %2778  ;;  %v2979_v37 = vadd.f32 %v2978_v9, %v2930_v10 }
 0x444   :  { %v3513_v20 = vperm.slane %v2779_v32, %v5767_v49 }
 0x445   :  { %v3109_v24 = vmax.f32 %v3074_v14, 0.0 }
 0x446   :  { %v3514_v29 = vsel %vm3203_vm4, %v3513_v20, %v3512_v38 }
 0x447   :  { %v3131_v12 = vsel %vm622_vm0, %v3109_v24, 0.0 }
 0x448   :  { %v3027_v30 = vpop.f32.mrf.mxu2  ;;  %3132 = vadd.xlane.f32.xlu1 %v3131_v12  ;;  %v2931_v57 = vpop.f32.mrf.mxu0 }
 0x449   :  { %v3028_v26 = vadd.f32 %v3027_v30, %v2979_v37  ;;  %v3076_v62 = vpop.f32.mrf.mxu3  ;;  %v2980_v21 = vpop.f32.mrf.mxu1  ;;  %v2932_v3 = vadd.f32 %v2931_v57, %v5494_v48 }
 0x44b   :  { %v3077_v31 = vadd.f32 %v3076_v62, %v3028_v26  ;;  %v2981_v6 = vadd.f32 %v2980_v21, %v2932_v3  ;;  %v2782_v44 = vpop.xlane.xlu2 %2781 }
 0x44c   :  { %v3515_v48 = vperm.slane %v2782_v44, %v7621_v1 }
 0x44d   :  { %v3110_v58 = vmax.f32 %v3077_v31, 0.0 }
 0x44e   :  { %v3516_v38 = vsel %vm3207_vm5, %v3515_v48, %v3514_v29 }
 0x44f   :  { %v3134_v40 = vsel %vm622_vm0, %v3110_v58, 0.0 }
 0x450   :  { %v3029_v22 = vpop.f32.mrf.mxu2  ;;  %3135 = vadd.xlane.f32.xlu0 %v3134_v40  ;;  %v2934_v5 = vpop.f32.mrf.mxu0 }
 0x451   :  { %v3030_v41 = vadd.f32 %v3029_v22, %v2981_v6  ;;  %v3078_v42 = vpop.f32.mrf.mxu3  ;;  %v2983_v47 = vpop.f32.mrf.mxu1  ;;  %v2935_v28 = vadd.f32 %v2934_v5, %v5504_v18 }
 0x453   :  { %v3079_v51 = vadd.f32 %v3078_v42, %v3030_v41  ;;  %v2785_v17 = vpop.xlane.xlu1 %2784  ;;  %v2984_v59 = vadd.f32 %v2983_v47, %v2935_v28 }
 0x454   :  { %v3517_v60 = vperm.slane %v2785_v17, %v5809_v0 }
 0x455   :  { %v3111_v8 = vmax.f32 %v3079_v51, 0.0 }
 0x456   :  { %v3518_v37 = vsel %vm3211_vm6, %v3517_v60, %v3516_v38 }
 0x457   :  { %v3137_v34 = vsel %vm622_vm0, %v3111_v8, 0.0 }
 0x458   :  { %v3032_v63 = vpop.f32.mrf.mxu2  ;;  %3138 = vadd.xlane.f32.xlu2 %v3137_v34  ;;  %v2936_v14 = vpop.f32.mrf.mxu0 }
 0x459   :  { %v3033_v16 = vadd.f32 %v3032_v63, %v2984_v59  ;;  %v3081_v9 = vpop.f32.mrf.mxu3  ;;  %v2985_v10 = vpop.f32.mrf.mxu1  ;;  %v2937_v20 = vadd.f32 %v2936_v14, %v5530_v11 }
 0x45b   :  { %v3082_v32 = vadd.f32 %v3081_v9, %v3033_v16  ;;  %v2788_v18 = vpop.xlane.xlu0 %2787  ;;  %v2986_v26 = vadd.f32 %v2985_v10, %v2937_v20  ;;  %v2764_v16 = vmax.f32 %v7230_v19, 0.0 }
 0x45c   :  { %v3519_v24 = vperm.slane %v2788_v18, %v7623_v56 }
 0x45d   :  { %v3112_v12 = vmax.f32 %v3082_v32, 0.0  ;;  %v2810_v20 = vsel %vm622_vm0, %v2764_v16, 0.0 }
 0x45e   :  { %v7261_v30 = vsel %vm3215_vm7, %v3519_v24, %v3518_v37 }
 0x45f   :  { %v3140_v62 = vsel %vm622_vm0, %v3112_v12, 0.0 }
 0x460   :  { %v3034_v57 = vpop.f32.mrf.mxu2  ;;  %3141 = vadd.xlane.f32.xlu1 %v3140_v62  ;;  %v2939_v3 = vpop.f32.mrf.mxu0 }
 0x461   :  { %v3035_v21 = vadd.f32 %v3034_v57, %v2986_v26  ;;  %v3083_v31 = vpop.f32.mrf.mxu3  ;;  %v2988_v11 = vpop.f32.mrf.mxu1  ;;  %v2940_v29 = vadd.f32 %v2939_v3, %v5540_v45 }
 0x463   :  { %v3084_v58 = vadd.f32 %v3083_v31, %v3035_v21  ;;  %v2989_v40 = vadd.f32 %v2988_v11, %v2940_v29 }
 0x465   :  { %v3113_v6 = vmax.f32 %v3084_v58, 0.0 }
 0x467   :  { %v3143_v22 = vsel %vm622_vm0, %v3113_v6, 0.0 }
 0x468   :  { %v3037_v41 = vpop.f32.mrf.mxu2  ;;  %3144 = vadd.xlane.f32.xlu0 %v3143_v22  ;;  %v2941_v47 = vpop.f32.mrf.mxu0  ;;  %v4481_v22 = vld [vmem:[%s7494_s3 + $0x70] sm:$0xf] }
 0x469   :  { %v3038_v42 = vadd.f32 %v3037_v41, %v2989_v40  ;;  %v3086_v5 = vpop.f32.mrf.mxu3  ;;  %v2990_v51 = vpop.f32.mrf.mxu1  ;;  %v2942_v44 = vadd.f32 %v2941_v47, %v5566_v27 }
 0x46b   :  { %v3087_v28 = vadd.f32 %v3086_v5, %v3038_v42  ;;  %v2991_v17 = vadd.f32 %v2990_v51, %v2942_v44  ;;  %v4565_v42 = vld [vmem:[%s7494_s3 + $0x74] sm:$0xf]  ;;  %v4483_v5 = vld [vmem:[%s7494_s3 + $0x78] sm:$0xf0] }
 0x46c   :  { %v4486_v51 = vor.u32 %v4565_v42, %v4483_v5  ;;  %v4465_v5 = vld [vmem:[%s7494_s3 + $0x50] sm:$0xf] }
 0x46d   :  { %v3114_v8 = vmax.f32 %v3087_v28, 0.0 }
 0x46e   :  { %3717 = vmatpush.bf16.msra.mxu1 %v4486_v51 }
 0x46f   :  { %v3146_v59 = vsel %vm622_vm0, %v3114_v8, 0.0 }
 0x470   :  { %v3039_v34 = vpop.f32.mrf.mxu2  ;;  %3147 = vadd.xlane.f32.xlu2 %v3146_v59  ;;  %v2944_v63 = vpop.f32.mrf.mxu0 }
 0x471   :  { %v3040_v45 = vadd.f32 %v3039_v34, %v2991_v17  ;;  %v3088_v48 = vpop.f32.mrf.mxu3  ;;  %v2993_v60 = vpop.f32.mrf.mxu1  ;;  %v2945_v14 = vadd.f32 %v2944_v63, %v5576_v13 }
 0x473   :  { %v3089_v9 = vadd.f32 %v3088_v48, %v3040_v45  ;;  %v2994_v32 = vadd.f32 %v2993_v60, %v2945_v14 }
 0x475   :  { %v3115_v10 = vmax.f32 %v3089_v9, 0.0 }
 0x477   :  { %v3149_v27 = vsel %vm622_vm0, %v3115_v10, 0.0 }
 0x478   :  { %v3042_v18 = vpop.f32.mrf.mxu2  ;;  %2811 = vadd.xlane.f32.xlu2 %v2810_v20  ;;  %3150 = vadd.xlane.f32.xlu1 %v3149_v27  ;;  %v2946_v37 = vpop.f32.mrf.mxu0 }
 0x479   :  { %v3043_v38 = vadd.f32 %v3042_v18, %v2994_v32  ;;  %v3091_v24 = vpop.f32.mrf.mxu3  ;;  %v2995_v12 = vpop.f32.mrf.mxu1  ;;  %v2947_v62 = vadd.f32 %v2946_v37, %v7718_v53  ;;  %v4566_v53 = vld [vmem:[%s7494_s3 + $0x74] sm:$0xf0] }
 0x47a   :  { %v4482_v41 = vor.u32 %v4566_v53, %v4481_v22 }
 0x47b   :  { %v3092_v26 = vadd.f32 %v3091_v24, %v3043_v38  ;;  %v2996_v57 = vadd.f32 %v2995_v12, %v2947_v62  ;;  %v4473_v38 = vld [vmem:[%s7494_s3 + $0x60] sm:$0xf]  ;;  %v4563_v24 = vld [vmem:[%s7494_s3 + $0x64] sm:$0xf] }
 0x47c   :  { %3704 = vmatpush.bf16.msra.mxu0 %v4482_v41 }
 0x47d   :  { %v3116_v19 = vmax.f32 %v3092_v26, 0.0 }
 0x47f   :  { %v3152_v13 = vsel %vm622_vm0, %v3116_v19, 0.0 }
 0x480   :  { %v3044_v21 = vpop.f32.mrf.mxu2  ;;  %3153 = vadd.xlane.f32.xlu1 %v3152_v13  ;;  %v2949_v11 = vpop.f32.mrf.mxu0 }
 0x481   :  { %v3045_v31 = vadd.f32 %v3044_v21, %v2996_v57  ;;  %v3093_v3 = vpop.f32.mrf.mxu3  ;;  %v2998_v58 = vpop.f32.mrf.mxu1  ;;  %v2950_v6 = vadd.f32 %v2949_v11, %v7695_v46 }
 0x483   :  { %v3094_v29 = vadd.f32 %v3093_v3, %v3045_v31  ;;  %v2999_v47 = vadd.f32 %v2998_v58, %v2950_v6 }
 0x485   :  { %v3117_v40 = vmax.f32 %v3094_v29, 0.0 }
 0x487   :  { %v3155_v46 = vsel %vm622_vm0, %v3117_v40, 0.0 }
 0x488   :  { %v3047_v28 = vpop.f32.mrf.mxu2  ;;  %3156 = vadd.xlane.f32.xlu0 %v3155_v46  ;;  %v2951_v17 = vpop.f32.mrf.mxu0 }
 0x489   :  { %v3048_v44 = vadd.f32 %v3047_v28, %v2999_v47  ;;  %v3096_v8 = vpop.f32.mrf.mxu3  ;;  %v3000_v59 = vpop.f32.mrf.mxu1  ;;  %v2952_v45 = vadd.f32 %v2951_v17, %v7651_v52  ;;  %v4564_v52 = vld [vmem:[%s7494_s3 + $0x64] sm:$0xf0]  ;;  %v4562_v47 = vld [vmem:[%s7494_s3 + $0x54] sm:$0xf0]  ;;  %v4467_v28 = vld [vmem:[%s7494_s3 + $0x58] sm:$0xf0] }
 0x48a   :  { %v4474_v26 = vor.u32 %v4564_v52, %v4473_v38  ;;  %v4466_v51 = vor.u32 %v4562_v47, %v4465_v5  ;;  %v4560_v17 = vld [vmem:[%s7494_s3 + $0x44] sm:$0xf0]  ;;  %v4435_v47 = vld [vmem:[%s7494_s3 + $0x18] sm:$0xf0] }
 0x48b   :  { %v3097_v34 = vadd.f32 %v3096_v8, %v3048_v44  ;;  %v3001_v63 = vadd.f32 %v3000_v59, %v2952_v45  ;;  %v4457_v8 = vld [vmem:[%s7494_s3 + $0x40] sm:$0xf]  ;;  %v4559_v59 = vld [vmem:[%s7494_s3 + $0x44] sm:$0xf]  ;;  %v4459_v45 = vld [vmem:[%s7494_s3 + $0x48] sm:$0xf0] }
 0x48c   :  { %3705 = vmatpush.bf16.msra.mxu0 %v4474_v26 }
 0x48d   :  { %v3118_v48 = vmax.f32 %v3097_v34, 0.0  ;;  %v4458_v34 = vor.u32 %v4560_v17, %v4457_v8 }
 0x48f   :  { %v3158_v60 = vsel %vm622_vm0, %v3118_v48, 0.0  ;;  %v4462_v48 = vor.u32 %v4559_v59, %v4459_v45 }
 0x490   :  { %v3049_v16 = vpop.f32.mrf.mxu2  ;;  %3159 = vadd.xlane.f32.xlu1 %v3158_v60  ;;  %v2954_v10 = vpop.f32.mrf.mxu0  ;;  %3706 = vmatpush.bf16.msra.mxu0 %v4466_v51 }
 0x491   :  { %v3050_v9 = vadd.f32 %v3049_v16, %v3001_v63  ;;  %v3098_v14 = vpop.f32.mrf.mxu3  ;;  %v2955_v20 = vadd.f32 %v2954_v10, %v5648_v25  ;;  %v3003_v27 = vpop.f32.mrf.mxu1  ;;  %v4475_v25 = vld [vmem:[%s7494_s3 + $0x68] sm:$0xf0]  ;;  %v4449_v16 = vld [vmem:[%s7494_s3 + $0x30] sm:$0xf] }
 0x492   :  { %v4478_v19 = vor.u32 %v4563_v24, %v4475_v25  ;;  %v2791_v63 = vpop.xlane.xlu2 %2790  ;;  %v4441_v24 = vld [vmem:[%s7494_s3 + $0x20] sm:$0xf]  ;;  %v4443_v25 = vld [vmem:[%s7494_s3 + $0x28] sm:$0xf0] }
 0x493   :  { %v3099_v32 = vadd.f32 %v3098_v14, %v3050_v9  ;;  %v3004_v37 = vadd.f32 %v3003_v27, %v2955_v20  ;;  %v4558_v9 = vld [vmem:[%s7494_s3 + $0x34] sm:$0xf0]  ;;  %v4557_v14 = vld [vmem:[%s7494_s3 + $0x34] sm:$0xf]  ;;  %v2797_v27 = vpop.xlane.xlu0 %2796 }
 0x494   :  { %3718 = vmatpush.bf16.msra.mxu1 %v4478_v19  ;;  %3707 = vmatpush.bf16.msra.mxu0 %v4458_v34  ;;  %v4450_v10 = vor.u32 %v4558_v9, %v4449_v16  ;;  %v4425_v9 = vld [vmem:[%s7494_s3] sm:$0xf] }
 0x495   :  { %v3119_v18 = vmax.f32 %v3099_v32, 0.0  ;;  %v4451_v32 = vld [vmem:[%s7494_s3 + $0x38] sm:$0xf0] }
 0x496   :  { %v4454_v20 = vor.u32 %v4557_v14, %v4451_v32  ;;  %v4552_v14 = vld [vmem:[%s7494_s3 + $0x4] sm:$0xf0] }
 0x497   :  { %v3161_v12 = vsel %vm622_vm0, %v3119_v18, 0.0 }
 0x498   :  { %v3052_v62 = vpop.f32.mrf.mxu2  ;;  %3162 = vadd.xlane.f32.xlu1 %v3161_v12  ;;  %v2956_v21 = vpop.f32.mrf.mxu0  ;;  %3708 = vmatpush.bf16.msra.mxu0 %v4450_v10  ;;  %v4555_v12 = vld [vmem:[%s7494_s3 + $0x24] sm:$0xf] }
 0x499   :  { %v3053_v57 = vadd.f32 %v3052_v62, %v3004_v37  ;;  %v3101_v13 = vpop.f32.mrf.mxu3  ;;  %v2957_v3 = vadd.f32 %v2956_v21, %v7725_v55  ;;  %v3005_v58 = vpop.f32.mrf.mxu1  ;;  %v4561_v55 = vld [vmem:[%s7494_s3 + $0x54] sm:$0xf]  ;;  %v4556_v37 = vld [vmem:[%s7494_s3 + $0x24] sm:$0xf0]  ;;  %v4446_v62 = vor.u32 %v4555_v12, %v4443_v25  ;;  %v3521_v21 = vperm.slane %v2791_v63, %v5851_v2  ;;  %v4551_v10 = vld [vmem:[%s7494_s3 + $0x4] sm:$0xf] }
 0x49a   :  { %v4470_v44 = vor.u32 %v4561_v55, %v4467_v28  ;;  %v2803_v60 = vpop.xlane.xlu2 %2802  ;;  %v4442_v26 = vor.u32 %v4556_v37, %v4441_v24  ;;  %v4574_v37 = vld [vmem:[%s7495_s5 + $0x38] sm:$0xff] }
 0x49b   :  { %v3102_v31 = vadd.f32 %v3101_v13, %v3053_v57  ;;  %v3006_v29 = vadd.f32 %v3005_v58, %v2957_v3  ;;  %v2800_v52 = vpop.xlane.xlu0 %2799  ;;  %v2794_v13 = vpop.xlane.xlu1 %2793  ;;  %3801 = vmatpush.bf16.msra.mxu2 %v4574_v37 }
 0x49c   :  { %3719 = vmatpush.bf16.msra.mxu1 %v4470_v44  ;;  %3709 = vmatpush.bf16.msra.mxu0 %v4442_v26  ;;  %v3523_v3 = vperm.slane %v2794_v13, %v7625_v35  ;;  %v3527_v58 = vperm.slane %v2800_v52, %v7694_v23  ;;  %v4573_v26 = vld [vmem:[%s7495_s5 + $0x30] sm:$0xff] }
 0x49d   :  { %v3120_v11 = vmax.f32 %v3102_v31, 0.0 }
 0x49f   :  { %v3164_v6 = vsel %vm622_vm0, %v3120_v11, 0.0  ;;  %v3525_v11 = vperm.slane %v2797_v27, %v7713_v50  ;;  %3802 = vmatpush.bf16.msra.mxu2 %v4573_v26 }
 0x4a0   :  { %v3054_v40 = vpop.f32.mrf.mxu2  ;;  %3165 = vadd.xlane.f32.xlu0 %v3164_v6  ;;  %3720 = vmatpush.bf16.msra.mxu1 %v4462_v48  ;;  %v4433_v6 = vld [vmem:[%s7494_s3 + $0x10] sm:$0xf] }
 0x4a1   :  { %v3055_v22 = vadd.f32 %v3054_v40, %v3006_v29  ;;  %v3103_v53 = vpop.f32.mrf.mxu3  ;;  %v4554_v40 = vld [vmem:[%s7494_s3 + $0x14] sm:$0xf0] }
 0x4a2   :  { %v4434_v5 = vor.u32 %v4554_v40, %v4433_v6  ;;  %v4570_v40 = vld [vmem:[%s7495_s5 + $0x18] sm:$0xff] }
 0x4a3   :  { %v3104_v41 = vadd.f32 %v3103_v53, %v3055_v22  ;;  %v7343_v18 = vpop.xlane.xlu2 %3123  ;;  %v2806_v57 = vpop.xlane.xlu0 %2805  ;;  %v4553_v22 = vld [vmem:[%s7494_s3 + $0x14] sm:$0xf]  ;;  %v3522_v53 = vsel %vm3219_vm8, %v3521_v21, %v7261_v30 }
 0x4a4   :  { %3721 = vmatpush.bf16.msra.mxu1 %v4454_v20  ;;  %v3524_v55 = vsel %vm3223_vm9, %v3523_v3, %v3522_v53  ;;  %v4438_v51 = vor.u32 %v4553_v22, %v4435_v47  ;;  %3710 = vmatpush.bf16.msra.mxu0 %v4434_v5  ;;  %v4426_v20 = vor.u32 %v4552_v14, %v4425_v9  ;;  %v4569_v47 = vld [vmem:[%s7495_s5 + $0x10] sm:$0xff] }
 0x4a5   :  { %v3121_v42 = vmax.f32 %v3104_v41, 0.0  ;;  %v3529_v41 = vperm.slane %v2803_v60, %v7674_v36  ;;  %v3526_v28 = vsel %vm3227_vm10, %v3525_v11, %v3524_v55  ;;  %v3554_v21 = vperm.slane %v7343_v18, %v5688_v43 }
 0x4a6   :  { %v3528_v30 = vsel %vm3231_vm11, %v3527_v58, %v3526_v28  ;;  %v4571_v58 = vld [vmem:[%s7495_s5 + $0x20] sm:$0xff] }
 0x4a7   :  { %v3167_v46 = vsel %vm622_vm0, %v3121_v42, 0.0  ;;  %v3530_v8 = vsel %vm3235_vm12, %v3529_v41, %v3528_v30  ;;  %vm7726_vm0 = vcmask 917312  }
 0x4a8   :  { %3168 = vadd.xlane.f32.xlu1 %v3167_v46  ;;  %3722 = vmatpush.bf16.msra.mxu1 %v4446_v62  ;;  %v3531_v46 = vperm.slane %v2806_v57, %v7675_v4  ;;  %v4572_v62 = vld [vmem:[%s7495_s5 + $0x28] sm:$0xff] }
 0x4a9   :  { %3711 = vmatpush.bf16.msra.mxu0 %v4426_v20  ;;  %3803 = vmatpush.bf16.msra.mxu2 %v4572_v62 }
 0x4aa   :  { %v3532_v59 = vsel %vm7726_vm0, %v3531_v46, %v3530_v8 }
 0x4ab   :  { %v2809_v29 = vpop.xlane.xlu0 %2808 }
 0x4ac   :  { %v3533_v44 = vperm.slane %v2809_v29, %v5979_v7  ;;  %3723 = vmatpush.bf16.msra.mxu1 %v4438_v51  ;;  %v4568_v51 = vld [vmem:[%s7495_s5 + $0x8] sm:$0xff] }
 0x4ad   :  { %3804 = vmatpush.bf16.msra.mxu2 %v4571_v58 }
 0x4ae   :  { %v3534_v45 = vsel %vm3243_vm14, %v3533_v44, %v3532_v59 }
 0x4b1   :  { %3805 = vmatpush.bf16.msra.mxu2 %v4570_v40 }
 0x4b3   :  { %v7345_v38 = vpop.xlane.xlu2 %3129  ;;  %v3127_v16 = vpop.xlane.xlu0 %3126 }
 0x4b4   :  { %v3555_v57 = vperm.slane %v3127_v16, %v5711_v39  ;;  %v3557_v13 = vperm.slane %v7345_v38, %v5725_v15 }
 0x4b5   :  { %3806 = vmatpush.bf16.msra.mxu2 %v4569_v47 }
 0x4b6   :  { %v3556_v6 = vsel %vm3191_vm1, %v3555_v57, %v3554_v21  ;;  %vm7727_vm1 = vmmov %vm7726_vm0 }
 0x4b7   :  { %v3558_v15 = vsel %vm3195_vm2, %v3557_v13, %v3556_v6  ;;  %vm3598_vm2 = vcmask 1046528  }
 0x4b9   :  { %3807 = vmatpush.bf16.msra.mxu2 %v4568_v51 }
 0x4bb   :  { %v3133_v42 = vpop.xlane.xlu1 %3132 }
 0x4bc   :  { %v3559_v3 = vperm.slane %v3133_v42, %v7619_v61 }
 0x4be   :  { %v3560_v18 = vsel %vm3199_vm3, %v3559_v3, %v3558_v15  ;;  %vm3815_vm3 = vcmp.lt.s32.totalorder %v5688_v43, 4 }
 0x4c3   :  { %v3136_v52 = vpop.xlane.xlu0 %3135 }
 0x4c4   :  { %v3561_v29 = vperm.slane %v3136_v52, %v5767_v49 }
 0x4c6   :  { %v3562_v49 = vsel %vm3203_vm4, %v3561_v29, %v3560_v18  ;;  %vm3816_vm4 = vcmp.ge.s32.totalorder %v5688_v43, 4 }
 0x4cb   :  { %v7359_v19 = vpop.xlane.xlu2 %3138 }
 0x4cc   :  { %v3563_v39 = vperm.slane %v7359_v19, %v7621_v1 }
 0x4ce   :  { %v3564_v1 = vsel %vm3207_vm5, %v3563_v39, %v3562_v49  ;;  %vm3817_vm5 = vcmp.lt.s32.totalorder %v5688_v43, 7 }
 0x4d3   :  { %v3142_v63 = vpop.xlane.xlu1 %3141 }
 0x4d4   :  { %v3565_v38 = vperm.slane %v3142_v63, %v5809_v0 }
 0x4d6   :  { %v3566_v0 = vsel %vm3211_vm6, %v3565_v38, %v3564_v1  ;;  %vm7478_vm6 = vmand %vm3816_vm4, %vm3817_vm5 }
 0x4db   :  { %v3145_v12 = vpop.xlane.xlu0 %3144 }
 0x4dc   :  { %v3567_v61 = vperm.slane %v3145_v12, %v7623_v56 }
 0x4de   :  { %v3568_v56 = vsel %vm3215_vm7, %v3567_v61, %v3566_v0 }
 0x4e3   :  { %v7362_v31 = vpop.xlane.xlu2 %3147 }
 0x4e4   :  { %v3569_v22 = vperm.slane %v7362_v31, %v5851_v2 }
 0x4e6   :  { %v3570_v2 = vsel %vm3219_vm8, %v3569_v22, %v3568_v56 }
 0x4eb   :  { %v2812_v17 = vpop.xlane.xlu2 %2811  ;;  %v3151_v32 = vpop.xlane.xlu1 %3150 }
 0x4ec   :  { %v3535_v34 = vperm.slane %v2812_v17, %v7703_v33  ;;  %v3571_v19 = vperm.slane %v3151_v32, %v7625_v35 }
 0x4ee   :  { %v3536_v48 = vsel %vm3247_vm15, %v3535_v34, %v3534_v45  ;;  %v3572_v35 = vsel %vm3223_vm9, %v3571_v19, %v3570_v2 }
 0x4ef   :  { %v7393_v60 = vsel %vm3596_vm13, %v7227_v54, %v3536_v48  ;;  %v4427_v54 = vld [vmem:[%s7494_s3 + $0x8] sm:$0xf0] }
 0x4f0   :  { %v4430_v27 = vor.u32 %v4551_v10, %v4427_v54 }
 0x4f2   :  { %3724 = vmatpush.bf16.msra.mxu1 %v4430_v27  ;;  %v4579_v27 = vld [vmem:[%s7496_s6] ss:$0 sm:$0xff] }
 0x4f3   :  { %v3154_v24 = vpop.xlane.xlu1 %3153 }
 0x4f4   :  { %v3573_v41 = vperm.slane %v3154_v24, %v7713_v50 }
 0x4f6   :  { %v3574_v50 = vsel %vm3227_vm10, %v3573_v41, %v3572_v35 }
 0x4fb   :  { %v3157_v11 = vpop.xlane.xlu0 %3156 }
 0x4fc   :  { %v3575_v42 = vperm.slane %v3157_v11, %v7694_v23 }
 0x4fe   :  { %v3576_v23 = vsel %vm3231_vm11, %v3575_v42, %v3574_v50 }
 0x503   :  { %v3160_v25 = vpop.xlane.xlu1 %3159 }
 0x504   :  { %v3577_v31 = vperm.slane %v3160_v25, %v7674_v36 }
 0x506   :  { %v3578_v28 = vsel %vm3235_vm12, %v3577_v31, %v3576_v23 }
 0x50b   :  { %v3163_v53 = vpop.xlane.xlu1 %3162 }
 0x50c   :  { %v3579_v55 = vperm.slane %v3163_v53, %v7675_v4 }
 0x50e   :  { %v3580_v36 = vsel %vm7727_vm1, %v3579_v55, %v3578_v28 }
 0x513   :  { %v3166_v5 = vpop.xlane.xlu0 %3165 }
 0x514   :  { %v3581_v46 = vperm.slane %v3166_v5, %v5979_v7  ;;  %v4567_v7 = vld [vmem:[%s7495_s5] sm:$0xff] }
 0x515   :  { %3808 = vmatpush.bf16.msra.mxu2 %v4567_v7 }
 0x516   :  { %v3582_v4 = vsel %vm3243_vm14, %v3581_v46, %v3580_v36 }
 0x51b   :  { %v3169_v44 = vpop.xlane.xlu1 %3168 }
 0x51c   :  { %v3583_v30 = vperm.slane %v3169_v44, %v7703_v33  ;;  %v3618_v33 = vld [vmem:[%s7497_s4] sm:$0x3] }
 0x51d   :  { %v3620_v45 = vperm.slane %v3618_v33, 0  ;;  %v3621_v48 = vperm.slane %v3618_v33, 1 }
 0x51e   :  { %v3584_v8 = vsel %vm3247_vm15, %v3583_v30, %v3582_v4 }
 0x51f   :  { %v3599_v17 = vsel %vm3598_vm2, %v7393_v60, %v3584_v8 }
 0x520   :  { %v3600_v59 = vmul.f32 0.015625, %v3599_v17 }
 0x522   :  { %v3601_v34 = vpack.c.bf16 %v3600_v59, %v3600_v59 }
 0x524   :  { %3712 = vmatmul.bf16.vlgmr.msra.gmra.mxu0 %v3601_v34  ;;  %3725 = vmatmul.bf16.vlgmr.msra.gmra.mxu1 %v3601_v34 }
 0x5a1   :  { %v3713_v63 = vpop.f32.mrf.mxu0  ;;  %v3726_v16 = vpop.f32.mrf.mxu1 }
 0x5a2   :  { %v3714_v9 = vadd.f32 %v3713_v63, %v3620_v45  ;;  %v3727_v14 = vadd.f32 %v3726_v16, %v3621_v48 }
 0x5a4   :  { %v3730_v10 = vmax.f32 %v3714_v9, 0.0  ;;  %v3731_v32 = vmax.f32 %v3727_v14, 0.0 }
 0x5a6   :  { %v3732_v20 = vpack.c.bf16 %v3731_v32, %v3730_v10 }
 0x5a8   :  { %3809 = vmatmul.bf16.vlgmr.msra.gmra.mxu2 %v3732_v20 }
 0x5a9   :  { %v3715_v60 = vpop.f32.mrf.mxu0  ;;  %v3728_v54 = vpop.f32.mrf.mxu1 }
 0x62b   :  { %v3810_v52 = vpop.f32.mrf.mxu2 }
 0x62c   :  { %v3811_v24 = vadd.f32 %v4579_v27, %v3810_v52 }
 0x62e   :  { %v3819_v37 = vsel %vm3815_vm3, %v3811_v24, -1e+30 }
 0x62f   :  { %3820 = vmax.xlane.f32.xlu2 %v3819_v37 }
 0x633   :  { %v3812_v12 = vpop.f32.mrf.mxu2 }
 0x634   :  { %v3813_v25 = vadd.f32 %v4579_v27, %v3812_v12 }
 0x636   :  { %v3830_v62 = vsel %vm7478_vm6, %v3813_v25, -1e+30 }
 0x637   :  { %3831 = vmax.xlane.f32.xlu0 %v3830_v62 }
 0x6a2   :  { %v3821_v57 = vpop.xlane.xlu2 %3820 }
 0x6a3   :  { %v3822_v13 = vsub.f32 %v3819_v37, %v3821_v57 }
 0x6a5   :  { %v3823_v21 = vmul.f32 1.442695, %v3822_v13 }
 0x6a7   :  { %4580 = vpow2.f32 %v3823_v21 }
 0x6aa   :  { %v3832_v3 = vpop.xlane.xlu0 %3831 }
 0x6ab   :  { %v3833_v11 = vsub.f32 %v3830_v62, %v3832_v3 }
 0x6ad   :  { %v4581_v58 = vpop.eup %4580  ;;  %v3834_v29 = vmul.f32 1.442695, %v3833_v11 }
 0x6ae   :  { %v3825_v6 = vsel %vm3815_vm3, %v4581_v58, 0.0 }
 0x6af   :  { %4582 = vpow2.f32 %v3834_v29  ;;  %3826 = vadd.xlane.f32.xlu1 %v3825_v6 }
 0x6b5   :  { %v4583_v39 = vpop.eup %4582 }
 0x6b6   :  { %v3836_v15 = vsel %vm7478_vm6, %v4583_v39, 0.0 }
 0x6b7   :  { %3837 = vadd.xlane.f32.xlu2 %v3836_v15 }
 0x722   :  { %v3827_v38 = vpop.xlane.xlu1 %3826 }
 0x723   :  { %4584 = vrcp.f32 %v3827_v38 }
 0x729   :  { %v4585_v61 = vpop.eup %4584 }
 0x72a   :  { %v3838_v18 = vpop.xlane.xlu2 %3837  ;;  %v3829_v49 = vmul.f32 %v4585_v61, %v3825_v6 }
 0x72b   :  { %4586 = vrcp.f32 %v3838_v18 }
 0x731   :  { %v4587_v40 = vpop.eup %4586 }
 0x732   :  { %v3840_v22 = vmul.f32 %v4587_v40, %v3836_v15 }
 0x734   :  { %v3841_v53 = vadd.f32 %v3840_v22, %v3829_v49 }
 0x736   :  { %3842 = vst [vmem:[%s7498_s7] sm:$0xff] %v3841_v53 }

</bundles_post_ra>
